<compile_context>
chip_gen: v6e
topology: v6e:2x2x1
jax: 0.10.0
libtpu: 0.0.40
codegen_flags: <defaults>
</compile_context>

<pallas_src>
import math
import functools

import jax
import jax.numpy as jnp
from jax import lax
from jax.experimental import pallas as pl
from jax.experimental.pallas import tpu as pltpu  # noqa: F401  (TPU backend)

# ----------------------------- config ---------------------------------------
VOCAB_SIZE = 64
N_EMBED    = 32
N_HEAD     = 4
N_LAYER    = 2
BLOCK_SIZE = 16
HEAD_DIM   = N_EMBED // N_HEAD
HIDDEN_DIM = int(2 * (4 * N_EMBED) / 3)            # = 85, exactly as the PyTorch FeedForward
HIDDEN_PAD = ((HIDDEN_DIM + 127) // 128) * 128     # = 128, lane-aligned (zero-padded, exact)
RMS_EPS    = 1.1920928955078125e-07                # torch.finfo(float32).eps (nn.RMSNorm eps=None)


# ----------------------------- fused kernel ----------------------------------
def _rms_norm(x, g):
    ms = jnp.mean(x * x, axis=-1, keepdims=True)
    return x * lax.rsqrt(ms + RMS_EPS) * g


def _gpt_kernel(*refs, B, T, n_layer):
    """Whole-model forward on VMEM-resident values.

    refs = [idx(N,1) i32, wte(V,C), wte_T(C,V), rot_cos(nh,hd/2), rot_sin(nh,hd/2),
            per-layer: ln1_g, attn_w(C,3C), proj_w(C,C), ln2_g, w13(C,2Hp), w2(Hp,C),
            lnf_g(1,C),  logits_out(N,V)]
    """
    C, NH, HD, HH = N_EMBED, N_HEAD, HEAD_DIM, HEAD_DIM // 2
    N = B * T
    scale = 1.0 / math.sqrt(HD)

    idx_ref, wte_ref, wte_t_ref, cos_ref, sin_ref = refs[0:5]
    layer_refs = refs[5:5 + 6 * n_layer]
    lnf_ref    = refs[5 + 6 * n_layer]
    logits_ref = refs[6 + 6 * n_layer]

    # --- token embedding via one-hot @ wte (MXU-friendly, keeps gather in-kernel) ---
    ids = idx_ref[...]                                                   # (N, 1) int32
    vocab_iota = lax.broadcasted_iota(jnp.int32, (N, VOCAB_SIZE), 1)
    onehot = (vocab_iota == ids).astype(jnp.float32)
    x = jnp.dot(onehot, wte_ref[...], preferred_element_type=jnp.float32)  # (N, C)

    cos = cos_ref[...]                                                   # (NH, HD//2)
    sin = sin_ref[...]

    # causal mask, shared across layers/heads
    row = lax.broadcasted_iota(jnp.int32, (T, T), 0)
    col = lax.broadcasted_iota(jnp.int32, (T, T), 1)
    causal = row >= col

    for l in range(n_layer):
        ln1_g, attn_w, proj_w, ln2_g, w13, w2 = layer_refs[6 * l: 6 * l + 6]

        # ---------- attention sub-block ----------
        h = _rms_norm(x, ln1_g[...])
        qkv = jnp.dot(h, attn_w[...], preferred_element_type=jnp.float32)   # (N, 3C)

        y_rows = []
        for b in range(B):
            r0 = b * T
            head_outs = []
            for hi in range(NH):
                c0 = hi * HD
                qh = qkv[r0:r0 + T, c0:c0 + HD]                 # (T, HD)
                kh = qkv[r0:r0 + T, C + c0:C + c0 + HD]
                vh = qkv[r0:r0 + T, 2 * C + c0:2 * C + c0 + HD]

                # rotary: angle depends on head index (faithful to the reference, which
                # takes seq_len AFTER the (B, nh, T, hd) transpose).
                ch = cos[hi:hi + 1, :]                          # (1, HD//2)
                sh = sin[hi:hi + 1, :]
                q1, q2 = qh[:, :HH], qh[:, HH:]
                k1, k2 = kh[:, :HH], kh[:, HH:]
                qr = jnp.concatenate([q1 * ch + q2 * sh, -q1 * sh + q2 * ch], axis=-1)
                kr = jnp.concatenate([k1 * ch + k2 * sh, -k1 * sh + k2 * ch], axis=-1)

                s = jnp.dot(qr, kr.T, preferred_element_type=jnp.float32) * scale
                s = jnp.where(causal, s, -jnp.inf)
                m = jnp.max(s, axis=-1, keepdims=True)
                p = jnp.exp(s - m)
                p = p * pl.reciprocal(jnp.sum(p, axis=-1, keepdims=True), approx=True)
                head_outs.append(jnp.dot(p, vh, preferred_element_type=jnp.float32))
            y_rows.append(jnp.concatenate(head_outs, axis=-1))   # (T, C)
        y = jnp.concatenate(y_rows, axis=0)                      # (N, C)

        x = x + jnp.dot(y, proj_w[...], preferred_element_type=jnp.float32)

        # ---------- SwiGLU MLP sub-block ----------
        h = _rms_norm(x, ln2_g[...])
        h13 = jnp.dot(h, w13[...], preferred_element_type=jnp.float32)   # (N, 2*HIDDEN_PAD)
        h1 = h13[:, :HIDDEN_PAD]
        h3 = h13[:, HIDDEN_PAD:]
        g = (h1 * jax.nn.sigmoid(h1)) * h3
        x = x + jnp.dot(g, w2[...], preferred_element_type=jnp.float32)

    # ---------- final RMSNorm + tied lm_head (pre-transposed weight) ----------
    xf = _rms_norm(x, lnf_ref[...])
    logits_ref[...] = jnp.dot(xf, wte_t_ref[...], preferred_element_type=jnp.float32)


# ----------------------------- wrapper ---------------------------------------
def gpt_forward(params, idx):
    """Inference forward (targets=None): returns logits of shape (B, 1, vocab)."""
    B, T = idx.shape
    N = B * T

    inputs = [idx.reshape(N, 1).astype(jnp.int32),
              params["wte"], params["wte_t"],
              params["rot_cos"], params["rot_sin"]]
    for lp in params["layers"]:
        inputs += [lp["ln1_g"], lp["attn_w"], lp["proj_w"], lp["ln2_g"], lp["w13"], lp["w2"]]
    inputs.append(params["lnf_g"])

    kernel = functools.partial(_gpt_kernel, B=B, T=T, n_layer=len(params["layers"]))
    logits_all = pl.pallas_call(
        kernel,
        out_shape=jax.ShapeDtypeStruct((N, VOCAB_SIZE), jnp.float32),
    )(*inputs)

    # reference returns lm_head(x[:, [-1], :]) only
    return logits_all.reshape(B, T, VOCAB_SIZE)[:, -1:, :]


# ----------------------------- parameter init --------------------------------
def init_params(key):
    def normal(k, shape, std=0.02):
        return std * jax.random.normal(k, shape, dtype=jnp.float32)

    keys = jax.random.split(key, 1 + 6 * N_LAYER)
    wte = normal(keys[0], (VOCAB_SIZE, N_EMBED))           # tied with lm_head
    proj_std = 0.02 / math.sqrt(2 * N_LAYER)
    pad = HIDDEN_PAD - HIDDEN_DIM

    layers = []
    for l in range(N_LAYER):
        k = keys[1 + 6 * l: 1 + 6 * (l + 1)]
        w1 = normal(k[2], (N_EMBED, HIDDEN_DIM))
        w3 = normal(k[3], (N_EMBED, HIDDEN_DIM))
        w2 = normal(k[4], (HIDDEN_DIM, N_EMBED))
        # zero-pad hidden dim 85 -> 128 (silu(0)*0 = 0 and padded w2 rows are 0: exact)
        w13 = jnp.concatenate([jnp.pad(w1, ((0, 0), (0, pad))),
                               jnp.pad(w3, ((0, 0), (0, pad)))], axis=1)   # (C, 2*Hp)
        w2p = jnp.pad(w2, ((0, pad), (0, 0)))                               # (Hp, C)
        layers.append({
            "ln1_g":  jnp.ones((1, N_EMBED), jnp.float32),
            # weights stored pre-transposed: y = x @ W, W shape (C_in, C_out)
            "attn_w": normal(k[0], (N_EMBED, 3 * N_EMBED)),
            "proj_w": normal(k[1], (N_EMBED, N_EMBED), std=proj_std),
            "ln2_g":  jnp.ones((1, N_EMBED), jnp.float32),
            "w13":    w13,
            "w2":     w2p,
        })

    # Rotary cos/sin: faithful to the reference, where seq_len = q.shape[1] is taken
    # AFTER the transpose to (B, n_head, T, head_dim) -> angle depends on head index,
    # which is static, so compute once here.
    inv_freq = jnp.array([1.0 / (10000.0 ** e) for e in range(0, HEAD_DIM, 2)],
                         dtype=jnp.float32)
    t = jnp.arange(N_HEAD, dtype=jnp.float32)
    freqs = jnp.outer(t, inv_freq)                           # (n_head, head_dim // 2)

    return {
        "wte":     wte,
        "wte_t":   wte.T,                                    # tied lm_head, pre-transposed once
        "rot_cos": jnp.cos(freqs),
        "rot_sin": jnp.sin(freqs),
        "layers":  layers,
        "lnf_g":   jnp.ones((1, N_EMBED), jnp.float32),
    }


# ----------------------------- main ------------------------------------------
if __name__ == "__main__":
    key = jax.random.PRNGKey(0)
    pkey, ikey = jax.random.split(key)
    params = init_params(pkey)

    B, T = 2, 8
    idx = jax.random.randint(ikey, (B, T), 0, VOCAB_SIZE, dtype=jnp.int32)

    logits = jax.jit(gpt_forward)(params, idx)
    jax.block_until_ready(logits)
    assert logits.shape == (B, 1, VOCAB_SIZE)
    # TODO(synk): training path (targets/cross-entropy) and generate() sampling are not kernelized.
    print("KERNEL_OK")
</pallas_src>

<mosaic_0001>
module attributes {stable_mosaic.version = 11 : i64} {
  func.func @_gpt_kernel(%arg0: memref<16x1xi32, #tpu.memory_space<vmem>>, %arg1: memref<64x32xf32, #tpu.memory_space<vmem>>, %arg2: memref<32x64xf32, #tpu.memory_space<vmem>>, %arg3: memref<4x4xf32, #tpu.memory_space<vmem>>, %arg4: memref<4x4xf32, #tpu.memory_space<vmem>>, %arg5: memref<1x32xf32, #tpu.memory_space<vmem>>, %arg6: memref<32x96xf32, #tpu.memory_space<vmem>>, %arg7: memref<32x32xf32, #tpu.memory_space<vmem>>, %arg8: memref<1x32xf32, #tpu.memory_space<vmem>>, %arg9: memref<32x256xf32, #tpu.memory_space<vmem>>, %arg10: memref<128x32xf32, #tpu.memory_space<vmem>>, %arg11: memref<1x32xf32, #tpu.memory_space<vmem>>, %arg12: memref<32x96xf32, #tpu.memory_space<vmem>>, %arg13: memref<32x32xf32, #tpu.memory_space<vmem>>, %arg14: memref<1x32xf32, #tpu.memory_space<vmem>>, %arg15: memref<32x256xf32, #tpu.memory_space<vmem>>, %arg16: memref<128x32xf32, #tpu.memory_space<vmem>>, %arg17: memref<1x32xf32, #tpu.memory_space<vmem>>, %arg18: memref<16x64xf32, #tpu.memory_space<vmem>>) attributes {dimension_semantics = [], scalar_prefetch = 0 : i64, scratch_operands = 0 : i64, tpu.core_type = #tpu.core_type<tc>} {
    %c0 = arith.constant 0 : index
    %c0_0 = arith.constant 0 : index
    %0 = vector.load %arg0[%c0, %c0_0] : memref<16x1xi32, #tpu.memory_space<vmem>>, vector<16x1xi32>
    %1 = tpu.iota {dimensions = array<i32: 1>} : vector<16x64xi32>
    %2 = vector.broadcast %0 : vector<16x1xi32> to vector<16x64xi32>
    %3 = arith.cmpi eq, %1, %2 : vector<16x64xi32>
    %4 = arith.extui %3 : vector<16x64xi1> to vector<16x64xi32>
    %5 = arith.sitofp %4 : vector<16x64xi32> to vector<16x64xf32>
    %c0_1 = arith.constant 0 : index
    %c0_2 = arith.constant 0 : index
    %6 = vector.load %arg1[%c0_1, %c0_2] : memref<64x32xf32, #tpu.memory_space<vmem>>, vector<64x32xf32>
    %cst = arith.constant dense<0.000000e+00> : vector<16x32xf32>
    %7 = tpu.matmul %5, %6, %cst {dimension_numbers = #tpu.dot_dimension_numbers<[1], [0], [0], [1], [0, 0, 1, 1], [], []>} : vector<16x64xf32>, vector<64x32xf32>, vector<16x32xf32> -> vector<16x32xf32>
    %c0_3 = arith.constant 0 : index
    %c0_4 = arith.constant 0 : index
    %8 = vector.load %arg3[%c0_3, %c0_4] : memref<4x4xf32, #tpu.memory_space<vmem>>, vector<4x4xf32>
    %c0_5 = arith.constant 0 : index
    %c0_6 = arith.constant 0 : index
    %9 = vector.load %arg4[%c0_5, %c0_6] : memref<4x4xf32, #tpu.memory_space<vmem>>, vector<4x4xf32>
    %10 = tpu.iota {dimensions = array<i32: 0>} : vector<8x8xi32>
    %11 = tpu.iota {dimensions = array<i32: 1>} : vector<8x8xi32>
    %12 = arith.cmpi sge, %10, %11 : vector<8x8xi32>
    %c0_7 = arith.constant 0 : index
    %c0_8 = arith.constant 0 : index
    %13 = vector.load %arg5[%c0_7, %c0_8] : memref<1x32xf32, #tpu.memory_space<vmem>>, vector<1x32xf32>
    %14 = arith.mulf %7, %7 : vector<16x32xf32>
    %cst_9 = arith.constant dense<0.000000e+00> : vector<16xf32>
    %15 = vector.multi_reduction <add>, %14, %cst_9 [1] : vector<16x32xf32> to vector<16xf32>
    %16 = vector.shape_cast %15 : vector<16xf32> to vector<16x1xf32>
    %cst_10 = arith.constant 3.200000e+01 : f32
    %17 = vector.broadcast %cst_10 : f32 to vector<16x1xf32>
    %18 = arith.divf %16, %17 : vector<16x1xf32>
    %cst_11 = arith.constant 1.1920929E-7 : f32
    %19 = vector.broadcast %cst_11 : f32 to vector<16x1xf32>
    %20 = arith.addf %18, %19 : vector<16x1xf32>
    %21 = math.rsqrt %20 : vector<16x1xf32>
    %22 = vector.broadcast %21 : vector<16x1xf32> to vector<16x32xf32>
    %23 = arith.mulf %7, %22 : vector<16x32xf32>
    %24 = vector.broadcast %13 : vector<1x32xf32> to vector<16x32xf32>
    %25 = arith.mulf %23, %24 : vector<16x32xf32>
    %c0_12 = arith.constant 0 : index
    %c0_13 = arith.constant 0 : index
    %26 = vector.load %arg6[%c0_12, %c0_13] : memref<32x96xf32, #tpu.memory_space<vmem>>, vector<32x96xf32>
    %cst_14 = arith.constant dense<0.000000e+00> : vector<16x96xf32>
    %27 = tpu.matmul %25, %26, %cst_14 {dimension_numbers = #tpu.dot_dimension_numbers<[1], [0], [0], [1], [0, 0, 1, 1], [], []>} : vector<16x32xf32>, vector<32x96xf32>, vector<16x96xf32> -> vector<16x96xf32>
    %28 = vector.extract_strided_slice %27 {offsets = [0, 0], sizes = [8, 8], strides = [1, 1]} : vector<16x96xf32> to vector<8x8xf32>
    %29 = vector.extract_strided_slice %27 {offsets = [0, 32], sizes = [8, 8], strides = [1, 1]} : vector<16x96xf32> to vector<8x8xf32>
    %30 = vector.extract_strided_slice %27 {offsets = [0, 64], sizes = [8, 8], strides = [1, 1]} : vector<16x96xf32> to vector<8x8xf32>
    %31 = vector.extract_strided_slice %8 {offsets = [0, 0], sizes = [1, 4], strides = [1, 1]} : vector<4x4xf32> to vector<1x4xf32>
    %32 = vector.extract_strided_slice %9 {offsets = [0, 0], sizes = [1, 4], strides = [1, 1]} : vector<4x4xf32> to vector<1x4xf32>
    %33 = vector.extract_strided_slice %28 {offsets = [0, 0], sizes = [8, 4], strides = [1, 1]} : vector<8x8xf32> to vector<8x4xf32>
    %34 = vector.extract_strided_slice %28 {offsets = [0, 4], sizes = [8, 4], strides = [1, 1]} : vector<8x8xf32> to vector<8x4xf32>
    %35 = vector.extract_strided_slice %29 {offsets = [0, 0], sizes = [8, 4], strides = [1, 1]} : vector<8x8xf32> to vector<8x4xf32>
    %36 = vector.extract_strided_slice %29 {offsets = [0, 4], sizes = [8, 4], strides = [1, 1]} : vector<8x8xf32> to vector<8x4xf32>
    %37 = vector.broadcast %31 : vector<1x4xf32> to vector<8x4xf32>
    %38 = arith.mulf %33, %37 : vector<8x4xf32>
    %39 = vector.broadcast %32 : vector<1x4xf32> to vector<8x4xf32>
    %40 = arith.mulf %34, %39 : vector<8x4xf32>
    %41 = arith.addf %38, %40 : vector<8x4xf32>
    %cst_15 = arith.constant 0.000000e+00 : f32
    %42 = vector.broadcast %cst_15 : f32 to vector<8x4xf32>
    %43 = arith.subf %42, %33 : vector<8x4xf32>
    %44 = vector.broadcast %32 : vector<1x4xf32> to vector<8x4xf32>
    %45 = arith.mulf %43, %44 : vector<8x4xf32>
    %46 = vector.broadcast %31 : vector<1x4xf32> to vector<8x4xf32>
    %47 = arith.mulf %34, %46 : vector<8x4xf32>
    %48 = arith.addf %45, %47 : vector<8x4xf32>
    %49 = tpu.concatenate %41, %48 in 1 : vector<8x4xf32>, vector<8x4xf32> -> vector<8x8xf32>
    %50 = vector.broadcast %31 : vector<1x4xf32> to vector<8x4xf32>
    %51 = arith.mulf %35, %50 : vector<8x4xf32>
    %52 = vector.broadcast %32 : vector<1x4xf32> to vector<8x4xf32>
    %53 = arith.mulf %36, %52 : vector<8x4xf32>
    %54 = arith.addf %51, %53 : vector<8x4xf32>
    %cst_16 = arith.constant 0.000000e+00 : f32
    %55 = vector.broadcast %cst_16 : f32 to vector<8x4xf32>
    %56 = arith.subf %55, %35 : vector<8x4xf32>
    %57 = vector.broadcast %32 : vector<1x4xf32> to vector<8x4xf32>
    %58 = arith.mulf %56, %57 : vector<8x4xf32>
    %59 = vector.broadcast %31 : vector<1x4xf32> to vector<8x4xf32>
    %60 = arith.mulf %36, %59 : vector<8x4xf32>
    %61 = arith.addf %58, %60 : vector<8x4xf32>
    %62 = tpu.concatenate %54, %61 in 1 : vector<8x4xf32>, vector<8x4xf32> -> vector<8x8xf32>
    %63 = tpu.transpose %62, [1, 0] : vector<8x8xf32> -> vector<8x8xf32>
    %cst_17 = arith.constant dense<0.000000e+00> : vector<8x8xf32>
    %64 = tpu.matmul %49, %63, %cst_17 {dimension_numbers = #tpu.dot_dimension_numbers<[1], [0], [0], [1], [0, 0, 1, 1], [], []>} : vector<8x8xf32>, vector<8x8xf32>, vector<8x8xf32> -> vector<8x8xf32>
    %cst_18 = arith.constant 0.353553385 : f32
    %65 = vector.broadcast %cst_18 : f32 to vector<8x8xf32>
    %66 = arith.mulf %64, %65 : vector<8x8xf32>
    %cst_19 = arith.constant 0xFF800000 : f32
    %67 = vector.broadcast %cst_19 : f32 to vector<8x8xf32>
    %68 = arith.select %12, %66, %67 : vector<8x8xi1>, vector<8x8xf32>
    %cst_20 = arith.constant dense<0xFF800000> : vector<8xf32>
    %69 = vector.multi_reduction <maximumf>, %68, %cst_20 [1] : vector<8x8xf32> to vector<8xf32>
    %70 = vector.shape_cast %69 : vector<8xf32> to vector<8x1xf32>
    %71 = vector.broadcast %70 : vector<8x1xf32> to vector<8x8xf32>
    %72 = arith.subf %68, %71 : vector<8x8xf32>
    %73 = math.exp %72 : vector<8x8xf32>
    %cst_21 = arith.constant dense<0.000000e+00> : vector<8xf32>
    %74 = vector.multi_reduction <add>, %73, %cst_21 [1] : vector<8x8xf32> to vector<8xf32>
    %75 = vector.shape_cast %74 : vector<8xf32> to vector<8x1xf32>
    %76 = tpu.reciprocal %75 {approx = true} : vector<8x1xf32> -> vector<8x1xf32>
    %77 = vector.broadcast %76 : vector<8x1xf32> to vector<8x8xf32>
    %78 = arith.mulf %73, %77 : vector<8x8xf32>
    %cst_22 = arith.constant dense<0.000000e+00> : vector<8x8xf32>
    %79 = tpu.matmul %78, %30, %cst_22 {dimension_numbers = #tpu.dot_dimension_numbers<[1], [0], [0], [1], [0, 0, 1, 1], [], []>} : vector<8x8xf32>, vector<8x8xf32>, vector<8x8xf32> -> vector<8x8xf32>
    %80 = vector.extract_strided_slice %27 {offsets = [0, 8], sizes = [8, 8], strides = [1, 1]} : vector<16x96xf32> to vector<8x8xf32>
    %81 = vector.extract_strided_slice %27 {offsets = [0, 40], sizes = [8, 8], strides = [1, 1]} : vector<16x96xf32> to vector<8x8xf32>
    %82 = vector.extract_strided_slice %27 {offsets = [0, 72], sizes = [8, 8], strides = [1, 1]} : vector<16x96xf32> to vector<8x8xf32>
    %83 = vector.extract_strided_slice %8 {offsets = [1, 0], sizes = [1, 4], strides = [1, 1]} : vector<4x4xf32> to vector<1x4xf32>
    %84 = vector.extract_strided_slice %9 {offsets = [1, 0], sizes = [1, 4], strides = [1, 1]} : vector<4x4xf32> to vector<1x4xf32>
    %85 = vector.extract_strided_slice %80 {offsets = [0, 0], sizes = [8, 4], strides = [1, 1]} : vector<8x8xf32> to vector<8x4xf32>
    %86 = vector.extract_strided_slice %80 {offsets = [0, 4], sizes = [8, 4], strides = [1, 1]} : vector<8x8xf32> to vector<8x4xf32>
    %87 = vector.extract_strided_slice %81 {offsets = [0, 0], sizes = [8, 4], strides = [1, 1]} : vector<8x8xf32> to vector<8x4xf32>
    %88 = vector.extract_strided_slice %81 {offsets = [0, 4], sizes = [8, 4], strides = [1, 1]} : vector<8x8xf32> to vector<8x4xf32>
    %89 = vector.broadcast %83 : vector<1x4xf32> to vector<8x4xf32>
    %90 = arith.mulf %85, %89 : vector<8x4xf32>
    %91 = vector.broadcast %84 : vector<1x4xf32> to vector<8x4xf32>
    %92 = arith.mulf %86, %91 : vector<8x4xf32>
    %93 = arith.addf %90, %92 : vector<8x4xf32>
    %cst_23 = arith.constant 0.000000e+00 : f32
    %94 = vector.broadcast %cst_23 : f32 to vector<8x4xf32>
    %95 = arith.subf %94, %85 : vector<8x4xf32>
    %96 = vector.broadcast %84 : vector<1x4xf32> to vector<8x4xf32>
    %97 = arith.mulf %95, %96 : vector<8x4xf32>
    %98 = vector.broadcast %83 : vector<1x4xf32> to vector<8x4xf32>
    %99 = arith.mulf %86, %98 : vector<8x4xf32>
    %100 = arith.addf %97, %99 : vector<8x4xf32>
    %101 = tpu.concatenate %93, %100 in 1 : vector<8x4xf32>, vector<8x4xf32> -> vector<8x8xf32>
    %102 = vector.broadcast %83 : vector<1x4xf32> to vector<8x4xf32>
    %103 = arith.mulf %87, %102 : vector<8x4xf32>
    %104 = vector.broadcast %84 : vector<1x4xf32> to vector<8x4xf32>
    %105 = arith.mulf %88, %104 : vector<8x4xf32>
    %106 = arith.addf %103, %105 : vector<8x4xf32>
    %cst_24 = arith.constant 0.000000e+00 : f32
    %107 = vector.broadcast %cst_24 : f32 to vector<8x4xf32>
    %108 = arith.subf %107, %87 : vector<8x4xf32>
    %109 = vector.broadcast %84 : vector<1x4xf32> to vector<8x4xf32>
    %110 = arith.mulf %108, %109 : vector<8x4xf32>
    %111 = vector.broadcast %83 : vector<1x4xf32> to vector<8x4xf32>
    %112 = arith.mulf %88, %111 : vector<8x4xf32>
    %113 = arith.addf %110, %112 : vector<8x4xf32>
    %114 = tpu.concatenate %106, %113 in 1 : vector<8x4xf32>, vector<8x4xf32> -> vector<8x8xf32>
    %115 = tpu.transpose %114, [1, 0] : vector<8x8xf32> -> vector<8x8xf32>
    %cst_25 = arith.constant dense<0.000000e+00> : vector<8x8xf32>
    %116 = tpu.matmul %101, %115, %cst_25 {dimension_numbers = #tpu.dot_dimension_numbers<[1], [0], [0], [1], [0, 0, 1, 1], [], []>} : vector<8x8xf32>, vector<8x8xf32>, vector<8x8xf32> -> vector<8x8xf32>
    %cst_26 = arith.constant 0.353553385 : f32
    %117 = vector.broadcast %cst_26 : f32 to vector<8x8xf32>
    %118 = arith.mulf %116, %117 : vector<8x8xf32>
    %cst_27 = arith.constant 0xFF800000 : f32
    %119 = vector.broadcast %cst_27 : f32 to vector<8x8xf32>
    %120 = arith.select %12, %118, %119 : vector<8x8xi1>, vector<8x8xf32>
    %cst_28 = arith.constant dense<0xFF800000> : vector<8xf32>
    %121 = vector.multi_reduction <maximumf>, %120, %cst_28 [1] : vector<8x8xf32> to vector<8xf32>
    %122 = vector.shape_cast %121 : vector<8xf32> to vector<8x1xf32>
    %123 = vector.broadcast %122 : vector<8x1xf32> to vector<8x8xf32>
    %124 = arith.subf %120, %123 : vector<8x8xf32>
    %125 = math.exp %124 : vector<8x8xf32>
    %cst_29 = arith.constant dense<0.000000e+00> : vector<8xf32>
    %126 = vector.multi_reduction <add>, %125, %cst_29 [1] : vector<8x8xf32> to vector<8xf32>
    %127 = vector.shape_cast %126 : vector<8xf32> to vector<8x1xf32>
    %128 = tpu.reciprocal %127 {approx = true} : vector<8x1xf32> -> vector<8x1xf32>
    %129 = vector.broadcast %128 : vector<8x1xf32> to vector<8x8xf32>
    %130 = arith.mulf %125, %129 : vector<8x8xf32>
    %cst_30 = arith.constant dense<0.000000e+00> : vector<8x8xf32>
    %131 = tpu.matmul %130, %82, %cst_30 {dimension_numbers = #tpu.dot_dimension_numbers<[1], [0], [0], [1], [0, 0, 1, 1], [], []>} : vector<8x8xf32>, vector<8x8xf32>, vector<8x8xf32> -> vector<8x8xf32>
    %132 = vector.extract_strided_slice %27 {offsets = [0, 16], sizes = [8, 8], strides = [1, 1]} : vector<16x96xf32> to vector<8x8xf32>
    %133 = vector.extract_strided_slice %27 {offsets = [0, 48], sizes = [8, 8], strides = [1, 1]} : vector<16x96xf32> to vector<8x8xf32>
    %134 = vector.extract_strided_slice %27 {offsets = [0, 80], sizes = [8, 8], strides = [1, 1]} : vector<16x96xf32> to vector<8x8xf32>
    %135 = vector.extract_strided_slice %8 {offsets = [2, 0], sizes = [1, 4], strides = [1, 1]} : vector<4x4xf32> to vector<1x4xf32>
    %136 = vector.extract_strided_slice %9 {offsets = [2, 0], sizes = [1, 4], strides = [1, 1]} : vector<4x4xf32> to vector<1x4xf32>
    %137 = vector.extract_strided_slice %132 {offsets = [0, 0], sizes = [8, 4], strides = [1, 1]} : vector<8x8xf32> to vector<8x4xf32>
    %138 = vector.extract_strided_slice %132 {offsets = [0, 4], sizes = [8, 4], strides = [1, 1]} : vector<8x8xf32> to vector<8x4xf32>
    %139 = vector.extract_strided_slice %133 {offsets = [0, 0], sizes = [8, 4], strides = [1, 1]} : vector<8x8xf32> to vector<8x4xf32>
    %140 = vector.extract_strided_slice %133 {offsets = [0, 4], sizes = [8, 4], strides = [1, 1]} : vector<8x8xf32> to vector<8x4xf32>
    %141 = vector.broadcast %135 : vector<1x4xf32> to vector<8x4xf32>
    %142 = arith.mulf %137, %141 : vector<8x4xf32>
    %143 = vector.broadcast %136 : vector<1x4xf32> to vector<8x4xf32>
    %144 = arith.mulf %138, %143 : vector<8x4xf32>
    %145 = arith.addf %142, %144 : vector<8x4xf32>
    %cst_31 = arith.constant 0.000000e+00 : f32
    %146 = vector.broadcast %cst_31 : f32 to vector<8x4xf32>
    %147 = arith.subf %146, %137 : vector<8x4xf32>
    %148 = vector.broadcast %136 : vector<1x4xf32> to vector<8x4xf32>
    %149 = arith.mulf %147, %148 : vector<8x4xf32>
    %150 = vector.broadcast %135 : vector<1x4xf32> to vector<8x4xf32>
    %151 = arith.mulf %138, %150 : vector<8x4xf32>
    %152 = arith.addf %149, %151 : vector<8x4xf32>
    %153 = tpu.concatenate %145, %152 in 1 : vector<8x4xf32>, vector<8x4xf32> -> vector<8x8xf32>
    %154 = vector.broadcast %135 : vector<1x4xf32> to vector<8x4xf32>
    %155 = arith.mulf %139, %154 : vector<8x4xf32>
    %156 = vector.broadcast %136 : vector<1x4xf32> to vector<8x4xf32>
    %157 = arith.mulf %140, %156 : vector<8x4xf32>
    %158 = arith.addf %155, %157 : vector<8x4xf32>
    %cst_32 = arith.constant 0.000000e+00 : f32
    %159 = vector.broadcast %cst_32 : f32 to vector<8x4xf32>
    %160 = arith.subf %159, %139 : vector<8x4xf32>
    %161 = vector.broadcast %136 : vector<1x4xf32> to vector<8x4xf32>
    %162 = arith.mulf %160, %161 : vector<8x4xf32>
    %163 = vector.broadcast %135 : vector<1x4xf32> to vector<8x4xf32>
    %164 = arith.mulf %140, %163 : vector<8x4xf32>
    %165 = arith.addf %162, %164 : vector<8x4xf32>
    %166 = tpu.concatenate %158, %165 in 1 : vector<8x4xf32>, vector<8x4xf32> -> vector<8x8xf32>
    %167 = tpu.transpose %166, [1, 0] : vector<8x8xf32> -> vector<8x8xf32>
    %cst_33 = arith.constant dense<0.000000e+00> : vector<8x8xf32>
    %168 = tpu.matmul %153, %167, %cst_33 {dimension_numbers = #tpu.dot_dimension_numbers<[1], [0], [0], [1], [0, 0, 1, 1], [], []>} : vector<8x8xf32>, vector<8x8xf32>, vector<8x8xf32> -> vector<8x8xf32>
    %cst_34 = arith.constant 0.353553385 : f32
    %169 = vector.broadcast %cst_34 : f32 to vector<8x8xf32>
    %170 = arith.mulf %168, %169 : vector<8x8xf32>
    %cst_35 = arith.constant 0xFF800000 : f32
    %171 = vector.broadcast %cst_35 : f32 to vector<8x8xf32>
    %172 = arith.select %12, %170, %171 : vector<8x8xi1>, vector<8x8xf32>
    %cst_36 = arith.constant dense<0xFF800000> : vector<8xf32>
    %173 = vector.multi_reduction <maximumf>, %172, %cst_36 [1] : vector<8x8xf32> to vector<8xf32>
    %174 = vector.shape_cast %173 : vector<8xf32> to vector<8x1xf32>
    %175 = vector.broadcast %174 : vector<8x1xf32> to vector<8x8xf32>
    %176 = arith.subf %172, %175 : vector<8x8xf32>
    %177 = math.exp %176 : vector<8x8xf32>
    %cst_37 = arith.constant dense<0.000000e+00> : vector<8xf32>
    %178 = vector.multi_reduction <add>, %177, %cst_37 [1] : vector<8x8xf32> to vector<8xf32>
    %179 = vector.shape_cast %178 : vector<8xf32> to vector<8x1xf32>
    %180 = tpu.reciprocal %179 {approx = true} : vector<8x1xf32> -> vector<8x1xf32>
    %181 = vector.broadcast %180 : vector<8x1xf32> to vector<8x8xf32>
    %182 = arith.mulf %177, %181 : vector<8x8xf32>
    %cst_38 = arith.constant dense<0.000000e+00> : vector<8x8xf32>
    %183 = tpu.matmul %182, %134, %cst_38 {dimension_numbers = #tpu.dot_dimension_numbers<[1], [0], [0], [1], [0, 0, 1, 1], [], []>} : vector<8x8xf32>, vector<8x8xf32>, vector<8x8xf32> -> vector<8x8xf32>
    %184 = vector.extract_strided_slice %27 {offsets = [0, 24], sizes = [8, 8], strides = [1, 1]} : vector<16x96xf32> to vector<8x8xf32>
    %185 = vector.extract_strided_slice %27 {offsets = [0, 56], sizes = [8, 8], strides = [1, 1]} : vector<16x96xf32> to vector<8x8xf32>
    %186 = vector.extract_strided_slice %27 {offsets = [0, 88], sizes = [8, 8], strides = [1, 1]} : vector<16x96xf32> to vector<8x8xf32>
    %187 = vector.extract_strided_slice %8 {offsets = [3, 0], sizes = [1, 4], strides = [1, 1]} : vector<4x4xf32> to vector<1x4xf32>
    %188 = vector.extract_strided_slice %9 {offsets = [3, 0], sizes = [1, 4], strides = [1, 1]} : vector<4x4xf32> to vector<1x4xf32>
    %189 = vector.extract_strided_slice %184 {offsets = [0, 0], sizes = [8, 4], strides = [1, 1]} : vector<8x8xf32> to vector<8x4xf32>
    %190 = vector.extract_strided_slice %184 {offsets = [0, 4], sizes = [8, 4], strides = [1, 1]} : vector<8x8xf32> to vector<8x4xf32>
    %191 = vector.extract_strided_slice %185 {offsets = [0, 0], sizes = [8, 4], strides = [1, 1]} : vector<8x8xf32> to vector<8x4xf32>
    %192 = vector.extract_strided_slice %185 {offsets = [0, 4], sizes = [8, 4], strides = [1, 1]} : vector<8x8xf32> to vector<8x4xf32>
    %193 = vector.broadcast %187 : vector<1x4xf32> to vector<8x4xf32>
    %194 = arith.mulf %189, %193 : vector<8x4xf32>
    %195 = vector.broadcast %188 : vector<1x4xf32> to vector<8x4xf32>
    %196 = arith.mulf %190, %195 : vector<8x4xf32>
    %197 = arith.addf %194, %196 : vector<8x4xf32>
    %cst_39 = arith.constant 0.000000e+00 : f32
    %198 = vector.broadcast %cst_39 : f32 to vector<8x4xf32>
    %199 = arith.subf %198, %189 : vector<8x4xf32>
    %200 = vector.broadcast %188 : vector<1x4xf32> to vector<8x4xf32>
    %201 = arith.mulf %199, %200 : vector<8x4xf32>
    %202 = vector.broadcast %187 : vector<1x4xf32> to vector<8x4xf32>
    %203 = arith.mulf %190, %202 : vector<8x4xf32>
    %204 = arith.addf %201, %203 : vector<8x4xf32>
    %205 = tpu.concatenate %197, %204 in 1 : vector<8x4xf32>, vector<8x4xf32> -> vector<8x8xf32>
    %206 = vector.broadcast %187 : vector<1x4xf32> to vector<8x4xf32>
    %207 = arith.mulf %191, %206 : vector<8x4xf32>
    %208 = vector.broadcast %188 : vector<1x4xf32> to vector<8x4xf32>
    %209 = arith.mulf %192, %208 : vector<8x4xf32>
    %210 = arith.addf %207, %209 : vector<8x4xf32>
    %cst_40 = arith.constant 0.000000e+00 : f32
    %211 = vector.broadcast %cst_40 : f32 to vector<8x4xf32>
    %212 = arith.subf %211, %191 : vector<8x4xf32>
    %213 = vector.broadcast %188 : vector<1x4xf32> to vector<8x4xf32>
    %214 = arith.mulf %212, %213 : vector<8x4xf32>
    %215 = vector.broadcast %187 : vector<1x4xf32> to vector<8x4xf32>
    %216 = arith.mulf %192, %215 : vector<8x4xf32>
    %217 = arith.addf %214, %216 : vector<8x4xf32>
    %218 = tpu.concatenate %210, %217 in 1 : vector<8x4xf32>, vector<8x4xf32> -> vector<8x8xf32>
    %219 = tpu.transpose %218, [1, 0] : vector<8x8xf32> -> vector<8x8xf32>
    %cst_41 = arith.constant dense<0.000000e+00> : vector<8x8xf32>
    %220 = tpu.matmul %205, %219, %cst_41 {dimension_numbers = #tpu.dot_dimension_numbers<[1], [0], [0], [1], [0, 0, 1, 1], [], []>} : vector<8x8xf32>, vector<8x8xf32>, vector<8x8xf32> -> vector<8x8xf32>
    %cst_42 = arith.constant 0.353553385 : f32
    %221 = vector.broadcast %cst_42 : f32 to vector<8x8xf32>
    %222 = arith.mulf %220, %221 : vector<8x8xf32>
    %cst_43 = arith.constant 0xFF800000 : f32
    %223 = vector.broadcast %cst_43 : f32 to vector<8x8xf32>
    %224 = arith.select %12, %222, %223 : vector<8x8xi1>, vector<8x8xf32>
    %cst_44 = arith.constant dense<0xFF800000> : vector<8xf32>
    %225 = vector.multi_reduction <maximumf>, %224, %cst_44 [1] : vector<8x8xf32> to vector<8xf32>
    %226 = vector.shape_cast %225 : vector<8xf32> to vector<8x1xf32>
    %227 = vector.broadcast %226 : vector<8x1xf32> to vector<8x8xf32>
    %228 = arith.subf %224, %227 : vector<8x8xf32>
    %229 = math.exp %228 : vector<8x8xf32>
    %cst_45 = arith.constant dense<0.000000e+00> : vector<8xf32>
    %230 = vector.multi_reduction <add>, %229, %cst_45 [1] : vector<8x8xf32> to vector<8xf32>
    %231 = vector.shape_cast %230 : vector<8xf32> to vector<8x1xf32>
    %232 = tpu.reciprocal %231 {approx = true} : vector<8x1xf32> -> vector<8x1xf32>
    %233 = vector.broadcast %232 : vector<8x1xf32> to vector<8x8xf32>
    %234 = arith.mulf %229, %233 : vector<8x8xf32>
    %cst_46 = arith.constant dense<0.000000e+00> : vector<8x8xf32>
    %235 = tpu.matmul %234, %186, %cst_46 {dimension_numbers = #tpu.dot_dimension_numbers<[1], [0], [0], [1], [0, 0, 1, 1], [], []>} : vector<8x8xf32>, vector<8x8xf32>, vector<8x8xf32> -> vector<8x8xf32>
    %236 = tpu.concatenate %79, %131, %183, %235 in 1 : vector<8x8xf32>, vector<8x8xf32>, vector<8x8xf32>, vector<8x8xf32> -> vector<8x32xf32>
    %237 = vector.extract_strided_slice %27 {offsets = [8, 0], sizes = [8, 8], strides = [1, 1]} : vector<16x96xf32> to vector<8x8xf32>
    %238 = vector.extract_strided_slice %27 {offsets = [8, 32], sizes = [8, 8], strides = [1, 1]} : vector<16x96xf32> to vector<8x8xf32>
    %239 = vector.extract_strided_slice %27 {offsets = [8, 64], sizes = [8, 8], strides = [1, 1]} : vector<16x96xf32> to vector<8x8xf32>
    %240 = vector.extract_strided_slice %8 {offsets = [0, 0], sizes = [1, 4], strides = [1, 1]} : vector<4x4xf32> to vector<1x4xf32>
    %241 = vector.extract_strided_slice %9 {offsets = [0, 0], sizes = [1, 4], strides = [1, 1]} : vector<4x4xf32> to vector<1x4xf32>
    %242 = vector.extract_strided_slice %237 {offsets = [0, 0], sizes = [8, 4], strides = [1, 1]} : vector<8x8xf32> to vector<8x4xf32>
    %243 = vector.extract_strided_slice %237 {offsets = [0, 4], sizes = [8, 4], strides = [1, 1]} : vector<8x8xf32> to vector<8x4xf32>
    %244 = vector.extract_strided_slice %238 {offsets = [0, 0], sizes = [8, 4], strides = [1, 1]} : vector<8x8xf32> to vector<8x4xf32>
    %245 = vector.extract_strided_slice %238 {offsets = [0, 4], sizes = [8, 4], strides = [1, 1]} : vector<8x8xf32> to vector<8x4xf32>
    %246 = vector.broadcast %240 : vector<1x4xf32> to vector<8x4xf32>
    %247 = arith.mulf %242, %246 : vector<8x4xf32>
    %248 = vector.broadcast %241 : vector<1x4xf32> to vector<8x4xf32>
    %249 = arith.mulf %243, %248 : vector<8x4xf32>
    %250 = arith.addf %247, %249 : vector<8x4xf32>
    %cst_47 = arith.constant 0.000000e+00 : f32
    %251 = vector.broadcast %cst_47 : f32 to vector<8x4xf32>
    %252 = arith.subf %251, %242 : vector<8x4xf32>
    %253 = vector.broadcast %241 : vector<1x4xf32> to vector<8x4xf32>
    %254 = arith.mulf %252, %253 : vector<8x4xf32>
    %255 = vector.broadcast %240 : vector<1x4xf32> to vector<8x4xf32>
    %256 = arith.mulf %243, %255 : vector<8x4xf32>
    %257 = arith.addf %254, %256 : vector<8x4xf32>
    %258 = tpu.concatenate %250, %257 in 1 : vector<8x4xf32>, vector<8x4xf32> -> vector<8x8xf32>
    %259 = vector.broadcast %240 : vector<1x4xf32> to vector<8x4xf32>
    %260 = arith.mulf %244, %259 : vector<8x4xf32>
    %261 = vector.broadcast %241 : vector<1x4xf32> to vector<8x4xf32>
    %262 = arith.mulf %245, %261 : vector<8x4xf32>
    %263 = arith.addf %260, %262 : vector<8x4xf32>
    %cst_48 = arith.constant 0.000000e+00 : f32
    %264 = vector.broadcast %cst_48 : f32 to vector<8x4xf32>
    %265 = arith.subf %264, %244 : vector<8x4xf32>
    %266 = vector.broadcast %241 : vector<1x4xf32> to vector<8x4xf32>
    %267 = arith.mulf %265, %266 : vector<8x4xf32>
    %268 = vector.broadcast %240 : vector<1x4xf32> to vector<8x4xf32>
    %269 = arith.mulf %245, %268 : vector<8x4xf32>
    %270 = arith.addf %267, %269 : vector<8x4xf32>
    %271 = tpu.concatenate %263, %270 in 1 : vector<8x4xf32>, vector<8x4xf32> -> vector<8x8xf32>
    %272 = tpu.transpose %271, [1, 0] : vector<8x8xf32> -> vector<8x8xf32>
    %cst_49 = arith.constant dense<0.000000e+00> : vector<8x8xf32>
    %273 = tpu.matmul %258, %272, %cst_49 {dimension_numbers = #tpu.dot_dimension_numbers<[1], [0], [0], [1], [0, 0, 1, 1], [], []>} : vector<8x8xf32>, vector<8x8xf32>, vector<8x8xf32> -> vector<8x8xf32>
    %cst_50 = arith.constant 0.353553385 : f32
    %274 = vector.broadcast %cst_50 : f32 to vector<8x8xf32>
    %275 = arith.mulf %273, %274 : vector<8x8xf32>
    %cst_51 = arith.constant 0xFF800000 : f32
    %276 = vector.broadcast %cst_51 : f32 to vector<8x8xf32>
    %277 = arith.select %12, %275, %276 : vector<8x8xi1>, vector<8x8xf32>
    %cst_52 = arith.constant dense<0xFF800000> : vector<8xf32>
    %278 = vector.multi_reduction <maximumf>, %277, %cst_52 [1] : vector<8x8xf32> to vector<8xf32>
    %279 = vector.shape_cast %278 : vector<8xf32> to vector<8x1xf32>
    %280 = vector.broadcast %279 : vector<8x1xf32> to vector<8x8xf32>
    %281 = arith.subf %277, %280 : vector<8x8xf32>
    %282 = math.exp %281 : vector<8x8xf32>
    %cst_53 = arith.constant dense<0.000000e+00> : vector<8xf32>
    %283 = vector.multi_reduction <add>, %282, %cst_53 [1] : vector<8x8xf32> to vector<8xf32>
    %284 = vector.shape_cast %283 : vector<8xf32> to vector<8x1xf32>
    %285 = tpu.reciprocal %284 {approx = true} : vector<8x1xf32> -> vector<8x1xf32>
    %286 = vector.broadcast %285 : vector<8x1xf32> to vector<8x8xf32>
    %287 = arith.mulf %282, %286 : vector<8x8xf32>
    %cst_54 = arith.constant dense<0.000000e+00> : vector<8x8xf32>
    %288 = tpu.matmul %287, %239, %cst_54 {dimension_numbers = #tpu.dot_dimension_numbers<[1], [0], [0], [1], [0, 0, 1, 1], [], []>} : vector<8x8xf32>, vector<8x8xf32>, vector<8x8xf32> -> vector<8x8xf32>
    %289 = vector.extract_strided_slice %27 {offsets = [8, 8], sizes = [8, 8], strides = [1, 1]} : vector<16x96xf32> to vector<8x8xf32>
    %290 = vector.extract_strided_slice %27 {offsets = [8, 40], sizes = [8, 8], strides = [1, 1]} : vector<16x96xf32> to vector<8x8xf32>
    %291 = vector.extract_strided_slice %27 {offsets = [8, 72], sizes = [8, 8], strides = [1, 1]} : vector<16x96xf32> to vector<8x8xf32>
    %292 = vector.extract_strided_slice %8 {offsets = [1, 0], sizes = [1, 4], strides = [1, 1]} : vector<4x4xf32> to vector<1x4xf32>
    %293 = vector.extract_strided_slice %9 {offsets = [1, 0], sizes = [1, 4], strides = [1, 1]} : vector<4x4xf32> to vector<1x4xf32>
    %294 = vector.extract_strided_slice %289 {offsets = [0, 0], sizes = [8, 4], strides = [1, 1]} : vector<8x8xf32> to vector<8x4xf32>
    %295 = vector.extract_strided_slice %289 {offsets = [0, 4], sizes = [8, 4], strides = [1, 1]} : vector<8x8xf32> to vector<8x4xf32>
    %296 = vector.extract_strided_slice %290 {offsets = [0, 0], sizes = [8, 4], strides = [1, 1]} : vector<8x8xf32> to vector<8x4xf32>
    %297 = vector.extract_strided_slice %290 {offsets = [0, 4], sizes = [8, 4], strides = [1, 1]} : vector<8x8xf32> to vector<8x4xf32>
    %298 = vector.broadcast %292 : vector<1x4xf32> to vector<8x4xf32>
    %299 = arith.mulf %294, %298 : vector<8x4xf32>
    %300 = vector.broadcast %293 : vector<1x4xf32> to vector<8x4xf32>
    %301 = arith.mulf %295, %300 : vector<8x4xf32>
    %302 = arith.addf %299, %301 : vector<8x4xf32>
    %cst_55 = arith.constant 0.000000e+00 : f32
    %303 = vector.broadcast %cst_55 : f32 to vector<8x4xf32>
    %304 = arith.subf %303, %294 : vector<8x4xf32>
    %305 = vector.broadcast %293 : vector<1x4xf32> to vector<8x4xf32>
    %306 = arith.mulf %304, %305 : vector<8x4xf32>
    %307 = vector.broadcast %292 : vector<1x4xf32> to vector<8x4xf32>
    %308 = arith.mulf %295, %307 : vector<8x4xf32>
    %309 = arith.addf %306, %308 : vector<8x4xf32>
    %310 = tpu.concatenate %302, %309 in 1 : vector<8x4xf32>, vector<8x4xf32> -> vector<8x8xf32>
    %311 = vector.broadcast %292 : vector<1x4xf32> to vector<8x4xf32>
    %312 = arith.mulf %296, %311 : vector<8x4xf32>
    %313 = vector.broadcast %293 : vector<1x4xf32> to vector<8x4xf32>
    %314 = arith.mulf %297, %313 : vector<8x4xf32>
    %315 = arith.addf %312, %314 : vector<8x4xf32>
    %cst_56 = arith.constant 0.000000e+00 : f32
    %316 = vector.broadcast %cst_56 : f32 to vector<8x4xf32>
    %317 = arith.subf %316, %296 : vector<8x4xf32>
    %318 = vector.broadcast %293 : vector<1x4xf32> to vector<8x4xf32>
    %319 = arith.mulf %317, %318 : vector<8x4xf32>
    %320 = vector.broadcast %292 : vector<1x4xf32> to vector<8x4xf32>
    %321 = arith.mulf %297, %320 : vector<8x4xf32>
    %322 = arith.addf %319, %321 : vector<8x4xf32>
    %323 = tpu.concatenate %315, %322 in 1 : vector<8x4xf32>, vector<8x4xf32> -> vector<8x8xf32>
    %324 = tpu.transpose %323, [1, 0] : vector<8x8xf32> -> vector<8x8xf32>
    %cst_57 = arith.constant dense<0.000000e+00> : vector<8x8xf32>
    %325 = tpu.matmul %310, %324, %cst_57 {dimension_numbers = #tpu.dot_dimension_numbers<[1], [0], [0], [1], [0, 0, 1, 1], [], []>} : vector<8x8xf32>, vector<8x8xf32>, vector<8x8xf32> -> vector<8x8xf32>
    %cst_58 = arith.constant 0.353553385 : f32
    %326 = vector.broadcast %cst_58 : f32 to vector<8x8xf32>
    %327 = arith.mulf %325, %326 : vector<8x8xf32>
    %cst_59 = arith.constant 0xFF800000 : f32
    %328 = vector.broadcast %cst_59 : f32 to vector<8x8xf32>
    %329 = arith.select %12, %327, %328 : vector<8x8xi1>, vector<8x8xf32>
    %cst_60 = arith.constant dense<0xFF800000> : vector<8xf32>
    %330 = vector.multi_reduction <maximumf>, %329, %cst_60 [1] : vector<8x8xf32> to vector<8xf32>
    %331 = vector.shape_cast %330 : vector<8xf32> to vector<8x1xf32>
    %332 = vector.broadcast %331 : vector<8x1xf32> to vector<8x8xf32>
    %333 = arith.subf %329, %332 : vector<8x8xf32>
    %334 = math.exp %333 : vector<8x8xf32>
    %cst_61 = arith.constant dense<0.000000e+00> : vector<8xf32>
    %335 = vector.multi_reduction <add>, %334, %cst_61 [1] : vector<8x8xf32> to vector<8xf32>
    %336 = vector.shape_cast %335 : vector<8xf32> to vector<8x1xf32>
    %337 = tpu.reciprocal %336 {approx = true} : vector<8x1xf32> -> vector<8x1xf32>
    %338 = vector.broadcast %337 : vector<8x1xf32> to vector<8x8xf32>
    %339 = arith.mulf %334, %338 : vector<8x8xf32>
    %cst_62 = arith.constant dense<0.000000e+00> : vector<8x8xf32>
    %340 = tpu.matmul %339, %291, %cst_62 {dimension_numbers = #tpu.dot_dimension_numbers<[1], [0], [0], [1], [0, 0, 1, 1], [], []>} : vector<8x8xf32>, vector<8x8xf32>, vector<8x8xf32> -> vector<8x8xf32>
    %341 = vector.extract_strided_slice %27 {offsets = [8, 16], sizes = [8, 8], strides = [1, 1]} : vector<16x96xf32> to vector<8x8xf32>
    %342 = vector.extract_strided_slice %27 {offsets = [8, 48], sizes = [8, 8], strides = [1, 1]} : vector<16x96xf32> to vector<8x8xf32>
    %343 = vector.extract_strided_slice %27 {offsets = [8, 80], sizes = [8, 8], strides = [1, 1]} : vector<16x96xf32> to vector<8x8xf32>
    %344 = vector.extract_strided_slice %8 {offsets = [2, 0], sizes = [1, 4], strides = [1, 1]} : vector<4x4xf32> to vector<1x4xf32>
    %345 = vector.extract_strided_slice %9 {offsets = [2, 0], sizes = [1, 4], strides = [1, 1]} : vector<4x4xf32> to vector<1x4xf32>
    %346 = vector.extract_strided_slice %341 {offsets = [0, 0], sizes = [8, 4], strides = [1, 1]} : vector<8x8xf32> to vector<8x4xf32>
    %347 = vector.extract_strided_slice %341 {offsets = [0, 4], sizes = [8, 4], strides = [1, 1]} : vector<8x8xf32> to vector<8x4xf32>
    %348 = vector.extract_strided_slice %342 {offsets = [0, 0], sizes = [8, 4], strides = [1, 1]} : vector<8x8xf32> to vector<8x4xf32>
    %349 = vector.extract_strided_slice %342 {offsets = [0, 4], sizes = [8, 4], strides = [1, 1]} : vector<8x8xf32> to vector<8x4xf32>
    %350 = vector.broadcast %344 : vector<1x4xf32> to vector<8x4xf32>
    %351 = arith.mulf %346, %350 : vector<8x4xf32>
    %352 = vector.broadcast %345 : vector<1x4xf32> to vector<8x4xf32>
    %353 = arith.mulf %347, %352 : vector<8x4xf32>
    %354 = arith.addf %351, %353 : vector<8x4xf32>
    %cst_63 = arith.constant 0.000000e+00 : f32
    %355 = vector.broadcast %cst_63 : f32 to vector<8x4xf32>
    %356 = arith.subf %355, %346 : vector<8x4xf32>
    %357 = vector.broadcast %345 : vector<1x4xf32> to vector<8x4xf32>
    %358 = arith.mulf %356, %357 : vector<8x4xf32>
    %359 = vector.broadcast %344 : vector<1x4xf32> to vector<8x4xf32>
    %360 = arith.mulf %347, %359 : vector<8x4xf32>
    %361 = arith.addf %358, %360 : vector<8x4xf32>
    %362 = tpu.concatenate %354, %361 in 1 : vector<8x4xf32>, vector<8x4xf32> -> vector<8x8xf32>
    %363 = vector.broadcast %344 : vector<1x4xf32> to vector<8x4xf32>
    %364 = arith.mulf %348, %363 : vector<8x4xf32>
    %365 = vector.broadcast %345 : vector<1x4xf32> to vector<8x4xf32>
    %366 = arith.mulf %349, %365 : vector<8x4xf32>
    %367 = arith.addf %364, %366 : vector<8x4xf32>
    %cst_64 = arith.constant 0.000000e+00 : f32
    %368 = vector.broadcast %cst_64 : f32 to vector<8x4xf32>
    %369 = arith.subf %368, %348 : vector<8x4xf32>
    %370 = vector.broadcast %345 : vector<1x4xf32> to vector<8x4xf32>
    %371 = arith.mulf %369, %370 : vector<8x4xf32>
    %372 = vector.broadcast %344 : vector<1x4xf32> to vector<8x4xf32>
    %373 = arith.mulf %349, %372 : vector<8x4xf32>
    %374 = arith.addf %371, %373 : vector<8x4xf32>
    %375 = tpu.concatenate %367, %374 in 1 : vector<8x4xf32>, vector<8x4xf32> -> vector<8x8xf32>
    %376 = tpu.transpose %375, [1, 0] : vector<8x8xf32> -> vector<8x8xf32>
    %cst_65 = arith.constant dense<0.000000e+00> : vector<8x8xf32>
    %377 = tpu.matmul %362, %376, %cst_65 {dimension_numbers = #tpu.dot_dimension_numbers<[1], [0], [0], [1], [0, 0, 1, 1], [], []>} : vector<8x8xf32>, vector<8x8xf32>, vector<8x8xf32> -> vector<8x8xf32>
    %cst_66 = arith.constant 0.353553385 : f32
    %378 = vector.broadcast %cst_66 : f32 to vector<8x8xf32>
    %379 = arith.mulf %377, %378 : vector<8x8xf32>
    %cst_67 = arith.constant 0xFF800000 : f32
    %380 = vector.broadcast %cst_67 : f32 to vector<8x8xf32>
    %381 = arith.select %12, %379, %380 : vector<8x8xi1>, vector<8x8xf32>
    %cst_68 = arith.constant dense<0xFF800000> : vector<8xf32>
    %382 = vector.multi_reduction <maximumf>, %381, %cst_68 [1] : vector<8x8xf32> to vector<8xf32>
    %383 = vector.shape_cast %382 : vector<8xf32> to vector<8x1xf32>
    %384 = vector.broadcast %383 : vector<8x1xf32> to vector<8x8xf32>
    %385 = arith.subf %381, %384 : vector<8x8xf32>
    %386 = math.exp %385 : vector<8x8xf32>
    %cst_69 = arith.constant dense<0.000000e+00> : vector<8xf32>
    %387 = vector.multi_reduction <add>, %386, %cst_69 [1] : vector<8x8xf32> to vector<8xf32>
    %388 = vector.shape_cast %387 : vector<8xf32> to vector<8x1xf32>
    %389 = tpu.reciprocal %388 {approx = true} : vector<8x1xf32> -> vector<8x1xf32>
    %390 = vector.broadcast %389 : vector<8x1xf32> to vector<8x8xf32>
    %391 = arith.mulf %386, %390 : vector<8x8xf32>
    %cst_70 = arith.constant dense<0.000000e+00> : vector<8x8xf32>
    %392 = tpu.matmul %391, %343, %cst_70 {dimension_numbers = #tpu.dot_dimension_numbers<[1], [0], [0], [1], [0, 0, 1, 1], [], []>} : vector<8x8xf32>, vector<8x8xf32>, vector<8x8xf32> -> vector<8x8xf32>
    %393 = vector.extract_strided_slice %27 {offsets = [8, 24], sizes = [8, 8], strides = [1, 1]} : vector<16x96xf32> to vector<8x8xf32>
    %394 = vector.extract_strided_slice %27 {offsets = [8, 56], sizes = [8, 8], strides = [1, 1]} : vector<16x96xf32> to vector<8x8xf32>
    %395 = vector.extract_strided_slice %27 {offsets = [8, 88], sizes = [8, 8], strides = [1, 1]} : vector<16x96xf32> to vector<8x8xf32>
    %396 = vector.extract_strided_slice %8 {offsets = [3, 0], sizes = [1, 4], strides = [1, 1]} : vector<4x4xf32> to vector<1x4xf32>
    %397 = vector.extract_strided_slice %9 {offsets = [3, 0], sizes = [1, 4], strides = [1, 1]} : vector<4x4xf32> to vector<1x4xf32>
    %398 = vector.extract_strided_slice %393 {offsets = [0, 0], sizes = [8, 4], strides = [1, 1]} : vector<8x8xf32> to vector<8x4xf32>
    %399 = vector.extract_strided_slice %393 {offsets = [0, 4], sizes = [8, 4], strides = [1, 1]} : vector<8x8xf32> to vector<8x4xf32>
    %400 = vector.extract_strided_slice %394 {offsets = [0, 0], sizes = [8, 4], strides = [1, 1]} : vector<8x8xf32> to vector<8x4xf32>
    %401 = vector.extract_strided_slice %394 {offsets = [0, 4], sizes = [8, 4], strides = [1, 1]} : vector<8x8xf32> to vector<8x4xf32>
    %402 = vector.broadcast %396 : vector<1x4xf32> to vector<8x4xf32>
    %403 = arith.mulf %398, %402 : vector<8x4xf32>
    %404 = vector.broadcast %397 : vector<1x4xf32> to vector<8x4xf32>
    %405 = arith.mulf %399, %404 : vector<8x4xf32>
    %406 = arith.addf %403, %405 : vector<8x4xf32>
    %cst_71 = arith.constant 0.000000e+00 : f32
    %407 = vector.broadcast %cst_71 : f32 to vector<8x4xf32>
    %408 = arith.subf %407, %398 : vector<8x4xf32>
    %409 = vector.broadcast %397 : vector<1x4xf32> to vector<8x4xf32>
    %410 = arith.mulf %408, %409 : vector<8x4xf32>
    %411 = vector.broadcast %396 : vector<1x4xf32> to vector<8x4xf32>
    %412 = arith.mulf %399, %411 : vector<8x4xf32>
    %413 = arith.addf %410, %412 : vector<8x4xf32>
    %414 = tpu.concatenate %406, %413 in 1 : vector<8x4xf32>, vector<8x4xf32> -> vector<8x8xf32>
    %415 = vector.broadcast %396 : vector<1x4xf32> to vector<8x4xf32>
    %416 = arith.mulf %400, %415 : vector<8x4xf32>
    %417 = vector.broadcast %397 : vector<1x4xf32> to vector<8x4xf32>
    %418 = arith.mulf %401, %417 : vector<8x4xf32>
    %419 = arith.addf %416, %418 : vector<8x4xf32>
    %cst_72 = arith.constant 0.000000e+00 : f32
    %420 = vector.broadcast %cst_72 : f32 to vector<8x4xf32>
    %421 = arith.subf %420, %400 : vector<8x4xf32>
    %422 = vector.broadcast %397 : vector<1x4xf32> to vector<8x4xf32>
    %423 = arith.mulf %421, %422 : vector<8x4xf32>
    %424 = vector.broadcast %396 : vector<1x4xf32> to vector<8x4xf32>
    %425 = arith.mulf %401, %424 : vector<8x4xf32>
    %426 = arith.addf %423, %425 : vector<8x4xf32>
    %427 = tpu.concatenate %419, %426 in 1 : vector<8x4xf32>, vector<8x4xf32> -> vector<8x8xf32>
    %428 = tpu.transpose %427, [1, 0] : vector<8x8xf32> -> vector<8x8xf32>
    %cst_73 = arith.constant dense<0.000000e+00> : vector<8x8xf32>
    %429 = tpu.matmul %414, %428, %cst_73 {dimension_numbers = #tpu.dot_dimension_numbers<[1], [0], [0], [1], [0, 0, 1, 1], [], []>} : vector<8x8xf32>, vector<8x8xf32>, vector<8x8xf32> -> vector<8x8xf32>
    %cst_74 = arith.constant 0.353553385 : f32
    %430 = vector.broadcast %cst_74 : f32 to vector<8x8xf32>
    %431 = arith.mulf %429, %430 : vector<8x8xf32>
    %cst_75 = arith.constant 0xFF800000 : f32
    %432 = vector.broadcast %cst_75 : f32 to vector<8x8xf32>
    %433 = arith.select %12, %431, %432 : vector<8x8xi1>, vector<8x8xf32>
    %cst_76 = arith.constant dense<0xFF800000> : vector<8xf32>
    %434 = vector.multi_reduction <maximumf>, %433, %cst_76 [1] : vector<8x8xf32> to vector<8xf32>
    %435 = vector.shape_cast %434 : vector<8xf32> to vector<8x1xf32>
    %436 = vector.broadcast %435 : vector<8x1xf32> to vector<8x8xf32>
    %437 = arith.subf %433, %436 : vector<8x8xf32>
    %438 = math.exp %437 : vector<8x8xf32>
    %cst_77 = arith.constant dense<0.000000e+00> : vector<8xf32>
    %439 = vector.multi_reduction <add>, %438, %cst_77 [1] : vector<8x8xf32> to vector<8xf32>
    %440 = vector.shape_cast %439 : vector<8xf32> to vector<8x1xf32>
    %441 = tpu.reciprocal %440 {approx = true} : vector<8x1xf32> -> vector<8x1xf32>
    %442 = vector.broadcast %441 : vector<8x1xf32> to vector<8x8xf32>
    %443 = arith.mulf %438, %442 : vector<8x8xf32>
    %cst_78 = arith.constant dense<0.000000e+00> : vector<8x8xf32>
    %444 = tpu.matmul %443, %395, %cst_78 {dimension_numbers = #tpu.dot_dimension_numbers<[1], [0], [0], [1], [0, 0, 1, 1], [], []>} : vector<8x8xf32>, vector<8x8xf32>, vector<8x8xf32> -> vector<8x8xf32>
    %445 = tpu.concatenate %288, %340, %392, %444 in 1 : vector<8x8xf32>, vector<8x8xf32>, vector<8x8xf32>, vector<8x8xf32> -> vector<8x32xf32>
    %446 = tpu.concatenate %236, %445 in 0 : vector<8x32xf32>, vector<8x32xf32> -> vector<16x32xf32>
    %c0_79 = arith.constant 0 : index
    %c0_80 = arith.constant 0 : index
    %447 = vector.load %arg7[%c0_79, %c0_80] : memref<32x32xf32, #tpu.memory_space<vmem>>, vector<32x32xf32>
    %cst_81 = arith.constant dense<0.000000e+00> : vector<16x32xf32>
    %448 = tpu.matmul %446, %447, %cst_81 {dimension_numbers = #tpu.dot_dimension_numbers<[1], [0], [0], [1], [0, 0, 1, 1], [], []>} : vector<16x32xf32>, vector<32x32xf32>, vector<16x32xf32> -> vector<16x32xf32>
    %449 = arith.addf %7, %448 : vector<16x32xf32>
    %c0_82 = arith.constant 0 : index
    %c0_83 = arith.constant 0 : index
    %450 = vector.load %arg8[%c0_82, %c0_83] : memref<1x32xf32, #tpu.memory_space<vmem>>, vector<1x32xf32>
    %451 = arith.mulf %449, %449 : vector<16x32xf32>
    %cst_84 = arith.constant dense<0.000000e+00> : vector<16xf32>
    %452 = vector.multi_reduction <add>, %451, %cst_84 [1] : vector<16x32xf32> to vector<16xf32>
    %453 = vector.shape_cast %452 : vector<16xf32> to vector<16x1xf32>
    %cst_85 = arith.constant 3.200000e+01 : f32
    %454 = vector.broadcast %cst_85 : f32 to vector<16x1xf32>
    %455 = arith.divf %453, %454 : vector<16x1xf32>
    %cst_86 = arith.constant 1.1920929E-7 : f32
    %456 = vector.broadcast %cst_86 : f32 to vector<16x1xf32>
    %457 = arith.addf %455, %456 : vector<16x1xf32>
    %458 = math.rsqrt %457 : vector<16x1xf32>
    %459 = vector.broadcast %458 : vector<16x1xf32> to vector<16x32xf32>
    %460 = arith.mulf %449, %459 : vector<16x32xf32>
    %461 = vector.broadcast %450 : vector<1x32xf32> to vector<16x32xf32>
    %462 = arith.mulf %460, %461 : vector<16x32xf32>
    %c0_87 = arith.constant 0 : index
    %c0_88 = arith.constant 0 : index
    %463 = vector.load %arg9[%c0_87, %c0_88] : memref<32x256xf32, #tpu.memory_space<vmem>>, vector<32x256xf32>
    %cst_89 = arith.constant dense<0.000000e+00> : vector<16x256xf32>
    %464 = tpu.matmul %462, %463, %cst_89 {dimension_numbers = #tpu.dot_dimension_numbers<[1], [0], [0], [1], [0, 0, 1, 1], [], []>} : vector<16x32xf32>, vector<32x256xf32>, vector<16x256xf32> -> vector<16x256xf32>
    %465 = vector.extract_strided_slice %464 {offsets = [0, 0], sizes = [16, 128], strides = [1, 1]} : vector<16x256xf32> to vector<16x128xf32>
    %466 = vector.extract_strided_slice %464 {offsets = [0, 128], sizes = [16, 128], strides = [1, 1]} : vector<16x256xf32> to vector<16x128xf32>
    %467 = arith.negf %465 : vector<16x128xf32>
    %468 = math.exp %467 : vector<16x128xf32>
    %cst_90 = arith.constant 1.000000e+00 : f32
    %469 = vector.broadcast %cst_90 : f32 to vector<16x128xf32>
    %470 = arith.addf %469, %468 : vector<16x128xf32>
    %471 = arith.divf %469, %470 : vector<16x128xf32>
    %472 = arith.mulf %465, %471 : vector<16x128xf32>
    %473 = arith.mulf %472, %466 : vector<16x128xf32>
    %c0_91 = arith.constant 0 : index
    %c0_92 = arith.constant 0 : index
    %474 = vector.load %arg10[%c0_91, %c0_92] : memref<128x32xf32, #tpu.memory_space<vmem>>, vector<128x32xf32>
    %cst_93 = arith.constant dense<0.000000e+00> : vector<16x32xf32>
    %475 = tpu.matmul %473, %474, %cst_93 {dimension_numbers = #tpu.dot_dimension_numbers<[1], [0], [0], [1], [0, 0, 1, 1], [], []>} : vector<16x128xf32>, vector<128x32xf32>, vector<16x32xf32> -> vector<16x32xf32>
    %476 = arith.addf %449, %475 : vector<16x32xf32>
    %c0_94 = arith.constant 0 : index
    %c0_95 = arith.constant 0 : index
    %477 = vector.load %arg11[%c0_94, %c0_95] : memref<1x32xf32, #tpu.memory_space<vmem>>, vector<1x32xf32>
    %478 = arith.mulf %476, %476 : vector<16x32xf32>
    %cst_96 = arith.constant dense<0.000000e+00> : vector<16xf32>
    %479 = vector.multi_reduction <add>, %478, %cst_96 [1] : vector<16x32xf32> to vector<16xf32>
    %480 = vector.shape_cast %479 : vector<16xf32> to vector<16x1xf32>
    %cst_97 = arith.constant 3.200000e+01 : f32
    %481 = vector.broadcast %cst_97 : f32 to vector<16x1xf32>
    %482 = arith.divf %480, %481 : vector<16x1xf32>
    %cst_98 = arith.constant 1.1920929E-7 : f32
    %483 = vector.broadcast %cst_98 : f32 to vector<16x1xf32>
    %484 = arith.addf %482, %483 : vector<16x1xf32>
    %485 = math.rsqrt %484 : vector<16x1xf32>
    %486 = vector.broadcast %485 : vector<16x1xf32> to vector<16x32xf32>
    %487 = arith.mulf %476, %486 : vector<16x32xf32>
    %488 = vector.broadcast %477 : vector<1x32xf32> to vector<16x32xf32>
    %489 = arith.mulf %487, %488 : vector<16x32xf32>
    %c0_99 = arith.constant 0 : index
    %c0_100 = arith.constant 0 : index
    %490 = vector.load %arg12[%c0_99, %c0_100] : memref<32x96xf32, #tpu.memory_space<vmem>>, vector<32x96xf32>
    %cst_101 = arith.constant dense<0.000000e+00> : vector<16x96xf32>
    %491 = tpu.matmul %489, %490, %cst_101 {dimension_numbers = #tpu.dot_dimension_numbers<[1], [0], [0], [1], [0, 0, 1, 1], [], []>} : vector<16x32xf32>, vector<32x96xf32>, vector<16x96xf32> -> vector<16x96xf32>
    %492 = vector.extract_strided_slice %491 {offsets = [0, 0], sizes = [8, 8], strides = [1, 1]} : vector<16x96xf32> to vector<8x8xf32>
    %493 = vector.extract_strided_slice %491 {offsets = [0, 32], sizes = [8, 8], strides = [1, 1]} : vector<16x96xf32> to vector<8x8xf32>
    %494 = vector.extract_strided_slice %491 {offsets = [0, 64], sizes = [8, 8], strides = [1, 1]} : vector<16x96xf32> to vector<8x8xf32>
    %495 = vector.extract_strided_slice %8 {offsets = [0, 0], sizes = [1, 4], strides = [1, 1]} : vector<4x4xf32> to vector<1x4xf32>
    %496 = vector.extract_strided_slice %9 {offsets = [0, 0], sizes = [1, 4], strides = [1, 1]} : vector<4x4xf32> to vector<1x4xf32>
    %497 = vector.extract_strided_slice %492 {offsets = [0, 0], sizes = [8, 4], strides = [1, 1]} : vector<8x8xf32> to vector<8x4xf32>
    %498 = vector.extract_strided_slice %492 {offsets = [0, 4], sizes = [8, 4], strides = [1, 1]} : vector<8x8xf32> to vector<8x4xf32>
    %499 = vector.extract_strided_slice %493 {offsets = [0, 0], sizes = [8, 4], strides = [1, 1]} : vector<8x8xf32> to vector<8x4xf32>
    %500 = vector.extract_strided_slice %493 {offsets = [0, 4], sizes = [8, 4], strides = [1, 1]} : vector<8x8xf32> to vector<8x4xf32>
    %501 = vector.broadcast %495 : vector<1x4xf32> to vector<8x4xf32>
    %502 = arith.mulf %497, %501 : vector<8x4xf32>
    %503 = vector.broadcast %496 : vector<1x4xf32> to vector<8x4xf32>
    %504 = arith.mulf %498, %503 : vector<8x4xf32>
    %505 = arith.addf %502, %504 : vector<8x4xf32>
    %cst_102 = arith.constant 0.000000e+00 : f32
    %506 = vector.broadcast %cst_102 : f32 to vector<8x4xf32>
    %507 = arith.subf %506, %497 : vector<8x4xf32>
    %508 = vector.broadcast %496 : vector<1x4xf32> to vector<8x4xf32>
    %509 = arith.mulf %507, %508 : vector<8x4xf32>
    %510 = vector.broadcast %495 : vector<1x4xf32> to vector<8x4xf32>
    %511 = arith.mulf %498, %510 : vector<8x4xf32>
    %512 = arith.addf %509, %511 : vector<8x4xf32>
    %513 = tpu.concatenate %505, %512 in 1 : vector<8x4xf32>, vector<8x4xf32> -> vector<8x8xf32>
    %514 = vector.broadcast %495 : vector<1x4xf32> to vector<8x4xf32>
    %515 = arith.mulf %499, %514 : vector<8x4xf32>
    %516 = vector.broadcast %496 : vector<1x4xf32> to vector<8x4xf32>
    %517 = arith.mulf %500, %516 : vector<8x4xf32>
    %518 = arith.addf %515, %517 : vector<8x4xf32>
    %cst_103 = arith.constant 0.000000e+00 : f32
    %519 = vector.broadcast %cst_103 : f32 to vector<8x4xf32>
    %520 = arith.subf %519, %499 : vector<8x4xf32>
    %521 = vector.broadcast %496 : vector<1x4xf32> to vector<8x4xf32>
    %522 = arith.mulf %520, %521 : vector<8x4xf32>
    %523 = vector.broadcast %495 : vector<1x4xf32> to vector<8x4xf32>
    %524 = arith.mulf %500, %523 : vector<8x4xf32>
    %525 = arith.addf %522, %524 : vector<8x4xf32>
    %526 = tpu.concatenate %518, %525 in 1 : vector<8x4xf32>, vector<8x4xf32> -> vector<8x8xf32>
    %527 = tpu.transpose %526, [1, 0] : vector<8x8xf32> -> vector<8x8xf32>
    %cst_104 = arith.constant dense<0.000000e+00> : vector<8x8xf32>
    %528 = tpu.matmul %513, %527, %cst_104 {dimension_numbers = #tpu.dot_dimension_numbers<[1], [0], [0], [1], [0, 0, 1, 1], [], []>} : vector<8x8xf32>, vector<8x8xf32>, vector<8x8xf32> -> vector<8x8xf32>
    %cst_105 = arith.constant 0.353553385 : f32
    %529 = vector.broadcast %cst_105 : f32 to vector<8x8xf32>
    %530 = arith.mulf %528, %529 : vector<8x8xf32>
    %cst_106 = arith.constant 0xFF800000 : f32
    %531 = vector.broadcast %cst_106 : f32 to vector<8x8xf32>
    %532 = arith.select %12, %530, %531 : vector<8x8xi1>, vector<8x8xf32>
    %cst_107 = arith.constant dense<0xFF800000> : vector<8xf32>
    %533 = vector.multi_reduction <maximumf>, %532, %cst_107 [1] : vector<8x8xf32> to vector<8xf32>
    %534 = vector.shape_cast %533 : vector<8xf32> to vector<8x1xf32>
    %535 = vector.broadcast %534 : vector<8x1xf32> to vector<8x8xf32>
    %536 = arith.subf %532, %535 : vector<8x8xf32>
    %537 = math.exp %536 : vector<8x8xf32>
    %cst_108 = arith.constant dense<0.000000e+00> : vector<8xf32>
    %538 = vector.multi_reduction <add>, %537, %cst_108 [1] : vector<8x8xf32> to vector<8xf32>
    %539 = vector.shape_cast %538 : vector<8xf32> to vector<8x1xf32>
    %540 = tpu.reciprocal %539 {approx = true} : vector<8x1xf32> -> vector<8x1xf32>
    %541 = vector.broadcast %540 : vector<8x1xf32> to vector<8x8xf32>
    %542 = arith.mulf %537, %541 : vector<8x8xf32>
    %cst_109 = arith.constant dense<0.000000e+00> : vector<8x8xf32>
    %543 = tpu.matmul %542, %494, %cst_109 {dimension_numbers = #tpu.dot_dimension_numbers<[1], [0], [0], [1], [0, 0, 1, 1], [], []>} : vector<8x8xf32>, vector<8x8xf32>, vector<8x8xf32> -> vector<8x8xf32>
    %544 = vector.extract_strided_slice %491 {offsets = [0, 8], sizes = [8, 8], strides = [1, 1]} : vector<16x96xf32> to vector<8x8xf32>
    %545 = vector.extract_strided_slice %491 {offsets = [0, 40], sizes = [8, 8], strides = [1, 1]} : vector<16x96xf32> to vector<8x8xf32>
    %546 = vector.extract_strided_slice %491 {offsets = [0, 72], sizes = [8, 8], strides = [1, 1]} : vector<16x96xf32> to vector<8x8xf32>
    %547 = vector.extract_strided_slice %8 {offsets = [1, 0], sizes = [1, 4], strides = [1, 1]} : vector<4x4xf32> to vector<1x4xf32>
    %548 = vector.extract_strided_slice %9 {offsets = [1, 0], sizes = [1, 4], strides = [1, 1]} : vector<4x4xf32> to vector<1x4xf32>
    %549 = vector.extract_strided_slice %544 {offsets = [0, 0], sizes = [8, 4], strides = [1, 1]} : vector<8x8xf32> to vector<8x4xf32>
    %550 = vector.extract_strided_slice %544 {offsets = [0, 4], sizes = [8, 4], strides = [1, 1]} : vector<8x8xf32> to vector<8x4xf32>
    %551 = vector.extract_strided_slice %545 {offsets = [0, 0], sizes = [8, 4], strides = [1, 1]} : vector<8x8xf32> to vector<8x4xf32>
    %552 = vector.extract_strided_slice %545 {offsets = [0, 4], sizes = [8, 4], strides = [1, 1]} : vector<8x8xf32> to vector<8x4xf32>
    %553 = vector.broadcast %547 : vector<1x4xf32> to vector<8x4xf32>
    %554 = arith.mulf %549, %553 : vector<8x4xf32>
    %555 = vector.broadcast %548 : vector<1x4xf32> to vector<8x4xf32>
    %556 = arith.mulf %550, %555 : vector<8x4xf32>
    %557 = arith.addf %554, %556 : vector<8x4xf32>
    %cst_110 = arith.constant 0.000000e+00 : f32
    %558 = vector.broadcast %cst_110 : f32 to vector<8x4xf32>
    %559 = arith.subf %558, %549 : vector<8x4xf32>
    %560 = vector.broadcast %548 : vector<1x4xf32> to vector<8x4xf32>
    %561 = arith.mulf %559, %560 : vector<8x4xf32>
    %562 = vector.broadcast %547 : vector<1x4xf32> to vector<8x4xf32>
    %563 = arith.mulf %550, %562 : vector<8x4xf32>
    %564 = arith.addf %561, %563 : vector<8x4xf32>
    %565 = tpu.concatenate %557, %564 in 1 : vector<8x4xf32>, vector<8x4xf32> -> vector<8x8xf32>
    %566 = vector.broadcast %547 : vector<1x4xf32> to vector<8x4xf32>
    %567 = arith.mulf %551, %566 : vector<8x4xf32>
    %568 = vector.broadcast %548 : vector<1x4xf32> to vector<8x4xf32>
    %569 = arith.mulf %552, %568 : vector<8x4xf32>
    %570 = arith.addf %567, %569 : vector<8x4xf32>
    %cst_111 = arith.constant 0.000000e+00 : f32
    %571 = vector.broadcast %cst_111 : f32 to vector<8x4xf32>
    %572 = arith.subf %571, %551 : vector<8x4xf32>
    %573 = vector.broadcast %548 : vector<1x4xf32> to vector<8x4xf32>
    %574 = arith.mulf %572, %573 : vector<8x4xf32>
    %575 = vector.broadcast %547 : vector<1x4xf32> to vector<8x4xf32>
    %576 = arith.mulf %552, %575 : vector<8x4xf32>
    %577 = arith.addf %574, %576 : vector<8x4xf32>
    %578 = tpu.concatenate %570, %577 in 1 : vector<8x4xf32>, vector<8x4xf32> -> vector<8x8xf32>
    %579 = tpu.transpose %578, [1, 0] : vector<8x8xf32> -> vector<8x8xf32>
    %cst_112 = arith.constant dense<0.000000e+00> : vector<8x8xf32>
    %580 = tpu.matmul %565, %579, %cst_112 {dimension_numbers = #tpu.dot_dimension_numbers<[1], [0], [0], [1], [0, 0, 1, 1], [], []>} : vector<8x8xf32>, vector<8x8xf32>, vector<8x8xf32> -> vector<8x8xf32>
    %cst_113 = arith.constant 0.353553385 : f32
    %581 = vector.broadcast %cst_113 : f32 to vector<8x8xf32>
    %582 = arith.mulf %580, %581 : vector<8x8xf32>
    %cst_114 = arith.constant 0xFF800000 : f32
    %583 = vector.broadcast %cst_114 : f32 to vector<8x8xf32>
    %584 = arith.select %12, %582, %583 : vector<8x8xi1>, vector<8x8xf32>
    %cst_115 = arith.constant dense<0xFF800000> : vector<8xf32>
    %585 = vector.multi_reduction <maximumf>, %584, %cst_115 [1] : vector<8x8xf32> to vector<8xf32>
    %586 = vector.shape_cast %585 : vector<8xf32> to vector<8x1xf32>
    %587 = vector.broadcast %586 : vector<8x1xf32> to vector<8x8xf32>
    %588 = arith.subf %584, %587 : vector<8x8xf32>
    %589 = math.exp %588 : vector<8x8xf32>
    %cst_116 = arith.constant dense<0.000000e+00> : vector<8xf32>
    %590 = vector.multi_reduction <add>, %589, %cst_116 [1] : vector<8x8xf32> to vector<8xf32>
    %591 = vector.shape_cast %590 : vector<8xf32> to vector<8x1xf32>
    %592 = tpu.reciprocal %591 {approx = true} : vector<8x1xf32> -> vector<8x1xf32>
    %593 = vector.broadcast %592 : vector<8x1xf32> to vector<8x8xf32>
    %594 = arith.mulf %589, %593 : vector<8x8xf32>
    %cst_117 = arith.constant dense<0.000000e+00> : vector<8x8xf32>
    %595 = tpu.matmul %594, %546, %cst_117 {dimension_numbers = #tpu.dot_dimension_numbers<[1], [0], [0], [1], [0, 0, 1, 1], [], []>} : vector<8x8xf32>, vector<8x8xf32>, vector<8x8xf32> -> vector<8x8xf32>
    %596 = vector.extract_strided_slice %491 {offsets = [0, 16], sizes = [8, 8], strides = [1, 1]} : vector<16x96xf32> to vector<8x8xf32>
    %597 = vector.extract_strided_slice %491 {offsets = [0, 48], sizes = [8, 8], strides = [1, 1]} : vector<16x96xf32> to vector<8x8xf32>
    %598 = vector.extract_strided_slice %491 {offsets = [0, 80], sizes = [8, 8], strides = [1, 1]} : vector<16x96xf32> to vector<8x8xf32>
    %599 = vector.extract_strided_slice %8 {offsets = [2, 0], sizes = [1, 4], strides = [1, 1]} : vector<4x4xf32> to vector<1x4xf32>
    %600 = vector.extract_strided_slice %9 {offsets = [2, 0], sizes = [1, 4], strides = [1, 1]} : vector<4x4xf32> to vector<1x4xf32>
    %601 = vector.extract_strided_slice %596 {offsets = [0, 0], sizes = [8, 4], strides = [1, 1]} : vector<8x8xf32> to vector<8x4xf32>
    %602 = vector.extract_strided_slice %596 {offsets = [0, 4], sizes = [8, 4], strides = [1, 1]} : vector<8x8xf32> to vector<8x4xf32>
    %603 = vector.extract_strided_slice %597 {offsets = [0, 0], sizes = [8, 4], strides = [1, 1]} : vector<8x8xf32> to vector<8x4xf32>
    %604 = vector.extract_strided_slice %597 {offsets = [0, 4], sizes = [8, 4], strides = [1, 1]} : vector<8x8xf32> to vector<8x4xf32>
    %605 = vector.broadcast %599 : vector<1x4xf32> to vector<8x4xf32>
    %606 = arith.mulf %601, %605 : vector<8x4xf32>
    %607 = vector.broadcast %600 : vector<1x4xf32> to vector<8x4xf32>
    %608 = arith.mulf %602, %607 : vector<8x4xf32>
    %609 = arith.addf %606, %608 : vector<8x4xf32>
    %cst_118 = arith.constant 0.000000e+00 : f32
    %610 = vector.broadcast %cst_118 : f32 to vector<8x4xf32>
    %611 = arith.subf %610, %601 : vector<8x4xf32>
    %612 = vector.broadcast %600 : vector<1x4xf32> to vector<8x4xf32>
    %613 = arith.mulf %611, %612 : vector<8x4xf32>
    %614 = vector.broadcast %599 : vector<1x4xf32> to vector<8x4xf32>
    %615 = arith.mulf %602, %614 : vector<8x4xf32>
    %616 = arith.addf %613, %615 : vector<8x4xf32>
    %617 = tpu.concatenate %609, %616 in 1 : vector<8x4xf32>, vector<8x4xf32> -> vector<8x8xf32>
    %618 = vector.broadcast %599 : vector<1x4xf32> to vector<8x4xf32>
    %619 = arith.mulf %603, %618 : vector<8x4xf32>
    %620 = vector.broadcast %600 : vector<1x4xf32> to vector<8x4xf32>
    %621 = arith.mulf %604, %620 : vector<8x4xf32>
    %622 = arith.addf %619, %621 : vector<8x4xf32>
    %cst_119 = arith.constant 0.000000e+00 : f32
    %623 = vector.broadcast %cst_119 : f32 to vector<8x4xf32>
    %624 = arith.subf %623, %603 : vector<8x4xf32>
    %625 = vector.broadcast %600 : vector<1x4xf32> to vector<8x4xf32>
    %626 = arith.mulf %624, %625 : vector<8x4xf32>
    %627 = vector.broadcast %599 : vector<1x4xf32> to vector<8x4xf32>
    %628 = arith.mulf %604, %627 : vector<8x4xf32>
    %629 = arith.addf %626, %628 : vector<8x4xf32>
    %630 = tpu.concatenate %622, %629 in 1 : vector<8x4xf32>, vector<8x4xf32> -> vector<8x8xf32>
    %631 = tpu.transpose %630, [1, 0] : vector<8x8xf32> -> vector<8x8xf32>
    %cst_120 = arith.constant dense<0.000000e+00> : vector<8x8xf32>
    %632 = tpu.matmul %617, %631, %cst_120 {dimension_numbers = #tpu.dot_dimension_numbers<[1], [0], [0], [1], [0, 0, 1, 1], [], []>} : vector<8x8xf32>, vector<8x8xf32>, vector<8x8xf32> -> vector<8x8xf32>
    %cst_121 = arith.constant 0.353553385 : f32
    %633 = vector.broadcast %cst_121 : f32 to vector<8x8xf32>
    %634 = arith.mulf %632, %633 : vector<8x8xf32>
    %cst_122 = arith.constant 0xFF800000 : f32
    %635 = vector.broadcast %cst_122 : f32 to vector<8x8xf32>
    %636 = arith.select %12, %634, %635 : vector<8x8xi1>, vector<8x8xf32>
    %cst_123 = arith.constant dense<0xFF800000> : vector<8xf32>
    %637 = vector.multi_reduction <maximumf>, %636, %cst_123 [1] : vector<8x8xf32> to vector<8xf32>
    %638 = vector.shape_cast %637 : vector<8xf32> to vector<8x1xf32>
    %639 = vector.broadcast %638 : vector<8x1xf32> to vector<8x8xf32>
    %640 = arith.subf %636, %639 : vector<8x8xf32>
    %641 = math.exp %640 : vector<8x8xf32>
    %cst_124 = arith.constant dense<0.000000e+00> : vector<8xf32>
    %642 = vector.multi_reduction <add>, %641, %cst_124 [1] : vector<8x8xf32> to vector<8xf32>
    %643 = vector.shape_cast %642 : vector<8xf32> to vector<8x1xf32>
    %644 = tpu.reciprocal %643 {approx = true} : vector<8x1xf32> -> vector<8x1xf32>
    %645 = vector.broadcast %644 : vector<8x1xf32> to vector<8x8xf32>
    %646 = arith.mulf %641, %645 : vector<8x8xf32>
    %cst_125 = arith.constant dense<0.000000e+00> : vector<8x8xf32>
    %647 = tpu.matmul %646, %598, %cst_125 {dimension_numbers = #tpu.dot_dimension_numbers<[1], [0], [0], [1], [0, 0, 1, 1], [], []>} : vector<8x8xf32>, vector<8x8xf32>, vector<8x8xf32> -> vector<8x8xf32>
    %648 = vector.extract_strided_slice %491 {offsets = [0, 24], sizes = [8, 8], strides = [1, 1]} : vector<16x96xf32> to vector<8x8xf32>
    %649 = vector.extract_strided_slice %491 {offsets = [0, 56], sizes = [8, 8], strides = [1, 1]} : vector<16x96xf32> to vector<8x8xf32>
    %650 = vector.extract_strided_slice %491 {offsets = [0, 88], sizes = [8, 8], strides = [1, 1]} : vector<16x96xf32> to vector<8x8xf32>
    %651 = vector.extract_strided_slice %8 {offsets = [3, 0], sizes = [1, 4], strides = [1, 1]} : vector<4x4xf32> to vector<1x4xf32>
    %652 = vector.extract_strided_slice %9 {offsets = [3, 0], sizes = [1, 4], strides = [1, 1]} : vector<4x4xf32> to vector<1x4xf32>
    %653 = vector.extract_strided_slice %648 {offsets = [0, 0], sizes = [8, 4], strides = [1, 1]} : vector<8x8xf32> to vector<8x4xf32>
    %654 = vector.extract_strided_slice %648 {offsets = [0, 4], sizes = [8, 4], strides = [1, 1]} : vector<8x8xf32> to vector<8x4xf32>
    %655 = vector.extract_strided_slice %649 {offsets = [0, 0], sizes = [8, 4], strides = [1, 1]} : vector<8x8xf32> to vector<8x4xf32>
    %656 = vector.extract_strided_slice %649 {offsets = [0, 4], sizes = [8, 4], strides = [1, 1]} : vector<8x8xf32> to vector<8x4xf32>
    %657 = vector.broadcast %651 : vector<1x4xf32> to vector<8x4xf32>
    %658 = arith.mulf %653, %657 : vector<8x4xf32>
    %659 = vector.broadcast %652 : vector<1x4xf32> to vector<8x4xf32>
    %660 = arith.mulf %654, %659 : vector<8x4xf32>
    %661 = arith.addf %658, %660 : vector<8x4xf32>
    %cst_126 = arith.constant 0.000000e+00 : f32
    %662 = vector.broadcast %cst_126 : f32 to vector<8x4xf32>
    %663 = arith.subf %662, %653 : vector<8x4xf32>
    %664 = vector.broadcast %652 : vector<1x4xf32> to vector<8x4xf32>
    %665 = arith.mulf %663, %664 : vector<8x4xf32>
    %666 = vector.broadcast %651 : vector<1x4xf32> to vector<8x4xf32>
    %667 = arith.mulf %654, %666 : vector<8x4xf32>
    %668 = arith.addf %665, %667 : vector<8x4xf32>
    %669 = tpu.concatenate %661, %668 in 1 : vector<8x4xf32>, vector<8x4xf32> -> vector<8x8xf32>
    %670 = vector.broadcast %651 : vector<1x4xf32> to vector<8x4xf32>
    %671 = arith.mulf %655, %670 : vector<8x4xf32>
    %672 = vector.broadcast %652 : vector<1x4xf32> to vector<8x4xf32>
    %673 = arith.mulf %656, %672 : vector<8x4xf32>
    %674 = arith.addf %671, %673 : vector<8x4xf32>
    %cst_127 = arith.constant 0.000000e+00 : f32
    %675 = vector.broadcast %cst_127 : f32 to vector<8x4xf32>
    %676 = arith.subf %675, %655 : vector<8x4xf32>
    %677 = vector.broadcast %652 : vector<1x4xf32> to vector<8x4xf32>
    %678 = arith.mulf %676, %677 : vector<8x4xf32>
    %679 = vector.broadcast %651 : vector<1x4xf32> to vector<8x4xf32>
    %680 = arith.mulf %656, %679 : vector<8x4xf32>
    %681 = arith.addf %678, %680 : vector<8x4xf32>
    %682 = tpu.concatenate %674, %681 in 1 : vector<8x4xf32>, vector<8x4xf32> -> vector<8x8xf32>
    %683 = tpu.transpose %682, [1, 0] : vector<8x8xf32> -> vector<8x8xf32>
    %cst_128 = arith.constant dense<0.000000e+00> : vector<8x8xf32>
    %684 = tpu.matmul %669, %683, %cst_128 {dimension_numbers = #tpu.dot_dimension_numbers<[1], [0], [0], [1], [0, 0, 1, 1], [], []>} : vector<8x8xf32>, vector<8x8xf32>, vector<8x8xf32> -> vector<8x8xf32>
    %cst_129 = arith.constant 0.353553385 : f32
    %685 = vector.broadcast %cst_129 : f32 to vector<8x8xf32>
    %686 = arith.mulf %684, %685 : vector<8x8xf32>
    %cst_130 = arith.constant 0xFF800000 : f32
    %687 = vector.broadcast %cst_130 : f32 to vector<8x8xf32>
    %688 = arith.select %12, %686, %687 : vector<8x8xi1>, vector<8x8xf32>
    %cst_131 = arith.constant dense<0xFF800000> : vector<8xf32>
    %689 = vector.multi_reduction <maximumf>, %688, %cst_131 [1] : vector<8x8xf32> to vector<8xf32>
    %690 = vector.shape_cast %689 : vector<8xf32> to vector<8x1xf32>
    %691 = vector.broadcast %690 : vector<8x1xf32> to vector<8x8xf32>
    %692 = arith.subf %688, %691 : vector<8x8xf32>
    %693 = math.exp %692 : vector<8x8xf32>
    %cst_132 = arith.constant dense<0.000000e+00> : vector<8xf32>
    %694 = vector.multi_reduction <add>, %693, %cst_132 [1] : vector<8x8xf32> to vector<8xf32>
    %695 = vector.shape_cast %694 : vector<8xf32> to vector<8x1xf32>
    %696 = tpu.reciprocal %695 {approx = true} : vector<8x1xf32> -> vector<8x1xf32>
    %697 = vector.broadcast %696 : vector<8x1xf32> to vector<8x8xf32>
    %698 = arith.mulf %693, %697 : vector<8x8xf32>
    %cst_133 = arith.constant dense<0.000000e+00> : vector<8x8xf32>
    %699 = tpu.matmul %698, %650, %cst_133 {dimension_numbers = #tpu.dot_dimension_numbers<[1], [0], [0], [1], [0, 0, 1, 1], [], []>} : vector<8x8xf32>, vector<8x8xf32>, vector<8x8xf32> -> vector<8x8xf32>
    %700 = tpu.concatenate %543, %595, %647, %699 in 1 : vector<8x8xf32>, vector<8x8xf32>, vector<8x8xf32>, vector<8x8xf32> -> vector<8x32xf32>
    %701 = vector.extract_strided_slice %491 {offsets = [8, 0], sizes = [8, 8], strides = [1, 1]} : vector<16x96xf32> to vector<8x8xf32>
    %702 = vector.extract_strided_slice %491 {offsets = [8, 32], sizes = [8, 8], strides = [1, 1]} : vector<16x96xf32> to vector<8x8xf32>
    %703 = vector.extract_strided_slice %491 {offsets = [8, 64], sizes = [8, 8], strides = [1, 1]} : vector<16x96xf32> to vector<8x8xf32>
    %704 = vector.extract_strided_slice %8 {offsets = [0, 0], sizes = [1, 4], strides = [1, 1]} : vector<4x4xf32> to vector<1x4xf32>
    %705 = vector.extract_strided_slice %9 {offsets = [0, 0], sizes = [1, 4], strides = [1, 1]} : vector<4x4xf32> to vector<1x4xf32>
    %706 = vector.extract_strided_slice %701 {offsets = [0, 0], sizes = [8, 4], strides = [1, 1]} : vector<8x8xf32> to vector<8x4xf32>
    %707 = vector.extract_strided_slice %701 {offsets = [0, 4], sizes = [8, 4], strides = [1, 1]} : vector<8x8xf32> to vector<8x4xf32>
    %708 = vector.extract_strided_slice %702 {offsets = [0, 0], sizes = [8, 4], strides = [1, 1]} : vector<8x8xf32> to vector<8x4xf32>
    %709 = vector.extract_strided_slice %702 {offsets = [0, 4], sizes = [8, 4], strides = [1, 1]} : vector<8x8xf32> to vector<8x4xf32>
    %710 = vector.broadcast %704 : vector<1x4xf32> to vector<8x4xf32>
    %711 = arith.mulf %706, %710 : vector<8x4xf32>
    %712 = vector.broadcast %705 : vector<1x4xf32> to vector<8x4xf32>
    %713 = arith.mulf %707, %712 : vector<8x4xf32>
    %714 = arith.addf %711, %713 : vector<8x4xf32>
    %cst_134 = arith.constant 0.000000e+00 : f32
    %715 = vector.broadcast %cst_134 : f32 to vector<8x4xf32>
    %716 = arith.subf %715, %706 : vector<8x4xf32>
    %717 = vector.broadcast %705 : vector<1x4xf32> to vector<8x4xf32>
    %718 = arith.mulf %716, %717 : vector<8x4xf32>
    %719 = vector.broadcast %704 : vector<1x4xf32> to vector<8x4xf32>
    %720 = arith.mulf %707, %719 : vector<8x4xf32>
    %721 = arith.addf %718, %720 : vector<8x4xf32>
    %722 = tpu.concatenate %714, %721 in 1 : vector<8x4xf32>, vector<8x4xf32> -> vector<8x8xf32>
    %723 = vector.broadcast %704 : vector<1x4xf32> to vector<8x4xf32>
    %724 = arith.mulf %708, %723 : vector<8x4xf32>
    %725 = vector.broadcast %705 : vector<1x4xf32> to vector<8x4xf32>
    %726 = arith.mulf %709, %725 : vector<8x4xf32>
    %727 = arith.addf %724, %726 : vector<8x4xf32>
    %cst_135 = arith.constant 0.000000e+00 : f32
    %728 = vector.broadcast %cst_135 : f32 to vector<8x4xf32>
    %729 = arith.subf %728, %708 : vector<8x4xf32>
    %730 = vector.broadcast %705 : vector<1x4xf32> to vector<8x4xf32>
    %731 = arith.mulf %729, %730 : vector<8x4xf32>
    %732 = vector.broadcast %704 : vector<1x4xf32> to vector<8x4xf32>
    %733 = arith.mulf %709, %732 : vector<8x4xf32>
    %734 = arith.addf %731, %733 : vector<8x4xf32>
    %735 = tpu.concatenate %727, %734 in 1 : vector<8x4xf32>, vector<8x4xf32> -> vector<8x8xf32>
    %736 = tpu.transpose %735, [1, 0] : vector<8x8xf32> -> vector<8x8xf32>
    %cst_136 = arith.constant dense<0.000000e+00> : vector<8x8xf32>
    %737 = tpu.matmul %722, %736, %cst_136 {dimension_numbers = #tpu.dot_dimension_numbers<[1], [0], [0], [1], [0, 0, 1, 1], [], []>} : vector<8x8xf32>, vector<8x8xf32>, vector<8x8xf32> -> vector<8x8xf32>
    %cst_137 = arith.constant 0.353553385 : f32
    %738 = vector.broadcast %cst_137 : f32 to vector<8x8xf32>
    %739 = arith.mulf %737, %738 : vector<8x8xf32>
    %cst_138 = arith.constant 0xFF800000 : f32
    %740 = vector.broadcast %cst_138 : f32 to vector<8x8xf32>
    %741 = arith.select %12, %739, %740 : vector<8x8xi1>, vector<8x8xf32>
    %cst_139 = arith.constant dense<0xFF800000> : vector<8xf32>
    %742 = vector.multi_reduction <maximumf>, %741, %cst_139 [1] : vector<8x8xf32> to vector<8xf32>
    %743 = vector.shape_cast %742 : vector<8xf32> to vector<8x1xf32>
    %744 = vector.broadcast %743 : vector<8x1xf32> to vector<8x8xf32>
    %745 = arith.subf %741, %744 : vector<8x8xf32>
    %746 = math.exp %745 : vector<8x8xf32>
    %cst_140 = arith.constant dense<0.000000e+00> : vector<8xf32>
    %747 = vector.multi_reduction <add>, %746, %cst_140 [1] : vector<8x8xf32> to vector<8xf32>
    %748 = vector.shape_cast %747 : vector<8xf32> to vector<8x1xf32>
    %749 = tpu.reciprocal %748 {approx = true} : vector<8x1xf32> -> vector<8x1xf32>
    %750 = vector.broadcast %749 : vector<8x1xf32> to vector<8x8xf32>
    %751 = arith.mulf %746, %750 : vector<8x8xf32>
    %cst_141 = arith.constant dense<0.000000e+00> : vector<8x8xf32>
    %752 = tpu.matmul %751, %703, %cst_141 {dimension_numbers = #tpu.dot_dimension_numbers<[1], [0], [0], [1], [0, 0, 1, 1], [], []>} : vector<8x8xf32>, vector<8x8xf32>, vector<8x8xf32> -> vector<8x8xf32>
    %753 = vector.extract_strided_slice %491 {offsets = [8, 8], sizes = [8, 8], strides = [1, 1]} : vector<16x96xf32> to vector<8x8xf32>
    %754 = vector.extract_strided_slice %491 {offsets = [8, 40], sizes = [8, 8], strides = [1, 1]} : vector<16x96xf32> to vector<8x8xf32>
    %755 = vector.extract_strided_slice %491 {offsets = [8, 72], sizes = [8, 8], strides = [1, 1]} : vector<16x96xf32> to vector<8x8xf32>
    %756 = vector.extract_strided_slice %8 {offsets = [1, 0], sizes = [1, 4], strides = [1, 1]} : vector<4x4xf32> to vector<1x4xf32>
    %757 = vector.extract_strided_slice %9 {offsets = [1, 0], sizes = [1, 4], strides = [1, 1]} : vector<4x4xf32> to vector<1x4xf32>
    %758 = vector.extract_strided_slice %753 {offsets = [0, 0], sizes = [8, 4], strides = [1, 1]} : vector<8x8xf32> to vector<8x4xf32>
    %759 = vector.extract_strided_slice %753 {offsets = [0, 4], sizes = [8, 4], strides = [1, 1]} : vector<8x8xf32> to vector<8x4xf32>
    %760 = vector.extract_strided_slice %754 {offsets = [0, 0], sizes = [8, 4], strides = [1, 1]} : vector<8x8xf32> to vector<8x4xf32>
    %761 = vector.extract_strided_slice %754 {offsets = [0, 4], sizes = [8, 4], strides = [1, 1]} : vector<8x8xf32> to vector<8x4xf32>
    %762 = vector.broadcast %756 : vector<1x4xf32> to vector<8x4xf32>
    %763 = arith.mulf %758, %762 : vector<8x4xf32>
    %764 = vector.broadcast %757 : vector<1x4xf32> to vector<8x4xf32>
    %765 = arith.mulf %759, %764 : vector<8x4xf32>
    %766 = arith.addf %763, %765 : vector<8x4xf32>
    %cst_142 = arith.constant 0.000000e+00 : f32
    %767 = vector.broadcast %cst_142 : f32 to vector<8x4xf32>
    %768 = arith.subf %767, %758 : vector<8x4xf32>
    %769 = vector.broadcast %757 : vector<1x4xf32> to vector<8x4xf32>
    %770 = arith.mulf %768, %769 : vector<8x4xf32>
    %771 = vector.broadcast %756 : vector<1x4xf32> to vector<8x4xf32>
    %772 = arith.mulf %759, %771 : vector<8x4xf32>
    %773 = arith.addf %770, %772 : vector<8x4xf32>
    %774 = tpu.concatenate %766, %773 in 1 : vector<8x4xf32>, vector<8x4xf32> -> vector<8x8xf32>
    %775 = vector.broadcast %756 : vector<1x4xf32> to vector<8x4xf32>
    %776 = arith.mulf %760, %775 : vector<8x4xf32>
    %777 = vector.broadcast %757 : vector<1x4xf32> to vector<8x4xf32>
    %778 = arith.mulf %761, %777 : vector<8x4xf32>
    %779 = arith.addf %776, %778 : vector<8x4xf32>
    %cst_143 = arith.constant 0.000000e+00 : f32
    %780 = vector.broadcast %cst_143 : f32 to vector<8x4xf32>
    %781 = arith.subf %780, %760 : vector<8x4xf32>
    %782 = vector.broadcast %757 : vector<1x4xf32> to vector<8x4xf32>
    %783 = arith.mulf %781, %782 : vector<8x4xf32>
    %784 = vector.broadcast %756 : vector<1x4xf32> to vector<8x4xf32>
    %785 = arith.mulf %761, %784 : vector<8x4xf32>
    %786 = arith.addf %783, %785 : vector<8x4xf32>
    %787 = tpu.concatenate %779, %786 in 1 : vector<8x4xf32>, vector<8x4xf32> -> vector<8x8xf32>
    %788 = tpu.transpose %787, [1, 0] : vector<8x8xf32> -> vector<8x8xf32>
    %cst_144 = arith.constant dense<0.000000e+00> : vector<8x8xf32>
    %789 = tpu.matmul %774, %788, %cst_144 {dimension_numbers = #tpu.dot_dimension_numbers<[1], [0], [0], [1], [0, 0, 1, 1], [], []>} : vector<8x8xf32>, vector<8x8xf32>, vector<8x8xf32> -> vector<8x8xf32>
    %cst_145 = arith.constant 0.353553385 : f32
    %790 = vector.broadcast %cst_145 : f32 to vector<8x8xf32>
    %791 = arith.mulf %789, %790 : vector<8x8xf32>
    %cst_146 = arith.constant 0xFF800000 : f32
    %792 = vector.broadcast %cst_146 : f32 to vector<8x8xf32>
    %793 = arith.select %12, %791, %792 : vector<8x8xi1>, vector<8x8xf32>
    %cst_147 = arith.constant dense<0xFF800000> : vector<8xf32>
    %794 = vector.multi_reduction <maximumf>, %793, %cst_147 [1] : vector<8x8xf32> to vector<8xf32>
    %795 = vector.shape_cast %794 : vector<8xf32> to vector<8x1xf32>
    %796 = vector.broadcast %795 : vector<8x1xf32> to vector<8x8xf32>
    %797 = arith.subf %793, %796 : vector<8x8xf32>
    %798 = math.exp %797 : vector<8x8xf32>
    %cst_148 = arith.constant dense<0.000000e+00> : vector<8xf32>
    %799 = vector.multi_reduction <add>, %798, %cst_148 [1] : vector<8x8xf32> to vector<8xf32>
    %800 = vector.shape_cast %799 : vector<8xf32> to vector<8x1xf32>
    %801 = tpu.reciprocal %800 {approx = true} : vector<8x1xf32> -> vector<8x1xf32>
    %802 = vector.broadcast %801 : vector<8x1xf32> to vector<8x8xf32>
    %803 = arith.mulf %798, %802 : vector<8x8xf32>
    %cst_149 = arith.constant dense<0.000000e+00> : vector<8x8xf32>
    %804 = tpu.matmul %803, %755, %cst_149 {dimension_numbers = #tpu.dot_dimension_numbers<[1], [0], [0], [1], [0, 0, 1, 1], [], []>} : vector<8x8xf32>, vector<8x8xf32>, vector<8x8xf32> -> vector<8x8xf32>
    %805 = vector.extract_strided_slice %491 {offsets = [8, 16], sizes = [8, 8], strides = [1, 1]} : vector<16x96xf32> to vector<8x8xf32>
    %806 = vector.extract_strided_slice %491 {offsets = [8, 48], sizes = [8, 8], strides = [1, 1]} : vector<16x96xf32> to vector<8x8xf32>
    %807 = vector.extract_strided_slice %491 {offsets = [8, 80], sizes = [8, 8], strides = [1, 1]} : vector<16x96xf32> to vector<8x8xf32>
    %808 = vector.extract_strided_slice %8 {offsets = [2, 0], sizes = [1, 4], strides = [1, 1]} : vector<4x4xf32> to vector<1x4xf32>
    %809 = vector.extract_strided_slice %9 {offsets = [2, 0], sizes = [1, 4], strides = [1, 1]} : vector<4x4xf32> to vector<1x4xf32>
    %810 = vector.extract_strided_slice %805 {offsets = [0, 0], sizes = [8, 4], strides = [1, 1]} : vector<8x8xf32> to vector<8x4xf32>
    %811 = vector.extract_strided_slice %805 {offsets = [0, 4], sizes = [8, 4], strides = [1, 1]} : vector<8x8xf32> to vector<8x4xf32>
    %812 = vector.extract_strided_slice %806 {offsets = [0, 0], sizes = [8, 4], strides = [1, 1]} : vector<8x8xf32> to vector<8x4xf32>
    %813 = vector.extract_strided_slice %806 {offsets = [0, 4], sizes = [8, 4], strides = [1, 1]} : vector<8x8xf32> to vector<8x4xf32>
    %814 = vector.broadcast %808 : vector<1x4xf32> to vector<8x4xf32>
    %815 = arith.mulf %810, %814 : vector<8x4xf32>
    %816 = vector.broadcast %809 : vector<1x4xf32> to vector<8x4xf32>
    %817 = arith.mulf %811, %816 : vector<8x4xf32>
    %818 = arith.addf %815, %817 : vector<8x4xf32>
    %cst_150 = arith.constant 0.000000e+00 : f32
    %819 = vector.broadcast %cst_150 : f32 to vector<8x4xf32>
    %820 = arith.subf %819, %810 : vector<8x4xf32>
    %821 = vector.broadcast %809 : vector<1x4xf32> to vector<8x4xf32>
    %822 = arith.mulf %820, %821 : vector<8x4xf32>
    %823 = vector.broadcast %808 : vector<1x4xf32> to vector<8x4xf32>
    %824 = arith.mulf %811, %823 : vector<8x4xf32>
    %825 = arith.addf %822, %824 : vector<8x4xf32>
    %826 = tpu.concatenate %818, %825 in 1 : vector<8x4xf32>, vector<8x4xf32> -> vector<8x8xf32>
    %827 = vector.broadcast %808 : vector<1x4xf32> to vector<8x4xf32>
    %828 = arith.mulf %812, %827 : vector<8x4xf32>
    %829 = vector.broadcast %809 : vector<1x4xf32> to vector<8x4xf32>
    %830 = arith.mulf %813, %829 : vector<8x4xf32>
    %831 = arith.addf %828, %830 : vector<8x4xf32>
    %cst_151 = arith.constant 0.000000e+00 : f32
    %832 = vector.broadcast %cst_151 : f32 to vector<8x4xf32>
    %833 = arith.subf %832, %812 : vector<8x4xf32>
    %834 = vector.broadcast %809 : vector<1x4xf32> to vector<8x4xf32>
    %835 = arith.mulf %833, %834 : vector<8x4xf32>
    %836 = vector.broadcast %808 : vector<1x4xf32> to vector<8x4xf32>
    %837 = arith.mulf %813, %836 : vector<8x4xf32>
    %838 = arith.addf %835, %837 : vector<8x4xf32>
    %839 = tpu.concatenate %831, %838 in 1 : vector<8x4xf32>, vector<8x4xf32> -> vector<8x8xf32>
    %840 = tpu.transpose %839, [1, 0] : vector<8x8xf32> -> vector<8x8xf32>
    %cst_152 = arith.constant dense<0.000000e+00> : vector<8x8xf32>
    %841 = tpu.matmul %826, %840, %cst_152 {dimension_numbers = #tpu.dot_dimension_numbers<[1], [0], [0], [1], [0, 0, 1, 1], [], []>} : vector<8x8xf32>, vector<8x8xf32>, vector<8x8xf32> -> vector<8x8xf32>
    %cst_153 = arith.constant 0.353553385 : f32
    %842 = vector.broadcast %cst_153 : f32 to vector<8x8xf32>
    %843 = arith.mulf %841, %842 : vector<8x8xf32>
    %cst_154 = arith.constant 0xFF800000 : f32
    %844 = vector.broadcast %cst_154 : f32 to vector<8x8xf32>
    %845 = arith.select %12, %843, %844 : vector<8x8xi1>, vector<8x8xf32>
    %cst_155 = arith.constant dense<0xFF800000> : vector<8xf32>
    %846 = vector.multi_reduction <maximumf>, %845, %cst_155 [1] : vector<8x8xf32> to vector<8xf32>
    %847 = vector.shape_cast %846 : vector<8xf32> to vector<8x1xf32>
    %848 = vector.broadcast %847 : vector<8x1xf32> to vector<8x8xf32>
    %849 = arith.subf %845, %848 : vector<8x8xf32>
    %850 = math.exp %849 : vector<8x8xf32>
    %cst_156 = arith.constant dense<0.000000e+00> : vector<8xf32>
    %851 = vector.multi_reduction <add>, %850, %cst_156 [1] : vector<8x8xf32> to vector<8xf32>
    %852 = vector.shape_cast %851 : vector<8xf32> to vector<8x1xf32>
    %853 = tpu.reciprocal %852 {approx = true} : vector<8x1xf32> -> vector<8x1xf32>
    %854 = vector.broadcast %853 : vector<8x1xf32> to vector<8x8xf32>
    %855 = arith.mulf %850, %854 : vector<8x8xf32>
    %cst_157 = arith.constant dense<0.000000e+00> : vector<8x8xf32>
    %856 = tpu.matmul %855, %807, %cst_157 {dimension_numbers = #tpu.dot_dimension_numbers<[1], [0], [0], [1], [0, 0, 1, 1], [], []>} : vector<8x8xf32>, vector<8x8xf32>, vector<8x8xf32> -> vector<8x8xf32>
    %857 = vector.extract_strided_slice %491 {offsets = [8, 24], sizes = [8, 8], strides = [1, 1]} : vector<16x96xf32> to vector<8x8xf32>
    %858 = vector.extract_strided_slice %491 {offsets = [8, 56], sizes = [8, 8], strides = [1, 1]} : vector<16x96xf32> to vector<8x8xf32>
    %859 = vector.extract_strided_slice %491 {offsets = [8, 88], sizes = [8, 8], strides = [1, 1]} : vector<16x96xf32> to vector<8x8xf32>
    %860 = vector.extract_strided_slice %8 {offsets = [3, 0], sizes = [1, 4], strides = [1, 1]} : vector<4x4xf32> to vector<1x4xf32>
    %861 = vector.extract_strided_slice %9 {offsets = [3, 0], sizes = [1, 4], strides = [1, 1]} : vector<4x4xf32> to vector<1x4xf32>
    %862 = vector.extract_strided_slice %857 {offsets = [0, 0], sizes = [8, 4], strides = [1, 1]} : vector<8x8xf32> to vector<8x4xf32>
    %863 = vector.extract_strided_slice %857 {offsets = [0, 4], sizes = [8, 4], strides = [1, 1]} : vector<8x8xf32> to vector<8x4xf32>
    %864 = vector.extract_strided_slice %858 {offsets = [0, 0], sizes = [8, 4], strides = [1, 1]} : vector<8x8xf32> to vector<8x4xf32>
    %865 = vector.extract_strided_slice %858 {offsets = [0, 4], sizes = [8, 4], strides = [1, 1]} : vector<8x8xf32> to vector<8x4xf32>
    %866 = vector.broadcast %860 : vector<1x4xf32> to vector<8x4xf32>
    %867 = arith.mulf %862, %866 : vector<8x4xf32>
    %868 = vector.broadcast %861 : vector<1x4xf32> to vector<8x4xf32>
    %869 = arith.mulf %863, %868 : vector<8x4xf32>
    %870 = arith.addf %867, %869 : vector<8x4xf32>
    %cst_158 = arith.constant 0.000000e+00 : f32
    %871 = vector.broadcast %cst_158 : f32 to vector<8x4xf32>
    %872 = arith.subf %871, %862 : vector<8x4xf32>
    %873 = vector.broadcast %861 : vector<1x4xf32> to vector<8x4xf32>
    %874 = arith.mulf %872, %873 : vector<8x4xf32>
    %875 = vector.broadcast %860 : vector<1x4xf32> to vector<8x4xf32>
    %876 = arith.mulf %863, %875 : vector<8x4xf32>
    %877 = arith.addf %874, %876 : vector<8x4xf32>
    %878 = tpu.concatenate %870, %877 in 1 : vector<8x4xf32>, vector<8x4xf32> -> vector<8x8xf32>
    %879 = vector.broadcast %860 : vector<1x4xf32> to vector<8x4xf32>
    %880 = arith.mulf %864, %879 : vector<8x4xf32>
    %881 = vector.broadcast %861 : vector<1x4xf32> to vector<8x4xf32>
    %882 = arith.mulf %865, %881 : vector<8x4xf32>
    %883 = arith.addf %880, %882 : vector<8x4xf32>
    %cst_159 = arith.constant 0.000000e+00 : f32
    %884 = vector.broadcast %cst_159 : f32 to vector<8x4xf32>
    %885 = arith.subf %884, %864 : vector<8x4xf32>
    %886 = vector.broadcast %861 : vector<1x4xf32> to vector<8x4xf32>
    %887 = arith.mulf %885, %886 : vector<8x4xf32>
    %888 = vector.broadcast %860 : vector<1x4xf32> to vector<8x4xf32>
    %889 = arith.mulf %865, %888 : vector<8x4xf32>
    %890 = arith.addf %887, %889 : vector<8x4xf32>
    %891 = tpu.concatenate %883, %890 in 1 : vector<8x4xf32>, vector<8x4xf32> -> vector<8x8xf32>
    %892 = tpu.transpose %891, [1, 0] : vector<8x8xf32> -> vector<8x8xf32>
    %cst_160 = arith.constant dense<0.000000e+00> : vector<8x8xf32>
    %893 = tpu.matmul %878, %892, %cst_160 {dimension_numbers = #tpu.dot_dimension_numbers<[1], [0], [0], [1], [0, 0, 1, 1], [], []>} : vector<8x8xf32>, vector<8x8xf32>, vector<8x8xf32> -> vector<8x8xf32>
    %cst_161 = arith.constant 0.353553385 : f32
    %894 = vector.broadcast %cst_161 : f32 to vector<8x8xf32>
    %895 = arith.mulf %893, %894 : vector<8x8xf32>
    %cst_162 = arith.constant 0xFF800000 : f32
    %896 = vector.broadcast %cst_162 : f32 to vector<8x8xf32>
    %897 = arith.select %12, %895, %896 : vector<8x8xi1>, vector<8x8xf32>
    %cst_163 = arith.constant dense<0xFF800000> : vector<8xf32>
    %898 = vector.multi_reduction <maximumf>, %897, %cst_163 [1] : vector<8x8xf32> to vector<8xf32>
    %899 = vector.shape_cast %898 : vector<8xf32> to vector<8x1xf32>
    %900 = vector.broadcast %899 : vector<8x1xf32> to vector<8x8xf32>
    %901 = arith.subf %897, %900 : vector<8x8xf32>
    %902 = math.exp %901 : vector<8x8xf32>
    %cst_164 = arith.constant dense<0.000000e+00> : vector<8xf32>
    %903 = vector.multi_reduction <add>, %902, %cst_164 [1] : vector<8x8xf32> to vector<8xf32>
    %904 = vector.shape_cast %903 : vector<8xf32> to vector<8x1xf32>
    %905 = tpu.reciprocal %904 {approx = true} : vector<8x1xf32> -> vector<8x1xf32>
    %906 = vector.broadcast %905 : vector<8x1xf32> to vector<8x8xf32>
    %907 = arith.mulf %902, %906 : vector<8x8xf32>
    %cst_165 = arith.constant dense<0.000000e+00> : vector<8x8xf32>
    %908 = tpu.matmul %907, %859, %cst_165 {dimension_numbers = #tpu.dot_dimension_numbers<[1], [0], [0], [1], [0, 0, 1, 1], [], []>} : vector<8x8xf32>, vector<8x8xf32>, vector<8x8xf32> -> vector<8x8xf32>
    %909 = tpu.concatenate %752, %804, %856, %908 in 1 : vector<8x8xf32>, vector<8x8xf32>, vector<8x8xf32>, vector<8x8xf32> -> vector<8x32xf32>
    %910 = tpu.concatenate %700, %909 in 0 : vector<8x32xf32>, vector<8x32xf32> -> vector<16x32xf32>
    %c0_166 = arith.constant 0 : index
    %c0_167 = arith.constant 0 : index
    %911 = vector.load %arg13[%c0_166, %c0_167] : memref<32x32xf32, #tpu.memory_space<vmem>>, vector<32x32xf32>
    %cst_168 = arith.constant dense<0.000000e+00> : vector<16x32xf32>
    %912 = tpu.matmul %910, %911, %cst_168 {dimension_numbers = #tpu.dot_dimension_numbers<[1], [0], [0], [1], [0, 0, 1, 1], [], []>} : vector<16x32xf32>, vector<32x32xf32>, vector<16x32xf32> -> vector<16x32xf32>
    %913 = arith.addf %476, %912 : vector<16x32xf32>
    %c0_169 = arith.constant 0 : index
    %c0_170 = arith.constant 0 : index
    %914 = vector.load %arg14[%c0_169, %c0_170] : memref<1x32xf32, #tpu.memory_space<vmem>>, vector<1x32xf32>
    %915 = arith.mulf %913, %913 : vector<16x32xf32>
    %cst_171 = arith.constant dense<0.000000e+00> : vector<16xf32>
    %916 = vector.multi_reduction <add>, %915, %cst_171 [1] : vector<16x32xf32> to vector<16xf32>
    %917 = vector.shape_cast %916 : vector<16xf32> to vector<16x1xf32>
    %cst_172 = arith.constant 3.200000e+01 : f32
    %918 = vector.broadcast %cst_172 : f32 to vector<16x1xf32>
    %919 = arith.divf %917, %918 : vector<16x1xf32>
    %cst_173 = arith.constant 1.1920929E-7 : f32
    %920 = vector.broadcast %cst_173 : f32 to vector<16x1xf32>
    %921 = arith.addf %919, %920 : vector<16x1xf32>
    %922 = math.rsqrt %921 : vector<16x1xf32>
    %923 = vector.broadcast %922 : vector<16x1xf32> to vector<16x32xf32>
    %924 = arith.mulf %913, %923 : vector<16x32xf32>
    %925 = vector.broadcast %914 : vector<1x32xf32> to vector<16x32xf32>
    %926 = arith.mulf %924, %925 : vector<16x32xf32>
    %c0_174 = arith.constant 0 : index
    %c0_175 = arith.constant 0 : index
    %927 = vector.load %arg15[%c0_174, %c0_175] : memref<32x256xf32, #tpu.memory_space<vmem>>, vector<32x256xf32>
    %cst_176 = arith.constant dense<0.000000e+00> : vector<16x256xf32>
    %928 = tpu.matmul %926, %927, %cst_176 {dimension_numbers = #tpu.dot_dimension_numbers<[1], [0], [0], [1], [0, 0, 1, 1], [], []>} : vector<16x32xf32>, vector<32x256xf32>, vector<16x256xf32> -> vector<16x256xf32>
    %929 = vector.extract_strided_slice %928 {offsets = [0, 0], sizes = [16, 128], strides = [1, 1]} : vector<16x256xf32> to vector<16x128xf32>
    %930 = vector.extract_strided_slice %928 {offsets = [0, 128], sizes = [16, 128], strides = [1, 1]} : vector<16x256xf32> to vector<16x128xf32>
    %931 = arith.negf %929 : vector<16x128xf32>
    %932 = math.exp %931 : vector<16x128xf32>
    %cst_177 = arith.constant 1.000000e+00 : f32
    %933 = vector.broadcast %cst_177 : f32 to vector<16x128xf32>
    %934 = arith.addf %933, %932 : vector<16x128xf32>
    %935 = arith.divf %933, %934 : vector<16x128xf32>
    %936 = arith.mulf %929, %935 : vector<16x128xf32>
    %937 = arith.mulf %936, %930 : vector<16x128xf32>
    %c0_178 = arith.constant 0 : index
    %c0_179 = arith.constant 0 : index
    %938 = vector.load %arg16[%c0_178, %c0_179] : memref<128x32xf32, #tpu.memory_space<vmem>>, vector<128x32xf32>
    %cst_180 = arith.constant dense<0.000000e+00> : vector<16x32xf32>
    %939 = tpu.matmul %937, %938, %cst_180 {dimension_numbers = #tpu.dot_dimension_numbers<[1], [0], [0], [1], [0, 0, 1, 1], [], []>} : vector<16x128xf32>, vector<128x32xf32>, vector<16x32xf32> -> vector<16x32xf32>
    %940 = arith.addf %913, %939 : vector<16x32xf32>
    %c0_181 = arith.constant 0 : index
    %c0_182 = arith.constant 0 : index
    %941 = vector.load %arg17[%c0_181, %c0_182] : memref<1x32xf32, #tpu.memory_space<vmem>>, vector<1x32xf32>
    %942 = arith.mulf %940, %940 : vector<16x32xf32>
    %cst_183 = arith.constant dense<0.000000e+00> : vector<16xf32>
    %943 = vector.multi_reduction <add>, %942, %cst_183 [1] : vector<16x32xf32> to vector<16xf32>
    %944 = vector.shape_cast %943 : vector<16xf32> to vector<16x1xf32>
    %cst_184 = arith.constant 3.200000e+01 : f32
    %945 = vector.broadcast %cst_184 : f32 to vector<16x1xf32>
    %946 = arith.divf %944, %945 : vector<16x1xf32>
    %cst_185 = arith.constant 1.1920929E-7 : f32
    %947 = vector.broadcast %cst_185 : f32 to vector<16x1xf32>
    %948 = arith.addf %946, %947 : vector<16x1xf32>
    %949 = math.rsqrt %948 : vector<16x1xf32>
    %950 = vector.broadcast %949 : vector<16x1xf32> to vector<16x32xf32>
    %951 = arith.mulf %940, %950 : vector<16x32xf32>
    %952 = vector.broadcast %941 : vector<1x32xf32> to vector<16x32xf32>
    %953 = arith.mulf %951, %952 : vector<16x32xf32>
    %c0_186 = arith.constant 0 : index
    %c0_187 = arith.constant 0 : index
    %954 = vector.load %arg2[%c0_186, %c0_187] : memref<32x64xf32, #tpu.memory_space<vmem>>, vector<32x64xf32>
    %cst_188 = arith.constant dense<0.000000e+00> : vector<16x64xf32>
    %955 = tpu.matmul %953, %954, %cst_188 {dimension_numbers = #tpu.dot_dimension_numbers<[1], [0], [0], [1], [0, 0, 1, 1], [], []>} : vector<16x32xf32>, vector<32x64xf32>, vector<16x64xf32> -> vector<16x64xf32>
    %c0_189 = arith.constant 0 : index
    %c0_190 = arith.constant 0 : index
    %956 = vector.load %arg18[%c0_189, %c0_190] : memref<16x64xf32, #tpu.memory_space<vmem>>, vector<16x64xf32>
    tpu.vector_store %arg18[%c0_189, %c0_190], %955 {strides = array<i32>} : memref<16x64xf32, #tpu.memory_space<vmem>>, vector<16x64xf32>,
    return
  }
}

</mosaic_0001>

<bundles_post_ra>
// kernel: gpt_forward.1
= control target key start
LH: loop header
LB: loop body
LE: loop exit
PB: predicated region body
PF: predicated region fallthrough
CT: control target
= control target key end

     0   :  { %v5347_v0 = vmov 0   ;;  %v5348_v3 = vmov 0.0   ;;  %v61_v12 = vlaneseq  ;;  %vm83_vm0 = vcmask 523264   ;;  %s5350_s20 = smov 4   ;;  %s5354_s21 = smov 20   ;;  %s6646_s0 = inlined_call_operand.vmem [shape: s32[16,1], index: 0, kind: input, shape index: {}]   ;;  %s6647_s1 = inlined_call_operand.vmem [shape: f32[64,32], index: 1, kind: input, shape index: {}]   ;;  %s6648_s6 = inlined_call_operand.vmem [shape: f32[32,96], index: 6, kind: input, shape index: {}]   ;;  %s6649_s4 = inlined_call_operand.vmem [shape: f32[4,4], index: 4, kind: input, shape index: {}]   ;;  %s6650_s3 = inlined_call_operand.vmem [shape: f32[4,4], index: 3, kind: input, shape index: {}]   ;;  %s6651_s5 = inlined_call_operand.vmem [shape: f32[1,32], index: 5, kind: input, shape index: {}]   ;;  %s6652_s7 = inlined_call_operand.vmem [shape: f32[32,32], index: 7, kind: input, shape index: {}]   ;;  %s6653_s9 = inlined_call_operand.vmem [shape: f32[32,256], index: 9, kind: input, shape index: {}]   ;;  %s6654_s8 = inlined_call_operand.vmem [shape: f32[1,32], index: 8, kind: input, shape index: {}]   ;;  %s6655_s10 = inlined_call_operand.vmem [shape: f32[128,32], index: 10, kind: input, shape index: {}]   ;;  %s6656_s12 = inlined_call_operand.vmem [shape: f32[32,96], index: 12, kind: input, shape index: {}]   ;;  %s6657_s11 = inlined_call_operand.vmem [shape: f32[1,32], index: 11, kind: input, shape index: {}]   ;;  %s6658_s13 = inlined_call_operand.vmem [shape: f32[32,32], index: 13, kind: input, shape index: {}]   ;;  %s6659_s15 = inlined_call_operand.vmem [shape: f32[32,256], index: 15, kind: input, shape index: {}]   ;;  %s6660_s14 = inlined_call_operand.vmem [shape: f32[1,32], index: 14, kind: input, shape index: {}]   ;;  %s6661_s16 = inlined_call_operand.vmem [shape: f32[128,32], index: 16, kind: input, shape index: {}]   ;;  %s6662_s2 = inlined_call_operand.vmem [shape: f32[32,64], index: 2, kind: input, shape index: {}]   ;;  %s6663_s17 = inlined_call_operand.vmem [shape: f32[1,32], index: 17, kind: input, shape index: {}]   ;;  %s6664_s18 = inlined_call_operand.vmem [shape: f32[16,64], index: 18, kind: output, shape index: {}]  }
   0x1   :  { %6694 = sst [smem:[#allocation2_spill]] %s6646_s0  ;;  %5246 = vset.pattern.permute.xlu0 %v5347_v0  ;;  %4939 = vmatprep.subr.mxu0 %v5348_v3  ;;  %vm173_vm3 = vcmask 261120   ;;  %v166_v30 = vld [vmem:[%s6649_s4] sm:$0xf]  ;;  %s5352_s4 = smov 44   ;;  %vm5370_vm4 = vmmov 0  }
   0x2   :  { %6695 = sst [smem:[#allocation3_spill]] %s6647_s1  ;;  %v5506_v13 = vand.u32 127, %v61_v12  ;;  %v5533_v27 = vshrl.u32 %v61_v12, 7  ;;  %v165_v31 = vld [vmem:[%s6650_s3] sm:$0xf]  ;;  %s5349_s1 = smov 36   ;;  %4941 = vmatprep.mubr.msk.f32.mxu0 %vm5370_vm4, %v5348_v3 }
   0x3   :  { %6696 = sst [smem:[#allocation4_spill]] %s6648_s6  ;;  %s5351_s3 = smov 12   ;;  %v4698_v50 = vld [vmem:[%s6651_s5] ss:$0 sm:$0xff]  ;;  %vm354_vm5 = vcmask 64512   ;;  %vm317_vm6 = vcmask 31744  }
   0x4   :  { %s6697_s29 = sld [smem:[#allocation2_spill]]  ;;  %v284_v29 = vsub.s32 0, %v5533_v27  ;;  %v523_v34 = vsub.s32 1, %v5533_v27  ;;  %v768_v36 = vsub.s32 2, %v5533_v27  ;;  %v1013_v39 = vsub.s32 3, %v5533_v27  ;;  %s5356_s6 = smov 28  }
   0x5   :  { %s6698_s19 = sld [smem:[#allocation3_spill]]  ;;  %s5357_s23 = smov 32   ;;  %vm5908_vm7 = vcmp.ge.s32.totalorder %v5533_v27, %v5506_v13  ;;  %vm1269_vm8 = vcmask 130048   ;;  %vm1271_vm9 = vcmask 195584  }
   0x6   :  { %s6699_s22 = sld [smem:[#allocation4_spill]]  ;;  %v5546_v32 = vrot.slane %v166_v30, %v284_v29  ;;  %v5548_v33 = vrot.slane %v165_v31, %v284_v29  ;;  %v524_v35 = vrot.slane %v165_v31, %v523_v34  ;;  %v533_v37 = vrot.slane %v166_v30, %v523_v34  ;;  %s6678_s24 = smov 40  }
   0x7   :  { %v769_v38 = vrot.slane %v165_v31, %v768_v36  ;;  %v1014_v40 = vrot.slane %v165_v31, %v1013_v39  ;;  %v778_v41 = vrot.slane %v166_v30, %v768_v36  ;;  %v1023_v42 = vrot.slane %v166_v30, %v1013_v39  ;;  %s5359_s25 = smov 8   ;;  %s6676_s26 = smov 48  }
   0x8   :  { %s5361_s27 = smov 16   ;;  %s5362_s28 = smov 56  }
   0x9   :  { %s5364_s5 = smov 124   ;;  %s6688_s30 = smov 112  }
   0xa   :  { %v59_v1 = vld [vmem:[%s6697_s29] sm:$0xff]  ;;  %v60_v5 = vld [vmem:[%s6697_s29 + $0x8] sm:$0xff]  ;;  %s6692_s29 = smov 24   ;;  %s6684_s0 = smov 76  }
   0xb   :  { %v82_v2 = vld [vmem:[%s6698_s19 + $0x38] sm:$0xff]  ;;  %64 = vperm.xlu0 %5246, %v59_v1   ;;  %v81_v4 = vld [vmem:[%s6698_s19 + $0x30] sm:$0xff]  ;;  %v80_v6 = vld [vmem:[%s6698_s19 + $0x28] sm:$0xff] }
   0xc   :  { %4909 = vmatprep.subr.mxu1 %v82_v2  ;;  %v79_v7 = vld [vmem:[%s6698_s19 + $0x20] sm:$0xff]  ;;  %v78_v8 = vld [vmem:[%s6698_s19 + $0x18] sm:$0xff]  ;;  %v77_v9 = vld [vmem:[%s6698_s19 + $0x10] sm:$0xff] }
   0xd   :  { %4910 = vmatpush3.msra.mxu1 %v82_v2  ;;  %v76_v10 = vld [vmem:[%s6698_s19 + $0x8] sm:$0xff]  ;;  %v75_v11 = vld [vmem:[%s6698_s19] sm:$0xff]  ;;  %v200_v24 = vld [vmem:[%s6699_s22 + $0x18] sm:$0xff]  ;;  %s5353_s19 = smov 52  }
   0xe   :  { %4911 = vmatprep.subr.mxu1 %v81_v4  ;;  %v199_v25 = vld [vmem:[%s6699_s22 + $0x10] sm:$0xff]  ;;  %v198_v26 = vld [vmem:[%s6699_s22 + $0x8] sm:$0xff]  ;;  %v197_v28 = vld [vmem:[%s6699_s22] sm:$0xff]  ;;  %s5355_s22 = smov 60  }
   0xf   :  { %4912 = vmatpush3.msra.mxu1 %v81_v4  ;;  %67 = vperm.xlu0 %5246, %v60_v5  }
  0x10   :  { %4913 = vmatprep.subr.mxu1 %v80_v6 }
  0x11   :  { %4914 = vmatpush3.msra.mxu1 %v80_v6 }
  0x12   :  { %4915 = vmatprep.subr.mxu1 %v79_v7 }
  0x13   :  { %4916 = vmatpush3.msra.mxu1 %v79_v7  ;;  %323 = vrot.lane.b32.xlu0 %v5546_v32, %s5349_s1 }
  0x14   :  { %4917 = vmatprep.subr.mxu1 %v78_v8 }
  0x15   :  { %4918 = vmatpush3.msra.mxu1 %v78_v8 }
  0x16   :  { %4919 = vmatprep.subr.mxu1 %v77_v9 }
  0x17   :  { %4920 = vmatpush3.msra.mxu1 %v77_v9  ;;  %304 = vrot.lane.b32.xlu0 %v5548_v33, %s5350_s20 }
  0x18   :  { %4921 = vmatprep.subr.mxu1 %v76_v10 }
  0x19   :  { %4922 = vmatpush3.msra.mxu1 %v76_v10 }
  0x1a   :  { %4923 = vmatprep.subr.mxu1 %v75_v11 }
  0x1b   :  { %4924 = vmatpush3.msra.mxu1 %v75_v11  ;;  %570 = vrot.lane.b32.xlu0 %v533_v37, %s5352_s4 }
  0x1c   :  { %4928 = vmatprep.subr.mxu1 %v200_v24 }
  0x1f   :  { %583 = vrot.lane.b32.xlu0 %v524_v35, %s5352_s4  ;;  %s6672_s4 = smov 88  }
  0x23   :  { %535 = vrot.lane.b32.xlu0 %v533_v37, %s5351_s3 }
  0x27   :  { %815 = vrot.lane.b32.xlu0 %v778_v41, %s5353_s19 }
  0x2b   :  { %780 = vrot.lane.b32.xlu0 %v778_v41, %s5354_s21 }
  0x2f   :  { %1060 = vrot.lane.b32.xlu0 %v1023_v42, %s5355_s22 }
  0x33   :  { %1025 = vrot.lane.b32.xlu0 %v1023_v42, %s5356_s6 }
  0x37   :  { %319 = vrot.lane.b32.xlu0 %v5548_v33, %s5357_s23 }
  0x3b   :  { %292 = vrot.lane.b32.xlu0 %v5546_v32, %s5350_s20 }
  0x3f   :  { %579 = vrot.lane.b32.xlu0 %v533_v37, %s6678_s24 }
  0x43   :  { %526 = vrot.lane.b32.xlu0 %v524_v35, %s5359_s25 }
  0x47   :  { %811 = vrot.lane.b32.xlu0 %v769_v38, %s6676_s26 }
  0x4b   :  { %771 = vrot.lane.b32.xlu0 %v769_v38, %s5361_s27 }
  0x4f   :  { %1056 = vrot.lane.b32.xlu0 %v1014_v40, %s5362_s28 }
  0x53   :  { %1016 = vrot.lane.b32.xlu0 %v1014_v40, %s6692_s29 }
  0x86   :  { %v65_v14 = vpop.permute.xlu0 %64 }
  0x87   :  { %vm69_vm1 = vcmp.eq.s32.totalorder %v5506_v13, %v65_v14 }
  0x88   :  { %v4694_v15 = vsel %vm69_vm1, 1.0, %v5348_v3 }
  0x89   :  { %4925 = vmatprep.mubr.msk.f32.mxu1 %vm83_vm0, %v4694_v15 }
  0x8a   :  { %v68_v16 = vpop.permute.xlu0 %67 }
  0x8b   :  { %vm70_vm2 = vcmp.eq.s32.totalorder %v5506_v13, %v68_v16 }
  0x8c   :  { %v4695_v17 = vsel %vm70_vm2, 1.0, %v5348_v3 }
  0x8d   :  { %4926 = vmatmul.mubr.msk.f32.vlgmr.msra.gmra.mxu1 %vm83_vm0, %v4695_v17 }
  0x8e   :  { %4929 = vmatpush3.msra.mxu1 %v200_v24  ;;  %v5580_v56 = vpop.permute.xlu0 %323 }
  0x8f   :  { %4930 = vmatprep.subr.mxu1 %v199_v25 }
  0x90   :  { %4931 = vmatpush3.msra.mxu1 %v199_v25 }
  0x91   :  { %4932 = vmatprep.subr.mxu1 %v198_v26 }
  0x92   :  { %4933 = vmatpush3.msra.mxu1 %v198_v26  ;;  %v5582_v57 = vpop.permute.xlu0 %304 }
  0x93   :  { %4934 = vmatprep.subr.mxu1 %v197_v28 }
  0x94   :  { %4935 = vmatpush3.msra.mxu1 %v197_v28 }
  0x95   :  { %4944 = vmatprep.subr.mxu1 %v5348_v3 }
  0x96   :  { %v5584_v58 = vpop.permute.xlu0 %570 }
  0x9a   :  { %v5588_v60 = vpop.permute.xlu0 %583 }
  0x9e   :  { %v5602_v2 = vpop.permute.xlu0 %535 }
  0xa2   :  { %v5614_v7 = vpop.permute.xlu0 %815 }
 0x14d   :  { %v5514_v18 = vpop.f32.mrf.mxu1 }
 0x14e   :  { %v172_v22 = vmul.f32 %v5514_v18, %v5514_v18 }
 0x14f   :  { %v5516_v19 = vpop.f32.mrf.mxu1 }
 0x150   :  { %v171_v20 = vmul.f32 %v5516_v19, %v5516_v19  ;;  %v177_v23 = vsel %vm173_vm3, %v172_v22, 0.0 }
 0x152   :  { %v174_v21 = vsel %vm173_vm3, %v171_v20, 0.0 }
 0x153   :  { %175 = vadd.xlane.f32.xlu1 %v174_v21 }
 0x157   :  { %178 = vadd.xlane.f32.xlu1 %v177_v23  ;;  %v5650_v23 = vpop.permute.xlu0 %780 }
 0x15b   :  { %v5664_v30 = vpop.permute.xlu0 %1060 }
 0x15f   :  { %v5676_v36 = vpop.permute.xlu0 %1025 }
 0x168   :  { %336 = vrot.lane.b32.xlu1 %v5548_v33, %s5349_s1  ;;  %s5365_s1 = smov 100  }
 0x16c   :  { %548 = vrot.lane.b32.xlu1 %v524_v35, %s5351_s3  ;;  %s5366_s3 = smov 96  }
 0x170   :  { %828 = vrot.lane.b32.xlu1 %v769_v38, %s5353_s19  ;;  %s6670_s19 = smov 120  }
 0x174   :  { %793 = vrot.lane.b32.xlu1 %v769_v38, %s5354_s21  ;;  %s6668_s21 = smov 92  }
 0x178   :  { %1073 = vrot.lane.b32.xlu1 %v1014_v40, %s5355_s22  ;;  %s6690_s22 = smov 84  }
 0x17c   :  { %1038 = vrot.lane.b32.xlu1 %v1014_v40, %s5356_s6  ;;  %s5372_s6 = smov 80  }
 0x180   :  { %332 = vrot.lane.b32.xlu1 %v5546_v32, %s5357_s23  ;;  %s6674_s23 = smov 116  }
 0x184   :  { %566 = vrot.lane.b32.xlu1 %v524_v35, %s6678_s24 }
 0x188   :  { %544 = vrot.lane.b32.xlu1 %v533_v37, %s5359_s25 }
 0x18c   :  { %824 = vrot.lane.b32.xlu1 %v778_v41, %s6676_s26 }
 0x190   :  { %789 = vrot.lane.b32.xlu1 %v778_v41, %s5361_s27 }
 0x194   :  { %1069 = vrot.lane.b32.xlu1 %v1023_v42, %s5362_s28 }
 0x198   :  { %1034 = vrot.lane.b32.xlu1 %v1023_v42, %s6692_s29 }
 0x1dc   :  { %v176_v43 = vpop.xlane.xlu1 %175 }
 0x1dd   :  { %v181_v44 = vmul.f32 0.03125, %v176_v43 }
 0x1df   :  { %v183_v45 = vadd.f32 1.1920929e-07, %v181_v44  ;;  %v5696_v44 = vpop.permute.xlu0 %319 }
 0x1e0   :  { %v179_v46 = vpop.xlane.xlu1 %178 }
 0x1e1   :  { %5247 = vrsqrt.f32 %v183_v45  ;;  %v182_v47 = vmul.f32 0.03125, %v179_v46 }
 0x1e3   :  { %v184_v48 = vadd.f32 1.1920929e-07, %v182_v47  ;;  %v5706_v47 = vpop.permute.xlu0 %292 }
 0x1e4   :  { %v5586_v59 = vpop.permute.xlu1 %336 }
 0x1e5   :  { %5249 = vrsqrt.f32 %v184_v48 }
 0x1e8   :  { %v5610_v6 = vpop.permute.xlu1 %548 }
 0x1ec   :  { %v5624_v11 = vpop.permute.xlu1 %828 }
 0x1ee   :  { %v5248_v49 = vpop.eup %5247 }
 0x1ef   :  { %v187_v51 = vmul.f32 %v5248_v49, %v5516_v19 }
 0x1f0   :  { %v5652_v24 = vpop.permute.xlu1 %793 }
 0x1f1   :  { %v195_v52 = vmul.f32 %v4698_v50, %v187_v51  ;;  %v5716_v51 = vpop.permute.xlu0 %579 }
 0x1f2   :  { %v5250_v53 = vpop.eup %5249 }
 0x1f3   :  { %v188_v54 = vmul.f32 %v5250_v53, %v5514_v18  ;;  %4936 = vmatprep.mubr.msk.f32.mxu1 %vm173_vm3, %v195_v52 }
 0x1f4   :  { %v5666_v31 = vpop.permute.xlu1 %1073 }
 0x1f5   :  { %v196_v55 = vmul.f32 %v4698_v50, %v188_v54  ;;  %v5720_v53 = vpop.permute.xlu0 %526 }
 0x1f7   :  { %4937 = vmatmul.mubr.msk.f32.vlgmr.msra.gmra.mxu1 %vm173_vm3, %v196_v55 }
 0x1f8   :  { %v5678_v37 = vpop.permute.xlu1 %1038  ;;  %4946 = vmatprep.mubr.msk.f32.mxu1 %vm5370_vm4, %v5348_v3 }
 0x1f9   :  { %v5724_v55 = vpop.permute.xlu0 %811 }
 0x1fc   :  { %v5714_v50 = vpop.permute.xlu1 %332 }
 0x200   :  { %v5718_v52 = vpop.permute.xlu1 %566 }
 0x204   :  { %v5722_v54 = vpop.permute.xlu1 %544 }
 0x2b7   :  { %v5590_v61 = vpop.f32.mrf.mxu1 }
 0x2b8   :  { %v1301_v62 = vmul.f32 %v5590_v61, %v5586_v59  ;;  %v1294_v63 = vmul.f32 %v5590_v61, %v5580_v56  ;;  %v1282_v0 = vmul.f32 %v5590_v61, %v5582_v57  ;;  %v1506_v1 = vmul.f32 %v5590_v61, %v5584_v58 }
 0x2b9   :  { %v1513_v4 = vmul.f32 %v5590_v61, %v5588_v60  ;;  %v1483_v5 = vmul.f32 %v5590_v61, %v5602_v2  ;;  %v1490_v8 = vmul.f32 %v5590_v61, %v5610_v6  ;;  %v1717_v9 = vmul.f32 %v5590_v61, %v5614_v7  ;;  %v5620_v10 = vpop.f32.mrf.mxu1 }
 0x2ba   :  { %1303 = vrot.lane.b32.xlu1 %v1301_v62, %s5364_s5  ;;  %1296 = vrot.lane.b32.xlu0 %v1294_v63, %s5364_s5  ;;  %v1724_v12 = vmul.f32 %v5590_v61, %v5624_v11  ;;  %v339_v14 = vmul.f32 %v5586_v59, %v5620_v10  ;;  %v326_v15 = vmul.f32 %v5580_v56, %v5620_v10  ;;  %v5726_v62 = vpop.permute.xlu1 %824  ;;  %v5728_v63 = vpop.permute.xlu0 %771 }
 0x2bb   :  { %v307_v16 = vmul.f32 %v5582_v57, %v5620_v10  ;;  %v573_v17 = vmul.f32 %v5584_v58, %v5620_v10  ;;  %v586_v20 = vmul.f32 %v5588_v60, %v5620_v10  ;;  %v538_v21 = vmul.f32 %v5602_v2, %v5620_v10 }
 0x2bc   :  { %v551_v22 = vmul.f32 %v5610_v6, %v5620_v10  ;;  %v831_v25 = vmul.f32 %v5624_v11, %v5620_v10  ;;  %v818_v26 = vmul.f32 %v5614_v7, %v5620_v10  ;;  %v796_v28 = vmul.f32 %v5652_v24, %v5620_v10 }
 0x2bd   :  { %v783_v29 = vmul.f32 %v5650_v23, %v5620_v10  ;;  %v1076_v34 = vmul.f32 %v5666_v31, %v5620_v10  ;;  %v1063_v35 = vmul.f32 %v5664_v30, %v5620_v10  ;;  %v1041_v38 = vmul.f32 %v5678_v37, %v5620_v10 }
 0x2be   :  { %1284 = vrot.lane.b32.xlu0 %v1282_v0, %s5364_s5  ;;  %1508 = vrot.lane.b32.xlu1 %v1506_v1, %s5364_s5  ;;  %v1028_v39 = vmul.f32 %v5676_v36, %v5620_v10  ;;  %v1694_v40 = vmul.f32 %v5590_v61, %v5650_v23  ;;  %v1701_v41 = vmul.f32 %v5590_v61, %v5652_v24  ;;  %v5730_v0 = vpop.permute.xlu1 %789  ;;  %v5732_v1 = vpop.permute.xlu0 %1056 }
 0x2bf   :  { %v1928_v42 = vmul.f32 %v5590_v61, %v5664_v30  ;;  %v1935_v43 = vmul.f32 %v5590_v61, %v5666_v31  ;;  %v1905_v45 = vmul.f32 %v5590_v61, %v5676_v36  ;;  %v1912_v46 = vmul.f32 %v5590_v61, %v5678_v37 }
 0x2c0   :  { %v1274_v48 = vmul.f32 %v5590_v61, %v5706_v47  ;;  %v295_v49 = vmul.f32 %v5706_v47, %v5620_v10 }
 0x2c2   :  { %1515 = vrot.lane.b32.xlu0 %v1513_v4, %s5364_s5  ;;  %1485 = vrot.lane.b32.xlu1 %v1483_v5, %s5364_s5  ;;  %v5734_v4 = vpop.permute.xlu1 %1069  ;;  %v5737_v5 = vsub.f32 0.0, %v5590_v61 }
 0x2c6   :  { %1492 = vrot.lane.b32.xlu0 %v1490_v8, %s5364_s5  ;;  %1719 = vrot.lane.b32.xlu1 %v1717_v9, %s5364_s5  ;;  %v5739_v8 = vpop.permute.xlu0 %1016  ;;  %v5741_v9 = vpop.permute.xlu1 %1034 }
 0x2ca   :  { %1726 = vrot.lane.b32.xlu0 %v1724_v12, %s5364_s5  ;;  %341 = vrot.lane.b32.xlu1 %v339_v14, %s5364_s5  ;;  %v1300_v12 = vmul.f32 %v5737_v5, %v5714_v50  ;;  %v1293_v14 = vmul.f32 %v5590_v61, %v5696_v44 }
 0x2ce   :  { %328 = vrot.lane.b32.xlu0 %v326_v15, %s5364_s5  ;;  %309 = vrot.lane.b32.xlu1 %v307_v16, %s5364_s5 }
 0x2d2   :  { %575 = vrot.lane.b32.xlu0 %v573_v17, %s5364_s5  ;;  %588 = vrot.lane.b32.xlu1 %v586_v20, %s5364_s5 }
 0x2d6   :  { %540 = vrot.lane.b32.xlu0 %v538_v21, %s5364_s5  ;;  %553 = vrot.lane.b32.xlu1 %v551_v22, %s5364_s5  ;;  %v1505_v21 = vmul.f32 %v5590_v61, %v5718_v52  ;;  %v1281_v22 = vmul.f32 %v5737_v5, %v5546_v32 }
 0x2da   :  { %833 = vrot.lane.b32.xlu1 %v831_v25, %s5364_s5  ;;  %820 = vrot.lane.b32.xlu0 %v818_v26, %s5364_s5 }
 0x2de   :  { %798 = vrot.lane.b32.xlu1 %v796_v28, %s5364_s5  ;;  %785 = vrot.lane.b32.xlu0 %v783_v29, %s5364_s5 }
 0x2e2   :  { %1078 = vrot.lane.b32.xlu1 %v1076_v34, %s5364_s5  ;;  %1065 = vrot.lane.b32.xlu0 %v1063_v35, %s5364_s5  ;;  %v1482_v34 = vmul.f32 %v5590_v61, %v5720_v53  ;;  %v1512_v35 = vmul.f32 %v5737_v5, %v5716_v51 }
 0x2e6   :  { %1043 = vrot.lane.b32.xlu1 %v1041_v38, %s5364_s5  ;;  %1030 = vrot.lane.b32.xlu0 %v1028_v39, %s5364_s5 }
 0x2ea   :  { %1696 = vrot.lane.b32.xlu1 %v1694_v40, %s5364_s5  ;;  %1703 = vrot.lane.b32.xlu0 %v1701_v41, %s5364_s5 }
 0x2ee   :  { %1930 = vrot.lane.b32.xlu1 %v1928_v42, %s5364_s5  ;;  %1937 = vrot.lane.b32.xlu0 %v1935_v43, %s5364_s5  ;;  %v1489_v42 = vmul.f32 %v5737_v5, %v5722_v54  ;;  %v5764_v43 = vsub.f32 0.0, %v5620_v10 }
 0x2f2   :  { %1907 = vrot.lane.b32.xlu1 %v1905_v45, %s5364_s5  ;;  %1914 = vrot.lane.b32.xlu0 %v1912_v46, %s5364_s5 }
 0x2f6   :  { %1276 = vrot.lane.b32.xlu1 %v1274_v48, %s5364_s5 }
 0x2fa   :  { %297 = vrot.lane.b32.xlu1 %v295_v49, %s5364_s5  ;;  %v335_v49 = vmul.f32 %v5714_v50, %v5764_v43 }
 0x32c   :  { %v1304_v15 = vpop.permute.xlu1 %1303  ;;  %v1297_v16 = vpop.permute.xlu0 %1296 }
 0x32d   :  { %v1306_v17 = vadd.f32 %v1304_v15, %v1300_v12  ;;  %v1299_v20 = vadd.f32 %v1297_v16, %v1293_v14  ;;  %v302_v16 = vmul.f32 %v5764_v43, %v5546_v32 }
 0x32f   :  { %1312 = vrot.lane.b32.xlu0 %v1306_v17, %s5365_s1  ;;  %1308 = vrot.lane.b32.xlu1 %v1299_v20, %s5366_s3  ;;  %v322_v17 = vmul.f32 %v5696_v44, %v5620_v10 }
 0x330   :  { %v1509_v25 = vpop.permute.xlu1 %1508  ;;  %v1285_v26 = vpop.permute.xlu0 %1284 }
 0x331   :  { %v1511_v28 = vadd.f32 %v1509_v25, %v1505_v21  ;;  %v1287_v29 = vadd.f32 %v1285_v26, %v1281_v22  ;;  %v582_v26 = vmul.f32 %v5716_v51, %v5764_v43 }
 0x333   :  { %1520 = vrot.lane.b32.xlu1 %v1511_v28, %s6672_s4  ;;  %1289 = vrot.lane.b32.xlu0 %v1287_v29, %s5350_s20  ;;  %v569_v28 = vmul.f32 %v5718_v52, %v5620_v10 }
 0x334   :  { %v1486_v38 = vpop.permute.xlu1 %1485  ;;  %v1516_v39 = vpop.permute.xlu0 %1515 }
 0x335   :  { %v1488_v40 = vadd.f32 %v1486_v38, %v1482_v34  ;;  %v1518_v41 = vadd.f32 %v1516_v39, %v1512_v35  ;;  %v547_v39 = vmul.f32 %v5722_v54, %v5764_v43 }
 0x337   :  { %1497 = vrot.lane.b32.xlu1 %v1488_v40, %s6670_s19  ;;  %1524 = vrot.lane.b32.xlu0 %v1518_v41, %s6668_s21  ;;  %v529_v40 = vmul.f32 %v5720_v53, %v5620_v10 }
 0x338   :  { %v5766_v45 = vpop.permute.xlu1 %1719  ;;  %v1493_v46 = vpop.permute.xlu0 %1492 }
 0x339   :  { %v1495_v48 = vadd.f32 %v1493_v46, %v1489_v42 }
 0x33b   :  { %1501 = vrot.lane.b32.xlu0 %v1495_v48, %s5364_s5 }
 0x33c   :  { %v342_v12 = vpop.permute.xlu1 %341  ;;  %v5775_v14 = vpop.permute.xlu0 %1726 }
 0x33d   :  { %v344_v15 = vadd.f32 %v342_v12, %v335_v49  ;;  %v827_v49 = vmul.f32 %v5726_v62, %v5764_v43  ;;  %v814_v12 = vmul.f32 %v5724_v55, %v5620_v10 }
 0x33f   :  { %350 = vrot.lane.b32.xlu0 %v344_v15, %s5365_s1 }
 0x340   :  { %v310_v20 = vpop.permute.xlu1 %309  ;;  %v329_v21 = vpop.permute.xlu0 %328 }
 0x341   :  { %v312_v22 = vadd.f32 %v310_v20, %v302_v16  ;;  %v331_v25 = vadd.f32 %v329_v21, %v322_v17  ;;  %v792_v21 = vmul.f32 %v5730_v0, %v5764_v43 }
 0x343   :  { %314 = vrot.lane.b32.xlu0 %v312_v22, %s5350_s20  ;;  %346 = vrot.lane.b32.xlu1 %v331_v25, %s5366_s3  ;;  %v774_v22 = vmul.f32 %v5728_v63, %v5620_v10 }
 0x344   :  { %v589_v29 = vpop.permute.xlu1 %588  ;;  %v576_v34 = vpop.permute.xlu0 %575 }
 0x345   :  { %v591_v35 = vadd.f32 %v589_v29, %v582_v26  ;;  %v578_v38 = vadd.f32 %v576_v34, %v569_v28  ;;  %v1072_v34 = vmul.f32 %v5734_v4, %v5764_v43 }
 0x347   :  { %597 = vrot.lane.b32.xlu0 %v591_v35, %s6668_s21  ;;  %593 = vrot.lane.b32.xlu1 %v578_v38, %s6672_s4  ;;  %v1059_v35 = vmul.f32 %v5732_v1, %v5620_v10  ;;  %s6686_s21 = smov 72   ;;  %s6682_s4 = smov 104  }
 0x348   :  { %v554_v41 = vpop.permute.xlu1 %553  ;;  %v541_v42 = vpop.permute.xlu0 %540 }
 0x349   :  { %v556_v46 = vadd.f32 %v554_v41, %v547_v39  ;;  %v543_v48 = vadd.f32 %v541_v42, %v529_v40  ;;  %v1037_v42 = vmul.f32 %v5741_v9, %v5764_v43 }
 0x34b   :  { %562 = vrot.lane.b32.xlu0 %v556_v46, %s5364_s5  ;;  %558 = vrot.lane.b32.xlu1 %v543_v48, %s6670_s19  ;;  %v1019_v46 = vmul.f32 %v5739_v8, %v5620_v10  ;;  %s6680_s19 = smov 108  }
 0x34c   :  { %v834_v15 = vpop.permute.xlu1 %833  ;;  %v821_v16 = vpop.permute.xlu0 %820 }
 0x34d   :  { %v836_v17 = vadd.f32 %v834_v15, %v827_v49  ;;  %v823_v20 = vadd.f32 %v821_v16, %v814_v12  ;;  %v1716_v16 = vmul.f32 %v5590_v61, %v5724_v55 }
 0x34f   :  { %842 = vrot.lane.b32.xlu0 %v836_v17, %s6690_s22  ;;  %838 = vrot.lane.b32.xlu1 %v823_v20, %s5372_s6  ;;  %v1723_v17 = vmul.f32 %v5737_v5, %v5726_v62 }
 0x350   :  { %v799_v25 = vpop.permute.xlu1 %798  ;;  %v786_v26 = vpop.permute.xlu0 %785 }
 0x351   :  { %v801_v28 = vadd.f32 %v799_v25, %v792_v21  ;;  %v788_v29 = vadd.f32 %v786_v26, %v774_v22  ;;  %v1722_v21 = vadd.f32 %v5766_v45, %v1716_v16  ;;  %v1729_v22 = vadd.f32 %v5775_v14, %v1723_v17 }
 0x352   :  { %v1693_v25 = vmul.f32 %v5590_v61, %v5728_v63  ;;  %v1700_v26 = vmul.f32 %v5737_v5, %v5730_v0  ;;  %v1934_v45 = vmul.f32 %v5737_v5, %v5734_v4 }
 0x353   :  { %807 = vrot.lane.b32.xlu0 %v801_v28, %s6674_s23  ;;  %803 = vrot.lane.b32.xlu1 %v788_v29, %s6688_s30 }
 0x354   :  { %v1079_v38 = vpop.permute.xlu1 %1078  ;;  %v1066_v39 = vpop.permute.xlu0 %1065 }
 0x355   :  { %v1081_v40 = vadd.f32 %v1079_v38, %v1072_v34  ;;  %v1068_v41 = vadd.f32 %v1066_v39, %v1059_v35  ;;  %v1927_v38 = vmul.f32 %v5590_v61, %v5732_v1 }
 0x357   :  { %1087 = vrot.lane.b32.xlu0 %v1081_v40, %s6684_s0  ;;  %1083 = vrot.lane.b32.xlu1 %v1068_v41, %s6686_s21 }
 0x358   :  { %v1044_v48 = vpop.permute.xlu1 %1043  ;;  %v1031_v49 = vpop.permute.xlu0 %1030 }
 0x359   :  { %v1046_v12 = vadd.f32 %v1044_v48, %v1037_v42  ;;  %v1033_v15 = vadd.f32 %v1031_v49, %v1019_v46  ;;  %v1904_v42 = vmul.f32 %v5590_v61, %v5739_v8  ;;  %v1911_v46 = vmul.f32 %v5737_v5, %v5741_v9 }
 0x35b   :  { %1052 = vrot.lane.b32.xlu0 %v1046_v12, %s6680_s19  ;;  %1048 = vrot.lane.b32.xlu1 %v1033_v15, %s6682_s4 }
 0x35c   :  { %v1697_v43 = vpop.permute.xlu1 %1696  ;;  %v1704_v20 = vpop.permute.xlu0 %1703 }
 0x35d   :  { %v1699_v34 = vadd.f32 %v1697_v43, %v1693_v25  ;;  %v1706_v35 = vadd.f32 %v1704_v20, %v1700_v26  ;;  %v286_v26 = vmul.f32 %v5548_v33, %v5620_v10 }
 0x35f   :  { %1735 = vrot.lane.b32.xlu0 %v1729_v22, %s6690_s22  ;;  %1731 = vrot.lane.b32.xlu1 %v1722_v21, %s5372_s6 }
 0x360   :  { %v1931_v28 = vpop.permute.xlu1 %1930  ;;  %v1938_v29 = vpop.permute.xlu0 %1937 }
 0x361   :  { %v1933_v14 = vadd.f32 %v1931_v28, %v1927_v38  ;;  %v1940_v39 = vadd.f32 %v1938_v29, %v1934_v45 }
 0x363   :  { %1708 = vrot.lane.b32.xlu1 %v1699_v34, %s6688_s30  ;;  %1712 = vrot.lane.b32.xlu0 %v1706_v35, %s6674_s23  ;;  %s5379_s23 = smov 64   ;;  %s6714_s30 = smov 24  }
 0x364   :  { %v1908_v40 = vpop.permute.xlu1 %1907  ;;  %v1915_v41 = vpop.permute.xlu0 %1914 }
 0x365   :  { %v1910_v48 = vadd.f32 %v1908_v40, %v1904_v42  ;;  %v1917_v49 = vadd.f32 %v1915_v41, %v1911_v46 }
 0x367   :  { %1942 = vrot.lane.b32.xlu1 %v1933_v14, %s6686_s21  ;;  %1946 = vrot.lane.b32.xlu0 %v1940_v39, %s6684_s0  ;;  %s6709_s21 = smov 76  }
 0x368   :  { %v1277_v12 = vpop.permute.xlu1 %1276 }
 0x36b   :  { %1919 = vrot.lane.b32.xlu1 %v1910_v48, %s6682_s4  ;;  %1923 = vrot.lane.b32.xlu0 %v1917_v49, %s6680_s19  ;;  %s6706_s4 = smov 112   ;;  %s6708_s19 = smov 72  }
 0x36c   :  { %v298_v15 = vpop.permute.xlu1 %297 }
 0x36d   :  { %v300_v35 = vadd.f32 %v298_v15, %v286_v26 }
 0x36f   :  { %445 = vrot.lane.b32.xlu1 %v5620_v10, %s5379_s23 }
 0x3a1   :  { %v1313_v16 = vpop.permute.xlu0 %1312  ;;  %v1309_v17 = vpop.permute.xlu1 %1308 }
 0x3a5   :  { %v1290_v43 = vpop.permute.xlu0 %1289  ;;  %v1521_v20 = vpop.permute.xlu1 %1520 }
 0x3a9   :  { %v1525_v5 = vpop.permute.xlu0 %1524  ;;  %v1498_v22 = vpop.permute.xlu1 %1497 }
 0x3ad   :  { %v1502_v21 = vpop.permute.xlu0 %1501 }
 0x3b1   :  { %v351_v25 = vpop.permute.xlu0 %350 }
 0x3b5   :  { %v347_v28 = vpop.permute.xlu1 %346  ;;  %v315_v29 = vpop.permute.xlu0 %314 }
 0x3b6   :  { %v353_v34 = vsel %vm317_vm6, %v347_v28, %v351_v25  ;;  %v318_v38 = vsel %vm317_vm6, %v300_v35, %v315_v29 }
 0x3b7   :  { %4940 = vmatpush3.xpose.msk.msra.mxu0 %vm354_vm5, %v353_v34 }
 0x3b8   :  { %4949 = vmatprep.subr.mxu0 %v5348_v3 }
 0x3b9   :  { %v594_v45 = vpop.permute.xlu1 %593  ;;  %v598_v14 = vpop.permute.xlu0 %597 }
 0x3ba   :  { %v600_v39 = vsel %vm317_vm6, %v594_v45, %v598_v14  ;;  %4942 = vmatmul.mubr.msk.f32.vlgmr.msra.gmra.mxu0 %vm354_vm5, %v318_v38  ;;  %v1273_v45 = vmul.f32 %v5590_v61, %v5548_v33 }
 0x3bb   :  { %4950 = vmatpush3.xpose.msk.msra.mxu0 %vm354_vm5, %v600_v39  ;;  %4951 = vmatprep.mubr.msk.f32.mxu0 %vm5370_vm4, %v5348_v3  ;;  %v1315_v39 = vsel %vm317_vm6, %v1309_v17, %v1313_v16  ;;  %v1504_v17 = vsel %vm317_vm6, %v1498_v22, %v1502_v21 }
 0x3bc   :  { %4959 = vmatprep.subr.mxu0 %v5348_v3 }
 0x3bd   :  { %v559_v40 = vpop.permute.xlu1 %558  ;;  %v563_v41 = vpop.permute.xlu0 %562 }
 0x3be   :  { %v565_v42 = vsel %vm317_vm6, %v559_v40, %v563_v41  ;;  %v1279_v40 = vadd.f32 %v1277_v12, %v1273_v45 }
 0x3bf   :  { %4952 = vmatmul.mubr.msk.f32.vlgmr.msra.gmra.mxu0 %vm354_vm5, %v565_v42 }
 0x3c0   :  { %4961 = vmatprep.mubr.msk.f32.mxu0 %vm5370_vm4, %v5348_v3 }
 0x3c1   :  { %v839_v46 = vpop.permute.xlu1 %838  ;;  %v843_v48 = vpop.permute.xlu0 %842 }
 0x3c2   :  { %v845_v49 = vsel %vm317_vm6, %v839_v46, %v843_v48  ;;  %v1292_v46 = vsel %vm317_vm6, %v1279_v40, %v1290_v43  ;;  %v1527_v48 = vsel %vm317_vm6, %v1521_v20, %v1525_v5 }
 0x3c3   :  { %4960 = vmatpush3.xpose.msk.msra.mxu0 %vm354_vm5, %v845_v49 }
 0x3c4   :  { %4969 = vmatprep.subr.mxu0 %v5348_v3 }
 0x3c5   :  { %v804_v15 = vpop.permute.xlu1 %803  ;;  %v808_v25 = vpop.permute.xlu0 %807 }
 0x3c6   :  { %v810_v26 = vsel %vm317_vm6, %v804_v15, %v808_v25 }
 0x3c7   :  { %4962 = vmatmul.mubr.msk.f32.vlgmr.msra.gmra.mxu0 %vm354_vm5, %v810_v26 }
 0x3c8   :  { %4971 = vmatprep.mubr.msk.f32.mxu0 %vm5370_vm4, %v5348_v3 }
 0x3c9   :  { %v1084_v28 = vpop.permute.xlu1 %1083  ;;  %v1088_v29 = vpop.permute.xlu0 %1087 }
 0x3ca   :  { %v1090_v34 = vsel %vm317_vm6, %v1084_v28, %v1088_v29 }
 0x3cb   :  { %4970 = vmatpush3.xpose.msk.msra.mxu0 %vm354_vm5, %v1090_v34 }
 0x3cc   :  { %4979 = vmatprep.subr.mxu0 %v5348_v3 }
 0x3cd   :  { %v1049_v35 = vpop.permute.xlu1 %1048  ;;  %v1053_v38 = vpop.permute.xlu0 %1052 }
 0x3ce   :  { %v1055_v14 = vsel %vm317_vm6, %v1049_v35, %v1053_v38 }
 0x3cf   :  { %4972 = vmatmul.mubr.msk.f32.vlgmr.msra.gmra.mxu0 %vm354_vm5, %v1055_v14 }
 0x3d0   :  { %4980 = vmatpush3.xpose.msk.msra.mxu0 %vm354_vm5, %v1315_v39  ;;  %4981 = vmatprep.mubr.msk.f32.mxu0 %vm5370_vm4, %v5348_v3 }
 0x3d1   :  { %v1732_v41 = vpop.permute.xlu1 %1731  ;;  %v1736_v42 = vpop.permute.xlu0 %1735  ;;  %4989 = vmatprep.subr.mxu0 %v5348_v3 }
 0x3d2   :  { %v1738_v49 = vsel %vm317_vm6, %v1732_v41, %v1736_v42 }
 0x3d3   :  { %4982 = vmatmul.mubr.msk.f32.vlgmr.msra.gmra.mxu0 %vm354_vm5, %v1292_v46 }
 0x3d4   :  { %4990 = vmatpush3.xpose.msk.msra.mxu0 %vm354_vm5, %v1527_v48  ;;  %4991 = vmatprep.mubr.msk.f32.mxu0 %vm5370_vm4, %v5348_v3 }
 0x3d5   :  { %v1709_v12 = vpop.permute.xlu1 %1708  ;;  %v1713_v16 = vpop.permute.xlu0 %1712  ;;  %4999 = vmatprep.subr.mxu0 %v5348_v3 }
 0x3d6   :  { %v1715_v20 = vsel %vm317_vm6, %v1709_v12, %v1713_v16 }
 0x3d7   :  { %4992 = vmatmul.mubr.msk.f32.vlgmr.msra.gmra.mxu0 %vm354_vm5, %v1504_v17 }
 0x3d8   :  { %5000 = vmatpush3.xpose.msk.msra.mxu0 %vm354_vm5, %v1738_v49  ;;  %5001 = vmatprep.mubr.msk.f32.mxu0 %vm5370_vm4, %v5348_v3 }
 0x3d9   :  { %v1943_v43 = vpop.permute.xlu1 %1942  ;;  %v1947_v5 = vpop.permute.xlu0 %1946  ;;  %5009 = vmatprep.subr.mxu0 %v5348_v3 }
 0x3da   :  { %v1949_v15 = vsel %vm317_vm6, %v1943_v43, %v1947_v5 }
 0x3db   :  { %5002 = vmatmul.mubr.msk.f32.vlgmr.msra.gmra.mxu0 %vm354_vm5, %v1715_v20 }
 0x3dc   :  { %5010 = vmatpush3.xpose.msk.msra.mxu0 %vm354_vm5, %v1949_v15  ;;  %5011 = vmatprep.mubr.msk.f32.mxu0 %vm5370_vm4, %v5348_v3 }
 0x3dd   :  { %v1920_v21 = vpop.permute.xlu1 %1919  ;;  %v1924_v22 = vpop.permute.xlu0 %1923 }
 0x3de   :  { %v1926_v25 = vsel %vm317_vm6, %v1920_v21, %v1924_v22 }
 0x3df   :  { %5012 = vmatmul.mubr.msk.f32.vlgmr.msra.gmra.mxu0 %vm354_vm5, %v1926_v25 }
 0x3e1   :  { %v446_v26 = vpop.permute.xlu1 %445 }
 0x3e2   :  { %4945 = vmatpush3.msra.mxu1 %v446_v26 }
 0x3e3   :  { %4954 = vmatprep.subr.mxu1 %v5348_v3 }
 0x47a   :  { %v427_v29 = vpop.f32.mrf.mxu0 }
 0x47b   :  { %v431_v34 = vmul.f32 0.35355338, %v427_v29 }
 0x47c   :  { %v4943_v35 = vpop.f32.mrf.mxu0 }
 0x47d   :  { %v432_v38 = vsel %vm5908_vm7, %v431_v34, -inf }
 0x47e   :  { %v433_v45 = vsel %vm354_vm5, %v432_v38, -inf }
 0x47f   :  { %434 = vmax.xlane.f32.xlu1 %v433_v45  ;;  %v673_v14 = vpop.f32.mrf.mxu0 }
 0x480   :  { %v677_v39 = vmul.f32 0.35355338, %v673_v14 }
 0x481   :  { %v4953_v40 = vpop.f32.mrf.mxu0 }
 0x482   :  { %v678_v41 = vsel %vm5908_vm7, %v677_v39, -inf }
 0x483   :  { %v679_v13 = vsel %vm354_vm5, %v678_v41, -inf }
 0x484   :  { %680 = vmax.xlane.f32.xlu0 %v679_v13 }
 0x487   :  { %v918_v27 = vpop.f32.mrf.mxu0 }
 0x488   :  { %v922_v42 = vmul.f32 0.35355338, %v918_v27 }
 0x489   :  { %v4963_v46 = vpop.f32.mrf.mxu0 }
 0x48a   :  { %v923_v48 = vsel %vm5908_vm7, %v922_v42, -inf }
 0x48b   :  { %v924_v12 = vsel %vm354_vm5, %v923_v48, -inf }
 0x48c   :  { %925 = vmax.xlane.f32.xlu0 %v924_v12 }
 0x48f   :  { %v1163_v16 = vpop.f32.mrf.mxu0 }
 0x490   :  { %v1167_v17 = vmul.f32 0.35355338, %v1163_v16 }
 0x491   :  { %v4973_v49 = vpop.f32.mrf.mxu0 }
 0x492   :  { %v1168_v43 = vsel %vm5908_vm7, %v1167_v17, -inf }
 0x493   :  { %v1388_v5 = vpop.f32.mrf.mxu0  ;;  %v1169_v20 = vsel %vm354_vm5, %v1168_v43, -inf }
 0x494   :  { %v1392_v15 = vmul.f32 0.35355338, %v1388_v5  ;;  %1170 = vmax.xlane.f32.xlu1 %v1169_v20 }
 0x495   :  { %v4983_v21 = vpop.f32.mrf.mxu0 }
 0x496   :  { %v1393_v22 = vsel %vm5908_vm7, %v1392_v15, -inf }
 0x497   :  { %v1600_v25 = vpop.f32.mrf.mxu0  ;;  %v1394_v26 = vsel %vm354_vm5, %v1393_v22, -inf }
 0x498   :  { %v1604_v29 = vmul.f32 0.35355338, %v1600_v25  ;;  %1395 = vmax.xlane.f32.xlu0 %v1394_v26 }
 0x499   :  { %v4993_v34 = vpop.f32.mrf.mxu0 }
 0x49a   :  { %v1605_v35 = vsel %vm5908_vm7, %v1604_v29, -inf }
 0x49b   :  { %v1811_v45 = vpop.f32.mrf.mxu0  ;;  %v1606_v14 = vsel %vm354_vm5, %v1605_v35, -inf }
 0x49c   :  { %v1815_v39 = vmul.f32 0.35355338, %v1811_v45  ;;  %1607 = vmax.xlane.f32.xlu1 %v1606_v14 }
 0x49d   :  { %v5003_v40 = vpop.f32.mrf.mxu0 }
 0x49e   :  { %v1816_v13 = vsel %vm5908_vm7, %v1815_v39, -inf }
 0x49f   :  { %v2022_v27 = vpop.f32.mrf.mxu0  ;;  %v1817_v42 = vsel %vm354_vm5, %v1816_v13, -inf }
 0x4a0   :  { %1818 = vmax.xlane.f32.xlu0 %v1817_v42  ;;  %v2026_v12 = vmul.f32 0.35355338, %v2022_v27 }
 0x4a1   :  { %v5013_v46 = vpop.f32.mrf.mxu0 }
 0x4a2   :  { %v2027_v16 = vsel %vm5908_vm7, %v2026_v12, -inf }
 0x4a3   :  { %v2028_v17 = vsel %vm354_vm5, %v2027_v16, -inf }
 0x4ad   :  { %935 = vrot.lane.b32.xlu1 %v5620_v10, %s6676_s26 }
 0x4b6   :  { %690 = vrot.lane.b32.xlu0 %v5620_v10, %s5362_s28 }
 0x4d1   :  { %2029 = vmax.xlane.f32.xlu1 %v2028_v17 }
 0x4e2   :  { %1180 = vrot.lane.b32.xlu1 %v5620_v10, %s6678_s24 }
 0x508   :  { %v435_v49 = vpop.xlane.xlu1 %434 }
 0x509   :  { %v436_v5 = vsub.f32 %v432_v38, %v435_v49 }
 0x50b   :  { %v437_v20 = vmul.f32 1.442695, %v436_v5 }
 0x50d   :  { %5251 = vpow2.f32 %v437_v20  ;;  %v681_v15 = vpop.xlane.xlu0 %680 }
 0x50e   :  { %v682_v21 = vsub.f32 %v678_v41, %v681_v15 }
 0x510   :  { %v683_v25 = vmul.f32 1.442695, %v682_v21 }
 0x512   :  { %5253 = vpow2.f32 %v683_v25 }
 0x515   :  { %v926_v26 = vpop.xlane.xlu0 %925 }
 0x516   :  { %v927_v29 = vsub.f32 %v923_v48, %v926_v26 }
 0x518   :  { %v928_v34 = vmul.f32 1.442695, %v927_v29 }
 0x51a   :  { %v5252_v45 = vpop.eup %5251  ;;  %5255 = vpow2.f32 %v928_v34 }
 0x51b   :  { %v439_v14 = vsel %vm354_vm5, %v5252_v45, 0.0 }
 0x51c   :  { %440 = vadd.xlane.f32.xlu0 %v439_v14 }
 0x51d   :  { %v1171_v41 = vpop.xlane.xlu1 %1170 }
 0x51e   :  { %v1172_v48 = vsub.f32 %v1168_v43, %v1171_v41 }
 0x51f   :  { %v5254_v39 = vpop.eup %5253 }
 0x520   :  { %v685_v40 = vsel %vm354_vm5, %v5254_v39, 0.0  ;;  %v1173_v42 = vmul.f32 1.442695, %v1172_v48 }
 0x521   :  { %686 = vadd.xlane.f32.xlu1 %v685_v40  ;;  %v1396_v12 = vpop.xlane.xlu0 %1395 }
 0x522   :  { %5257 = vpow2.f32 %v1173_v42  ;;  %v1397_v17 = vsub.f32 %v1393_v22, %v1396_v12 }
 0x524   :  { %v1398_v20 = vmul.f32 1.442695, %v1397_v17 }
 0x525   :  { %v1608_v27 = vpop.xlane.xlu1 %1607 }
 0x526   :  { %v1609_v46 = vsub.f32 %v1605_v35, %v1608_v27 }
 0x527   :  { %v5944_v10 = vpop.eup %5255 }
 0x528   :  { %v930_v38 = vsel %vm354_vm5, %v5944_v10, 0.0  ;;  %v1610_v49 = vmul.f32 1.442695, %v1609_v46 }
 0x529   :  { %931 = vadd.xlane.f32.xlu0 %v930_v38  ;;  %v1819_v5 = vpop.xlane.xlu0 %1818  ;;  %v936_v29 = vpop.permute.xlu1 %935 }
 0x52a   :  { %5259 = vpow2.f32 %v1610_v49  ;;  %v1820_v15 = vsub.f32 %v1816_v13, %v1819_v5 }
 0x52b   :  { %5261 = vpow2.f32 %v1398_v20 }
 0x52c   :  { %v1821_v21 = vmul.f32 1.442695, %v1820_v15 }
 0x52e   :  { %5263 = vpow2.f32 %v1821_v21 }
 0x52f   :  { %v5258_v25 = vpop.eup %5257 }
 0x530   :  { %v1175_v43 = vsel %vm354_vm5, %v5258_v25, 0.0 }
 0x532   :  { %1406 = vrot.lane.b32.xlu1 %v5590_v61, %s5379_s23 }
 0x537   :  { %v5953_v26 = vpop.eup %5259 }
 0x538   :  { %v1612_v35 = vsel %vm354_vm5, %v5953_v26, 0.0  ;;  %v5262_v34 = vpop.eup %5261 }
 0x539   :  { %v1400_v13 = vsel %vm354_vm5, %v5262_v34, 0.0 }
 0x53b   :  { %v5958_v38 = vpop.eup %5263 }
 0x53c   :  { %v1823_v41 = vsel %vm354_vm5, %v5958_v38, 0.0 }
 0x53f   :  { %1617 = vrot.lane.b32.xlu0 %v5590_v61, %s5362_s28 }
 0x556   :  { %1176 = vadd.xlane.f32.xlu1 %v1175_v43 }
 0x55a   :  { %v2030_v22 = vpop.xlane.xlu1 %2029  ;;  %1613 = vadd.xlane.f32.xlu1 %v1612_v35 }
 0x55b   :  { %v2031_v14 = vsub.f32 %v2027_v16, %v2030_v22  ;;  %v691_v16 = vpop.permute.xlu0 %690 }
 0x55d   :  { %v2032_v40 = vmul.f32 1.442695, %v2031_v14 }
 0x55e   :  { %1401 = vadd.xlane.f32.xlu0 %v1400_v13  ;;  %v1181_v46 = vpop.permute.xlu1 %1180 }
 0x55f   :  { %5265 = vpow2.f32 %v2032_v40 }
 0x562   :  { %1824 = vadd.xlane.f32.xlu0 %v1823_v41 }
 0x56b   :  { %1828 = vrot.lane.b32.xlu1 %v5590_v61, %s6676_s26  ;;  %s6705_s26 = smov 84  }
 0x56c   :  { %v5964_v48 = vpop.eup %5265 }
 0x56d   :  { %v2034_v27 = vsel %vm354_vm5, %v5964_v48, 0.0 }
 0x56e   :  { %2035 = vadd.xlane.f32.xlu0 %v2034_v27 }
 0x584   :  { %2039 = vrot.lane.b32.xlu0 %v5590_v61, %s6678_s24  ;;  %s6704_s24 = smov 92  }
 0x5a5   :  { %v441_v42 = vpop.xlane.xlu0 %440 }
 0x5a6   :  { %5267 = vrcp.f32 %v441_v42 }
 0x5aa   :  { %v687_v12 = vpop.xlane.xlu1 %686 }
 0x5ab   :  { %5269 = vrcp.f32 %v687_v12 }
 0x5b2   :  { %v932_v17 = vpop.xlane.xlu0 %931 }
 0x5b3   :  { %v5268_v49 = vpop.eup %5267  ;;  %5271 = vrcp.f32 %v932_v17 }
 0x5b4   :  { %v443_v5 = vmul.f32 %v5268_v49, %v5252_v45 }
 0x5b6   :  { %4947 = vmatmul.mubr.msk.f32.vlgmr.msra.gmra.mxu1 %vm354_vm5, %v443_v5  ;;  %v1618_v43 = vpop.permute.xlu0 %1617 }
 0x5b7   :  { %4955 = vmatpush3.msra.mxu1 %v691_v16  ;;  %4956 = vmatprep.mubr.msk.f32.mxu1 %vm5370_vm4, %v5348_v3 }
 0x5b8   :  { %v5270_v20 = vpop.eup %5269  ;;  %4964 = vmatprep.subr.mxu1 %v5348_v3 }
 0x5b9   :  { %v689_v61 = vmul.f32 %v5270_v20, %v5254_v39  ;;  %v1407_v39 = vpop.permute.xlu1 %1406 }
 0x5bb   :  { %4957 = vmatmul.mubr.msk.f32.vlgmr.msra.gmra.mxu1 %vm354_vm5, %v689_v61 }
 0x5bc   :  { %4965 = vmatpush3.msra.mxu1 %v936_v29  ;;  %4966 = vmatprep.mubr.msk.f32.mxu1 %vm5370_vm4, %v5348_v3 }
 0x5bd   :  { %4974 = vmatprep.subr.mxu1 %v5348_v3 }
 0x5c0   :  { %v5272_v15 = vpop.eup %5271 }
 0x5c1   :  { %v934_v45 = vmul.f32 %v5272_v15, %v5944_v10 }
 0x5c3   :  { %4967 = vmatmul.mubr.msk.f32.vlgmr.msra.gmra.mxu1 %vm354_vm5, %v934_v45 }
 0x5c4   :  { %4975 = vmatpush3.msra.mxu1 %v1181_v46  ;;  %4976 = vmatprep.mubr.msk.f32.mxu1 %vm5370_vm4, %v5348_v3 }
 0x5c5   :  { %4984 = vmatprep.subr.mxu1 %v5348_v3 }
 0x5df   :  { %v1177_v21 = vpop.xlane.xlu1 %1176 }
 0x5e0   :  { %5273 = vrcp.f32 %v1177_v21  ;;  %v2131_v21 = vld [vmem:[%s6652_s7 + $0x8] sm:$0xff] }
 0x5e3   :  { %v1614_v29 = vpop.xlane.xlu1 %1613 }
 0x5e7   :  { %v1402_v35 = vpop.xlane.xlu0 %1401  ;;  %v1829_v42 = vpop.permute.xlu1 %1828 }
 0x5e8   :  { %5275 = vrcp.f32 %v1402_v35 }
 0x5e9   :  { %5277 = vrcp.f32 %v1614_v29  ;;  %v2130_v29 = vld [vmem:[%s6652_s7] sm:$0xff] }
 0x5eb   :  { %v1825_v22 = vpop.xlane.xlu0 %1824 }
 0x5ec   :  { %5279 = vrcp.f32 %v1825_v22 }
 0x5ed   :  { %v5274_v14 = vpop.eup %5273 }
 0x5ee   :  { %v1179_v10 = vmul.f32 %v5274_v14, %v5258_v25 }
 0x5f0   :  { %4977 = vmatmul.mubr.msk.f32.vlgmr.msra.gmra.mxu1 %vm354_vm5, %v1179_v10 }
 0x5f1   :  { %4985 = vmatpush3.msra.mxu1 %v1407_v39  ;;  %4986 = vmatprep.mubr.msk.f32.mxu1 %vm5370_vm4, %v5348_v3  ;;  %v2132_v39 = vld [vmem:[%s6652_s7 + $0x10] sm:$0xff] }
 0x5f2   :  { %4994 = vmatprep.subr.mxu1 %v5348_v3 }
 0x5f5   :  { %v5276_v40 = vpop.eup %5275 }
 0x5f6   :  { %v1404_v13 = vmul.f32 %v5276_v40, %v5262_v34  ;;  %v5278_v41 = vpop.eup %5277 }
 0x5f7   :  { %v2036_v27 = vpop.xlane.xlu0 %2035  ;;  %v1616_v25 = vmul.f32 %v5278_v41, %v5953_v26 }
 0x5f8   :  { %5281 = vrcp.f32 %v2036_v27  ;;  %4987 = vmatmul.mubr.msk.f32.vlgmr.msra.gmra.mxu1 %vm354_vm5, %v1404_v13 }
 0x5f9   :  { %4995 = vmatpush3.msra.mxu1 %v1618_v43  ;;  %4996 = vmatprep.mubr.msk.f32.mxu1 %vm5370_vm4, %v5348_v3  ;;  %v5280_v16 = vpop.eup %5279 }
 0x5fa   :  { %5004 = vmatprep.subr.mxu1 %v5348_v3  ;;  %v1827_v34 = vmul.f32 %v5280_v16, %v5958_v38 }
 0x5fb   :  { %v2040_v46 = vpop.permute.xlu0 %2039 }
 0x5fc   :  { %4997 = vmatmul.mubr.msk.f32.vlgmr.msra.gmra.mxu1 %vm354_vm5, %v1616_v25 }
 0x5fd   :  { %5005 = vmatpush3.msra.mxu1 %v1829_v42  ;;  %5006 = vmatprep.mubr.msk.f32.mxu1 %vm5370_vm4, %v5348_v3 }
 0x5fe   :  { %5014 = vmatprep.subr.mxu1 %v5348_v3 }
 0x600   :  { %5007 = vmatmul.mubr.msk.f32.vlgmr.msra.gmra.mxu1 %vm354_vm5, %v1827_v34 }
 0x601   :  { %5015 = vmatpush3.msra.mxu1 %v2040_v46  ;;  %5016 = vmatprep.mubr.msk.f32.mxu1 %vm5370_vm4, %v5348_v3 }
 0x605   :  { %v5282_v26 = vpop.eup %5281 }
 0x606   :  { %v2038_v12 = vmul.f32 %v5282_v26, %v5964_v48  ;;  %v2133_v48 = vld [vmem:[%s6652_s7 + $0x18] sm:$0xff] }
 0x607   :  { %5019 = vmatprep.subr.mxu0 %v2133_v48 }
 0x608   :  { %5017 = vmatmul.mubr.msk.f32.vlgmr.msra.gmra.mxu1 %vm354_vm5, %v2038_v12  ;;  %5020 = vmatpush3.msra.mxu0 %v2133_v48 }
 0x609   :  { %2320 = vmatprep.mubr.f32.mxu1 %v5348_v3  ;;  %5021 = vmatprep.subr.mxu0 %v2132_v39 }
 0x60a   :  { %5022 = vmatpush3.msra.mxu0 %v2132_v39 }
 0x60b   :  { %5023 = vmatprep.subr.mxu0 %v2131_v21 }
 0x60c   :  { %5024 = vmatpush3.msra.mxu0 %v2131_v21 }
 0x60d   :  { %5025 = vmatprep.subr.mxu0 %v2130_v29 }
 0x60e   :  { %5026 = vmatpush3.msra.mxu0 %v2130_v29  ;;  %v2247_v29 = vld [vmem:[%s6653_s9 + $0x28] sm:$0xff] }
 0x676   :  { %v517_v17 = vpop.f32.mrf.mxu1 }
 0x678   :  { %v4948_v49 = vpop.f32.mrf.mxu1 }
 0x67b   :  { %v762_v5 = vpop.f32.mrf.mxu1 }
 0x67c   :  { %1257 = vrot.lane.b32.xlu1 %v762_v5, %s5359_s25 }
 0x67d   :  { %v4958_v38 = vpop.f32.mrf.mxu1 }
 0x683   :  { %v1007_v20 = vpop.f32.mrf.mxu1 }
 0x684   :  { %1261 = vrot.lane.b32.xlu0 %v1007_v20, %s5361_s27 }
 0x685   :  { %v4968_v61 = vpop.f32.mrf.mxu1 }
 0x6b0   :  { %v1252_v15 = vpop.f32.mrf.mxu1 }
 0x6b1   :  { %1265 = vrot.lane.b32.xlu0 %v1252_v15, %s6692_s29 }
 0x6b2   :  { %v4978_v45 = vpop.f32.mrf.mxu1 }
 0x6b8   :  { %v1478_v43 = vpop.f32.mrf.mxu1 }
 0x6ba   :  { %v4988_v35 = vpop.f32.mrf.mxu1 }
 0x6bb   :  { %v2246_v35 = vld [vmem:[%s6653_s9 + $0x20] sm:$0xff] }
 0x6bc   :  { %v1689_v22 = vpop.f32.mrf.mxu1 }
 0x6bd   :  { %2116 = vrot.lane.b32.xlu1 %v1689_v22, %s5359_s25  ;;  %v2245_v22 = vld [vmem:[%s6653_s9 + $0x18] sm:$0xff] }
 0x6be   :  { %v4998_v14 = vpop.f32.mrf.mxu1 }
 0x6bf   :  { %v2244_v14 = vld [vmem:[%s6653_s9 + $0x10] sm:$0xff] }
 0x6c0   :  { %v1900_v10 = vpop.f32.mrf.mxu1 }
 0x6c1   :  { %2120 = vrot.lane.b32.xlu1 %v1900_v10, %s5361_s27  ;;  %v2243_v10 = vld [vmem:[%s6653_s9 + $0x8] sm:$0xff] }
 0x6c2   :  { %v5008_v40 = vpop.f32.mrf.mxu1 }
 0x6c3   :  { %v2242_v40 = vld [vmem:[%s6653_s9] sm:$0xff] }
 0x6c8   :  { %v2111_v13 = vpop.f32.mrf.mxu1 }
 0x6c9   :  { %2124 = vrot.lane.b32.xlu0 %v2111_v13, %s6692_s29  ;;  %s6710_s29 = smov 104  }
 0x6ca   :  { %v5018_v41 = vpop.f32.mrf.mxu1 }
 0x6ee   :  { %v1258_v27 = vpop.permute.xlu1 %1257 }
 0x6ef   :  { %v1268_v16 = vsel %vm354_vm5, %v517_v17, %v1258_v27 }
 0x6f6   :  { %v1262_v25 = vpop.permute.xlu0 %1261 }
 0x6f7   :  { %v1270_v42 = vsel %vm1269_vm8, %v1268_v16, %v1262_v25 }
 0x723   :  { %v1266_v34 = vpop.permute.xlu0 %1265 }
 0x724   :  { %v1272_v46 = vsel %vm1271_vm9, %v1270_v42, %v1266_v34 }
 0x725   :  { %5027 = vmatprep.mubr.msk.f32.mxu0 %vm173_vm3, %v1272_v46 }
 0x72f   :  { %v2117_v26 = vpop.permute.xlu1 %2116 }
 0x730   :  { %v2127_v49 = vsel %vm354_vm5, %v1478_v43, %v2117_v26 }
 0x733   :  { %v2121_v12 = vpop.permute.xlu1 %2120 }
 0x734   :  { %v2128_v5 = vsel %vm1269_vm8, %v2127_v49, %v2121_v12  ;;  %v4727_v12 = vld [vmem:[%s6654_s8] ss:$0 sm:$0xff]  ;;  %s6703_s8 = smov 120  }
 0x73b   :  { %v2125_v38 = vpop.permute.xlu0 %2124 }
 0x73c   :  { %v2129_v20 = vsel %vm1271_vm9, %v2128_v5, %v2125_v38 }
 0x73d   :  { %5028 = vmatmul.mubr.msk.f32.vlgmr.msra.gmra.mxu0 %vm173_vm3, %v2129_v20  ;;  %v2364_v20 = vld [vmem:[%s6655_s10 + $0x78] sm:$0xff] }
 0x73e   :  { %5030 = vmatprep.subr.mxu0 %v2364_v20 }
 0x73f   :  { %5031 = vmatpush3.msra.mxu0 %v2364_v20 }
 0x7fd   :  { %v5029_v61 = vpop.f32.mrf.mxu0 }
 0x7fe   :  { %v6030_v17 = vadd.f32 %v5029_v61, %v5514_v18  ;;  %v2249_v18 = vld [vmem:[%s6653_s9 + $0x38] sm:$0xff]  ;;  %v2363_v61 = vld [vmem:[%s6655_s10 + $0x70] sm:$0xff] }
 0x7ff   :  { %v2206_v15 = vpop.f32.mrf.mxu0  ;;  %2280 = vmatprep.subr.mxu1 %v2249_v18  ;;  %5032 = vmatprep.subr.mxu0 %v2363_v61  ;;  %v2357_v18 = vld [vmem:[%s6655_s10 + $0x40] sm:$0xff] }
 0x800   :  { %v6033_v45 = vadd.f32 %v2206_v15, %v5516_v19  ;;  %v2219_v48 = vmul.f32 %v6030_v17, %v6030_v17  ;;  %v2248_v19 = vld [vmem:[%s6653_s9 + $0x30] sm:$0xff]  ;;  %5033 = vmatpush3.msra.mxu0 %v2363_v61  ;;  %v2362_v15 = vld [vmem:[%s6655_s10 + $0x68] sm:$0xff] }
 0x801   :  { %2281 = vmatpush1.msra.mxu1 %v2248_v19  ;;  %5034 = vmatprep.subr.mxu0 %v2362_v15  ;;  %v2356_v19 = vld [vmem:[%s6655_s10 + $0x38] sm:$0xff] }
 0x802   :  { %v2223_v39 = vsel %vm173_vm3, %v2219_v48, 0.0  ;;  %v2218_v21 = vmul.f32 %v6033_v45, %v6033_v45  ;;  %2282 = vmatprep.subr.mxu1 %v2247_v29  ;;  %5035 = vmatpush3.msra.mxu0 %v2362_v15  ;;  %v2361_v48 = vld [vmem:[%s6655_s10 + $0x60] sm:$0xff]  ;;  %v2355_v29 = vld [vmem:[%s6655_s10 + $0x30] sm:$0xff] }
 0x803   :  { %2224 = vadd.xlane.f32.xlu0 %v2223_v39  ;;  %2283 = vmatpush1.msra.mxu1 %v2246_v35  ;;  %v2360_v39 = vld [vmem:[%s6655_s10 + $0x58] sm:$0xff]  ;;  %v2354_v35 = vld [vmem:[%s6655_s10 + $0x28] sm:$0xff] }
 0x804   :  { %v2220_v43 = vsel %vm173_vm3, %v2218_v21, 0.0  ;;  %2284 = vmatprep.subr.mxu1 %v2245_v22  ;;  %5036 = vmatprep.subr.mxu0 %v2361_v48  ;;  %v2359_v21 = vld [vmem:[%s6655_s10 + $0x50] sm:$0xff]  ;;  %v2353_v22 = vld [vmem:[%s6655_s10 + $0x20] sm:$0xff] }
 0x805   :  { %2221 = vadd.xlane.f32.xlu1 %v2220_v43  ;;  %2285 = vmatpush1.msra.mxu1 %v2244_v14  ;;  %v2358_v43 = vld [vmem:[%s6655_s10 + $0x48] sm:$0xff]  ;;  %v2352_v14 = vld [vmem:[%s6655_s10 + $0x18] sm:$0xff] }
 0x806   :  { %2286 = vmatprep.subr.mxu1 %v2243_v10  ;;  %5037 = vmatpush3.msra.mxu0 %v2361_v48  ;;  %v2351_v10 = vld [vmem:[%s6655_s10 + $0x10] sm:$0xff] }
 0x807   :  { %2287 = vmatpush1.msra.mxu1 %v2242_v40  ;;  %5038 = vmatprep.subr.mxu0 %v2360_v39  ;;  %v2350_v40 = vld [vmem:[%s6655_s10 + $0x8] sm:$0xff] }
 0x808   :  { %5039 = vmatpush3.msra.mxu0 %v2360_v39 }
 0x809   :  { %5040 = vmatprep.subr.mxu0 %v2359_v21 }
 0x80a   :  { %5041 = vmatpush3.msra.mxu0 %v2359_v21 }
 0x80b   :  { %5042 = vmatprep.subr.mxu0 %v2358_v43 }
 0x80c   :  { %5043 = vmatpush3.msra.mxu0 %v2358_v43 }
 0x80d   :  { %5044 = vmatprep.subr.mxu0 %v2357_v18 }
 0x80e   :  { %5045 = vmatpush3.msra.mxu0 %v2357_v18 }
 0x80f   :  { %5046 = vmatprep.subr.mxu0 %v2356_v19 }
 0x810   :  { %5047 = vmatpush3.msra.mxu0 %v2356_v19 }
 0x811   :  { %5048 = vmatprep.subr.mxu0 %v2355_v29 }
 0x812   :  { %5049 = vmatpush3.msra.mxu0 %v2355_v29 }
 0x813   :  { %5050 = vmatprep.subr.mxu0 %v2354_v35 }
 0x814   :  { %5051 = vmatpush3.msra.mxu0 %v2354_v35 }
 0x815   :  { %5052 = vmatprep.subr.mxu0 %v2353_v22 }
 0x816   :  { %5053 = vmatpush3.msra.mxu0 %v2353_v22 }
 0x817   :  { %5054 = vmatprep.subr.mxu0 %v2352_v14 }
 0x818   :  { %5055 = vmatpush3.msra.mxu0 %v2352_v14  ;;  %v2468_v14 = vld [vmem:[%s6656_s12 + $0x8] sm:$0xff] }
 0x819   :  { %5056 = vmatprep.subr.mxu0 %v2351_v10 }
 0x81a   :  { %5057 = vmatpush3.msra.mxu0 %v2351_v10  ;;  %v2467_v10 = vld [vmem:[%s6656_s12] sm:$0xff] }
 0x81b   :  { %5058 = vmatprep.subr.mxu0 %v2350_v40 }
 0x81c   :  { %5059 = vmatpush3.msra.mxu0 %v2350_v40 }
 0x88c   :  { %v2225_v13 = vpop.xlane.xlu0 %2224 }
 0x88d   :  { %v2227_v41 = vmul.f32 0.03125, %v2225_v13  ;;  %v2349_v13 = vld [vmem:[%s6655_s10] sm:$0xff]  ;;  %s6707_s10 = smov 116  }
 0x88e   :  { %v2222_v27 = vpop.xlane.xlu1 %2221  ;;  %5060 = vmatprep.subr.mxu0 %v2349_v13 }
 0x88f   :  { %v2229_v25 = vadd.f32 1.1920929e-07, %v2227_v41  ;;  %v2226_v16 = vmul.f32 0.03125, %v2222_v27  ;;  %5061 = vmatpush3.msra.mxu0 %v2349_v13 }
 0x890   :  { %5106 = vmatprep.subr.mxu0 %v5348_v3 }
 0x891   :  { %v2228_v42 = vadd.f32 1.1920929e-07, %v2226_v16  ;;  %5283 = vrsqrt.f32 %v2229_v25 }
 0x893   :  { %5285 = vrsqrt.f32 %v2228_v42 }
 0x89e   :  { %v5284_v34 = vpop.eup %5283 }
 0x89f   :  { %v2233_v5 = vmul.f32 %v5284_v34, %v6030_v17 }
 0x8a0   :  { %v5286_v46 = vpop.eup %5285 }
 0x8a1   :  { %v2232_v26 = vmul.f32 %v5286_v46, %v6033_v45  ;;  %v2241_v38 = vmul.f32 %v4727_v12, %v2233_v5 }
 0x8a3   :  { %v2240_v49 = vmul.f32 %v4727_v12, %v2232_v26 }
 0x8a5   :  { %4728 = vmatmul.mubr.msk.f32.vlgmr.msra.gmra.mxu1 %vm173_vm3, %v2240_v49 }
 0x8a6   :  { %2326 = vmatprep.mubr.f32.mxu1 %v5348_v3 }
 0x8a9   :  { %4729 = vmatmul.mubr.msk.f32.gmra.mxu1 %vm173_vm3, %v2241_v38 }
 0x965   :  { %v2322_v41 = vpop.f32.mrf.mxu1 }
 0x966   :  { %v4730_v27 = vmul.f32 -1.442695, %v2322_v41 }
 0x967   :  { %v2324_v25 = vpop.f32.mrf.mxu1 }
 0x968   :  { %5287 = vpow2.f32 %v4730_v27 }
 0x969   :  { %v2328_v16 = vpop.f32.mrf.mxu1 }
 0x96a   :  { %v4731_v42 = vmul.f32 -1.442695, %v2328_v16 }
 0x96b   :  { %v2330_v15 = vpop.f32.mrf.mxu1 }
 0x96c   :  { %5289 = vpow2.f32 %v4731_v42 }
 0x975   :  { %v5288_v34 = vpop.eup %5287 }
 0x976   :  { %v2339_v46 = vadd.f32 1.0, %v5288_v34 }
 0x978   :  { %5291 = vrcp.f32 %v2339_v46 }
 0x979   :  { %v5290_v26 = vpop.eup %5289 }
 0x97a   :  { %v2340_v12 = vadd.f32 1.0, %v5290_v26  ;;  %v4732_v26 = vld [vmem:[%s6657_s11] ss:$0 sm:$0xff]  ;;  %s6702_s11 = smov 88  }
 0x97c   :  { %5293 = vrcp.f32 %v2340_v12 }
 0x985   :  { %v5292_v49 = vpop.eup %5291 }
 0x986   :  { %v2345_v5 = vmul.f32 %v5292_v49, %v2322_v41 }
 0x988   :  { %v2347_v38 = vmul.f32 %v2345_v5, %v2324_v25 }
 0x989   :  { %v5294_v20 = vpop.eup %5293 }
 0x98a   :  { %v2346_v61 = vmul.f32 %v5294_v20, %v2328_v16  ;;  %5062 = vmatprep.mubr.f32.mxu0 %v2347_v38 }
 0x98c   :  { %v2348_v48 = vmul.f32 %v2346_v61, %v2330_v15 }
 0x98e   :  { %5063 = vmatmul.mubr.f32.vlgmr.msra.gmra.mxu0 %v2348_v48 }
 0x98f   :  { %5108 = vmatprep.mubr.msk.f32.mxu0 %vm5370_vm4, %v5348_v3 }
 0xa4e   :  { %v5064_v39 = vpop.f32.mrf.mxu0 }
 0xa4f   :  { %v6125_v21 = vadd.f32 %v5064_v39, %v6030_v17  ;;  %v2470_v17 = vld [vmem:[%s6656_s12 + $0x18] sm:$0xff] }
 0xa50   :  { %v2431_v43 = vpop.f32.mrf.mxu0  ;;  %5065 = vmatprep.subr.mxu1 %v2470_v17 }
 0xa51   :  { %v6128_v18 = vadd.f32 %v2431_v43, %v6033_v45  ;;  %v2444_v19 = vmul.f32 %v6125_v21, %v6125_v21  ;;  %v2469_v45 = vld [vmem:[%s6656_s12 + $0x10] sm:$0xff]  ;;  %5066 = vmatpush3.msra.mxu1 %v2470_v17 }
 0xa52   :  { %5067 = vmatprep.subr.mxu1 %v2469_v45 }
 0xa53   :  { %v2448_v29 = vsel %vm173_vm3, %v2444_v19, 0.0  ;;  %v2443_v35 = vmul.f32 %v6128_v18, %v6128_v18  ;;  %5068 = vmatpush3.msra.mxu1 %v2469_v45 }
 0xa54   :  { %2449 = vadd.xlane.f32.xlu1 %v2448_v29  ;;  %5069 = vmatprep.subr.mxu1 %v2468_v14 }
 0xa55   :  { %v2445_v22 = vsel %vm173_vm3, %v2443_v35, 0.0  ;;  %5070 = vmatpush3.msra.mxu1 %v2468_v14 }
 0xa56   :  { %2446 = vadd.xlane.f32.xlu0 %v2445_v22  ;;  %5071 = vmatprep.subr.mxu1 %v2467_v10 }
 0xa57   :  { %5072 = vmatpush3.msra.mxu1 %v2467_v10 }
 0xa58   :  { %5076 = vmatprep.subr.mxu1 %v5348_v3 }
 0xadd   :  { %v2450_v40 = vpop.xlane.xlu1 %2449 }
 0xade   :  { %v2452_v13 = vmul.f32 0.03125, %v2450_v40 }
 0xadf   :  { %v2447_v41 = vpop.xlane.xlu0 %2446 }
 0xae0   :  { %v2454_v27 = vadd.f32 1.1920929e-07, %v2452_v13  ;;  %v2451_v25 = vmul.f32 0.03125, %v2447_v41 }
 0xae2   :  { %5295 = vrsqrt.f32 %v2454_v27  ;;  %v2453_v16 = vadd.f32 1.1920929e-07, %v2451_v25 }
 0xae4   :  { %5297 = vrsqrt.f32 %v2453_v16 }
 0xaef   :  { %v5296_v42 = vpop.eup %5295 }
 0xaf0   :  { %v2458_v46 = vmul.f32 %v5296_v42, %v6125_v21 }
 0xaf1   :  { %v5298_v34 = vpop.eup %5297 }
 0xaf2   :  { %v2457_v12 = vmul.f32 %v5298_v34, %v6128_v18  ;;  %v2466_v5 = vmul.f32 %v4732_v26, %v2458_v46 }
 0xaf4   :  { %v2465_v49 = vmul.f32 %v4732_v26, %v2457_v12 }
 0xaf6   :  { %5073 = vmatprep.mubr.msk.f32.mxu1 %vm173_vm3, %v2465_v49 }
 0xaf7   :  { %5074 = vmatmul.mubr.msk.f32.vlgmr.msra.gmra.mxu1 %vm173_vm3, %v2466_v5 }
 0xaf8   :  { %5078 = vmatprep.mubr.msk.f32.mxu1 %vm5370_vm4, %v5348_v3 }
 0xbb7   :  { %v6158_v38 = vpop.f32.mrf.mxu1 }
 0xbb9   :  { %v6160_v20 = vpop.f32.mrf.mxu1 }
 0xbba   :  { %v2580_v61 = vmul.f32 %v6160_v20, %v5586_v59  ;;  %v2573_v15 = vmul.f32 %v6160_v20, %v5580_v56  ;;  %v2561_v48 = vmul.f32 %v6160_v20, %v5582_v57  ;;  %v6172_v39 = vsub.f32 0.0, %v6160_v20 }
 0xbbb   :  { %v2572_v19 = vmul.f32 %v6160_v20, %v5696_v44  ;;  %v2553_v40 = vmul.f32 %v6160_v20, %v5706_v47  ;;  %v2785_v13 = vmul.f32 %v6160_v20, %v5584_v58  ;;  %v2792_v41 = vmul.f32 %v6160_v20, %v5588_v60 }
 0xbbc   :  { %2582 = vrot.lane.b32.xlu1 %v2580_v61, %s5364_s5  ;;  %2575 = vrot.lane.b32.xlu0 %v2573_v15, %s5364_s5  ;;  %v2579_v43 = vmul.f32 %v6172_v39, %v5714_v50  ;;  %v2560_v45 = vmul.f32 %v6172_v39, %v5546_v32  ;;  %v2762_v27 = vmul.f32 %v6160_v20, %v5602_v2 }
 0xbbd   :  { %v2769_v25 = vmul.f32 %v6160_v20, %v5610_v6  ;;  %v2552_v46 = vmul.f32 %v6160_v20, %v5548_v33 }
 0xbc0   :  { %2563 = vrot.lane.b32.xlu1 %v2561_v48, %s5364_s5 }
 0xc2e   :  { %v2583_v29 = vpop.permute.xlu1 %2582  ;;  %v2576_v35 = vpop.permute.xlu0 %2575 }
 0xc2f   :  { %v2585_v22 = vadd.f32 %v2583_v29, %v2579_v43  ;;  %v2578_v17 = vadd.f32 %v2576_v35, %v2572_v19 }
 0xc31   :  { %2587 = vrot.lane.b32.xlu0 %v2578_v17, %s5366_s3  ;;  %2591 = vrot.lane.b32.xlu1 %v2585_v22, %s5365_s1  ;;  %v2784_v22 = vmul.f32 %v6160_v20, %v5718_v52 }
 0xc32   :  { %v2564_v14 = vpop.permute.xlu1 %2563 }
 0xc33   :  { %v2566_v10 = vadd.f32 %v2564_v14, %v2560_v45  ;;  %v2761_v14 = vmul.f32 %v6160_v20, %v5720_v53 }
 0xc35   :  { %2568 = vrot.lane.b32.xlu1 %v2566_v10, %s5350_s20  ;;  %2555 = vrot.lane.b32.xlu0 %v2553_v40, %s5364_s5 }
 0xc39   :  { %2787 = vrot.lane.b32.xlu1 %v2785_v13, %s5364_s5  ;;  %v2768_v13 = vmul.f32 %v6172_v39, %v5722_v54 }
 0xc3d   :  { %2794 = vrot.lane.b32.xlu1 %v2792_v41, %s5364_s5 }
 0xc41   :  { %2764 = vrot.lane.b32.xlu1 %v2762_v27, %s5364_s5 }
 0xc45   :  { %2771 = vrot.lane.b32.xlu1 %v2769_v25, %s5364_s5 }
 0xca3   :  { %v2588_v16 = vpop.permute.xlu0 %2587  ;;  %v2592_v42 = vpop.permute.xlu1 %2591 }
 0xca4   :  { %v2594_v34 = vsel %vm317_vm6, %v2588_v16, %v2592_v42 }
 0xca5   :  { %5077 = vmatpush3.xpose.msk.msra.mxu1 %vm354_vm5, %v2594_v34 }
 0xca6   :  { %5081 = vmatprep.subr.mxu1 %v5348_v3 }
 0xca7   :  { %v2556_v26 = vpop.permute.xlu0 %2555  ;;  %v2569_v49 = vpop.permute.xlu1 %2568 }
 0xca8   :  { %v2558_v12 = vadd.f32 %v2556_v26, %v2552_v46  ;;  %v2791_v26 = vmul.f32 %v6172_v39, %v5716_v51 }
 0xcaa   :  { %v2571_v5 = vsel %vm317_vm6, %v2558_v12, %v2569_v49  ;;  %v2996_v49 = vmul.f32 %v6160_v20, %v5614_v7 }
 0xcab   :  { %5079 = vmatmul.mubr.msk.f32.vlgmr.msra.gmra.mxu1 %vm354_vm5, %v2571_v5  ;;  %v2788_v29 = vpop.permute.xlu1 %2787  ;;  %v3003_v5 = vmul.f32 %v6160_v20, %v5624_v11 }
 0xcac   :  { %5083 = vmatprep.mubr.msk.f32.mxu1 %vm5370_vm4, %v5348_v3  ;;  %v2790_v45 = vadd.f32 %v2788_v29, %v2784_v22  ;;  %v3430_v29 = vmul.f32 %v6158_v38, %v5580_v56  ;;  %v3418_v22 = vmul.f32 %v6158_v38, %v5582_v57  ;;  %v3649_v56 = vmul.f32 %v6158_v38, %v5588_v60 }
 0xcad   :  { %v3860_v57 = vmul.f32 %v6158_v38, %v5624_v11  ;;  %v4071_v60 = vmul.f32 %v6158_v38, %v5666_v31 }
 0xcaf   :  { %v2795_v35 = vpop.permute.xlu1 %2794 }
 0xcb0   :  { %v2797_v12 = vadd.f32 %v2795_v35, %v2791_v26  ;;  %v3437_v35 = vmul.f32 %v6158_v38, %v5586_v59  ;;  %v3626_v59 = vmul.f32 %v6158_v38, %v5610_v6  ;;  %v4048_v6 = vmul.f32 %v6158_v38, %v5678_v37 }
 0xcb3   :  { %v2765_v17 = vpop.permute.xlu1 %2764 }
 0xcb4   :  { %v2767_v10 = vadd.f32 %v2765_v17, %v2761_v14  ;;  %v3642_v17 = vmul.f32 %v6158_v38, %v5584_v58  ;;  %v3837_v58 = vmul.f32 %v6158_v38, %v5652_v24 }
 0xcb7   :  { %v2772_v40 = vpop.permute.xlu1 %2771 }
 0xcb8   :  { %v2774_v41 = vadd.f32 %v2772_v40, %v2768_v13  ;;  %v3002_v13 = vmul.f32 %v6172_v39, %v5726_v62 }
 0xd6b   :  { %v2667_v61 = vpop.f32.mrf.mxu1 }
 0xd6c   :  { %v2671_v15 = vmul.f32 0.35355338, %v2667_v61  ;;  %v2973_v61 = vmul.f32 %v6160_v20, %v5650_v23 }
 0xd6d   :  { %v5080_v48 = vpop.f32.mrf.mxu1 }
 0xd6e   :  { %v2672_v43 = vsel %vm5908_vm7, %v2671_v15, -inf  ;;  %v2980_v15 = vmul.f32 %v6160_v20, %v5652_v24  ;;  %v3207_v48 = vmul.f32 %v6160_v20, %v5664_v30  ;;  %v2995_v24 = vmul.f32 %v6160_v20, %v5724_v55 }
 0xd6f   :  { %v2673_v19 = vsel %vm354_vm5, %v2672_v43, -inf }
 0xd70   :  { %2674 = vmax.xlane.f32.xlu0 %v2673_v19  ;;  %v3184_v19 = vmul.f32 %v6160_v20, %v5676_v36 }
 0xd86   :  { %2685 = vrot.lane.b32.xlu0 %v6160_v20, %s5379_s23 }
 0xd8a   :  { %2799 = vrot.lane.b32.xlu0 %v2790_v45, %s6702_s11 }
 0xd8e   :  { %2776 = vrot.lane.b32.xlu0 %v2767_v10, %s6703_s8 }
 0xd92   :  { %2780 = vrot.lane.b32.xlu0 %v2774_v41, %s5364_s5 }
 0xdf9   :  { %v2675_v27 = vpop.xlane.xlu0 %2674 }
 0xdfa   :  { %v2676_v25 = vsub.f32 %v2672_v43, %v2675_v27  ;;  %v3214_v43 = vmul.f32 %v6160_v20, %v5666_v31 }
 0xdfc   :  { %v2677_v16 = vmul.f32 1.442695, %v2676_v25 }
 0xdfd   :  { %v2686_v42 = vpop.permute.xlu0 %2685 }
 0xdfe   :  { %5299 = vpow2.f32 %v2677_v16  ;;  %5082 = vmatpush3.msra.mxu1 %v2686_v42  ;;  %v2972_v16 = vmul.f32 %v6160_v20, %v5728_v63 }
 0xdff   :  { %5086 = vmatprep.subr.mxu1 %v5348_v3 }
 0xe01   :  { %v2800_v14 = vpop.permute.xlu0 %2799 }
 0xe05   :  { %v2777_v31 = vpop.permute.xlu0 %2776 }
 0xe09   :  { %v2781_v26 = vpop.permute.xlu0 %2780 }
 0xe0b   :  { %v5300_v34 = vpop.eup %5299 }
 0xe0c   :  { %v2679_v46 = vsel %vm354_vm5, %v5300_v34, 0.0 }
 0xe0d   :  { %2680 = vadd.xlane.f32.xlu1 %v2679_v46 }
 0xe1e   :  { %2803 = vrot.lane.b32.xlu1 %v2797_v12, %s6704_s24 }
 0xe22   :  { %2998 = vrot.lane.b32.xlu1 %v2996_v49, %s5364_s5 }
 0xe26   :  { %3005 = vrot.lane.b32.xlu1 %v3003_v5, %s5364_s5  ;;  %v2979_v5 = vmul.f32 %v6172_v39, %v5730_v0 }
 0xe2a   :  { %2975 = vrot.lane.b32.xlu1 %v2973_v61, %s5364_s5 }
 0xe2e   :  { %2982 = vrot.lane.b32.xlu1 %v2980_v15, %s5364_s5 }
 0xe32   :  { %3209 = vrot.lane.b32.xlu1 %v3207_v48, %s5364_s5  ;;  %v3206_v48 = vmul.f32 %v6160_v20, %v5732_v1 }
 0xe36   :  { %3216 = vrot.lane.b32.xlu1 %v3214_v43, %s5364_s5 }
 0xe3a   :  { %3186 = vrot.lane.b32.xlu1 %v3184_v19, %s5364_s5 }
 0xe3e   :  { %3432 = vrot.lane.b32.xlu1 %v3430_v29, %s5364_s5  ;;  %v3213_v29 = vmul.f32 %v6172_v39, %v5734_v4 }
 0xe42   :  { %3439 = vrot.lane.b32.xlu1 %v3437_v35, %s5364_s5 }
 0xe46   :  { %3420 = vrot.lane.b32.xlu1 %v3418_v22, %s5364_s5 }
 0xe4a   :  { %3644 = vrot.lane.b32.xlu1 %v3642_v17, %s5364_s5  ;;  %v3183_v17 = vmul.f32 %v6160_v20, %v5739_v8 }
 0xe4e   :  { %3651 = vrot.lane.b32.xlu1 %v3649_v56, %s5364_s5 }
 0xe52   :  { %3628 = vrot.lane.b32.xlu1 %v3626_v59, %s5364_s5 }
 0xe56   :  { %3862 = vrot.lane.b32.xlu1 %v3860_v57, %s5364_s5  ;;  %v3429_v57 = vmul.f32 %v6158_v38, %v5696_v44 }
 0xe5a   :  { %3839 = vrot.lane.b32.xlu1 %v3837_v58, %s5364_s5  ;;  %v3416_v58 = vsub.f32 0.0, %v6158_v38 }
 0xe5e   :  { %4073 = vrot.lane.b32.xlu1 %v4071_v60, %s5364_s5 }
 0xe62   :  { %4050 = vrot.lane.b32.xlu1 %v4048_v6, %s5364_s5 }
 0xe66   :  { %2896 = vrot.lane.b32.xlu1 %v6160_v20, %s5362_s28 }
 0xe96   :  { %v2681_v11 = vpop.xlane.xlu1 %2680 }
 0xe97   :  { %5301 = vrcp.f32 %v2681_v11  ;;  %v3436_v11 = vmul.f32 %v3416_v58, %v5714_v50 }
 0xe9a   :  { %v2804_v45 = vpop.permute.xlu1 %2803 }
 0xe9b   :  { %v2806_v12 = vsel %vm317_vm6, %v2800_v14, %v2804_v45 }
 0xe9e   :  { %v2999_v10 = vpop.permute.xlu1 %2998 }
 0xe9f   :  { %v3001_v40 = vadd.f32 %v2999_v10, %v2995_v24  ;;  %v3410_v10 = vmul.f32 %v6158_v38, %v5706_v47  ;;  %v3625_v47 = vmul.f32 %v3416_v58, %v5722_v54 }
 0xea1   :  { %3010 = vrot.lane.b32.xlu1 %v3001_v40, %s5372_s6  ;;  %v3417_v40 = vmul.f32 %v3416_v58, %v5546_v32 }
 0xea2   :  { %v3006_v41 = vpop.permute.xlu1 %3005 }
 0xea3   :  { %v3008_v27 = vadd.f32 %v3006_v41, %v3002_v13  ;;  %v3641_v13 = vmul.f32 %v6158_v38, %v5718_v52 }
 0xea4   :  { %v5302_v25 = vpop.eup %5301 }
 0xea5   :  { %3014 = vrot.lane.b32.xlu1 %v3008_v27, %s6705_s26  ;;  %v2683_v42 = vmul.f32 %v5302_v25, %v5300_v34  ;;  %v2783_v34 = vsel %vm317_vm6, %v2777_v31, %v2781_v26  ;;  %v3648_v27 = vmul.f32 %v3416_v58, %v5716_v51 }
 0xea6   :  { %v2976_v46 = vpop.permute.xlu1 %2975 }
 0xea7   :  { %v2978_v49 = vadd.f32 %v2976_v46, %v2972_v16  ;;  %5084 = vmatmul.mubr.msk.f32.vlgmr.msra.gmra.mxu1 %vm354_vm5, %v2683_v42  ;;  %v3859_v46 = vmul.f32 %v3416_v58, %v5726_v62 }
 0xea8   :  { %5087 = vmatpush3.xpose.msk.msra.mxu1 %vm354_vm5, %v2806_v12  ;;  %5088 = vmatprep.mubr.msk.f32.mxu1 %vm5370_vm4, %v5348_v3  ;;  %v3836_v12 = vmul.f32 %v3416_v58, %v5730_v0 }
 0xea9   :  { %2987 = vrot.lane.b32.xlu1 %v2978_v49, %s6706_s4  ;;  %5091 = vmatprep.subr.mxu1 %v5348_v3 }
 0xeaa   :  { %v2983_v61 = vpop.permute.xlu1 %2982 }
 0xeab   :  { %v2985_v15 = vadd.f32 %v2983_v61, %v2979_v5  ;;  %5089 = vmatmul.mubr.msk.f32.vlgmr.msra.gmra.mxu1 %vm354_vm5, %v2783_v34  ;;  %v4070_v5 = vmul.f32 %v3416_v58, %v5734_v4  ;;  %v4047_v61 = vmul.f32 %v3416_v58, %v5741_v9 }
 0xeac   :  { %5093 = vmatprep.mubr.msk.f32.mxu1 %vm5370_vm4, %v5348_v3 }
 0xead   :  { %2991 = vrot.lane.b32.xlu1 %v2985_v15, %s6707_s10 }
 0xeae   :  { %v3210_v43 = vpop.permute.xlu1 %3209 }
 0xeaf   :  { %v3212_v19 = vadd.f32 %v3210_v43, %v3206_v48 }
 0xeb1   :  { %3221 = vrot.lane.b32.xlu1 %v3212_v19, %s6708_s19 }
 0xeb2   :  { %v3217_v35 = vpop.permute.xlu1 %3216 }
 0xeb3   :  { %v3219_v22 = vadd.f32 %v3217_v35, %v3213_v29 }
 0xeb5   :  { %3225 = vrot.lane.b32.xlu1 %v3219_v22, %s6709_s21 }
 0xeb6   :  { %v3187_v56 = vpop.permute.xlu1 %3186 }
 0xeb7   :  { %v3189_v59 = vadd.f32 %v3187_v56, %v3183_v17 }
 0xeb9   :  { %3198 = vrot.lane.b32.xlu1 %v3189_v59, %s6710_s29 }
 0xeba   :  { %v3433_v60 = vpop.permute.xlu1 %3432 }
 0xebb   :  { %v3435_v6 = vadd.f32 %v3433_v60, %v3429_v57 }
 0xebd   :  { %3444 = vrot.lane.b32.xlu1 %v3435_v6, %s5366_s3 }
 0xebe   :  { %v3440_v45 = vpop.permute.xlu1 %3439 }
 0xebf   :  { %v3442_v14 = vadd.f32 %v3440_v45, %v3436_v11  ;;  %v3191_v45 = vmul.f32 %v6160_v20, %v5678_v37  ;;  %v4064_v37 = vmul.f32 %v6158_v38, %v5664_v30  ;;  %v3190_v30 = vmul.f32 %v6172_v39, %v5741_v9 }
 0xec1   :  { %3448 = vrot.lane.b32.xlu1 %v3442_v14, %s5365_s1  ;;  %v3619_v14 = vmul.f32 %v6158_v38, %v5602_v2  ;;  %v4041_v2 = vmul.f32 %v6158_v38, %v5676_v36  ;;  %v3618_v36 = vmul.f32 %v6158_v38, %v5720_v53  ;;  %v4063_v53 = vmul.f32 %v6158_v38, %v5732_v1  ;;  %s6713_s1 = smov 48  }
 0xec2   :  { %v3421_v24 = vpop.permute.xlu1 %3420 }
 0xec3   :  { %v3423_v31 = vadd.f32 %v3421_v24, %v3417_v40  ;;  %v3853_v24 = vmul.f32 %v6158_v38, %v5614_v7 }
 0xec5   :  { %3412 = vrot.lane.b32.xlu1 %v3410_v10, %s5364_s5  ;;  %v3830_v10 = vmul.f32 %v6158_v38, %v5650_v23 }
 0xec6   :  { %v3645_v44 = vpop.permute.xlu1 %3644 }
 0xec7   :  { %v3647_v41 = vadd.f32 %v3645_v44, %v3641_v13 }
 0xec9   :  { %3425 = vrot.lane.b32.xlu1 %v3423_v31, %s5350_s20  ;;  %s6711_s20 = smov 108  }
 0xeca   :  { %v3652_v50 = vpop.permute.xlu1 %3651 }
 0xecb   :  { %v3654_v16 = vadd.f32 %v3652_v50, %v3648_v27 }
 0xecd   :  { %3656 = vrot.lane.b32.xlu1 %v3647_v41, %s6702_s11 }
 0xece   :  { %v3629_v25 = vpop.permute.xlu1 %3628 }
 0xecf   :  { %v3631_v42 = vadd.f32 %v3629_v25, %v3625_v47  ;;  %v3852_v47 = vmul.f32 %v6158_v38, %v5724_v55  ;;  %v4040_v55 = vmul.f32 %v6158_v38, %v5739_v8 }
 0xed1   :  { %3660 = vrot.lane.b32.xlu1 %v3654_v16, %s6704_s24 }
 0xed2   :  { %v3863_v32 = vpop.permute.xlu1 %3862 }
 0xed3   :  { %v3865_v26 = vadd.f32 %v3863_v32, %v3859_v46 }
 0xed5   :  { %3637 = vrot.lane.b32.xlu1 %v3631_v42, %s5364_s5  ;;  %v3829_v42 = vmul.f32 %v6158_v38, %v5728_v63 }
 0xed6   :  { %v3840_v52 = vpop.permute.xlu1 %3839 }
 0xed7   :  { %v3842_v49 = vadd.f32 %v3840_v52, %v3836_v12 }
 0xed9   :  { %3871 = vrot.lane.b32.xlu1 %v3865_v26, %s6705_s26 }
 0xeda   :  { %v4074_v51 = vpop.permute.xlu1 %4073 }
 0xedb   :  { %v4076_v34 = vadd.f32 %v4074_v51, %v4070_v5 }
 0xedd   :  { %3848 = vrot.lane.b32.xlu1 %v3842_v49, %s6707_s10 }
 0xede   :  { %v4051_v54 = vpop.permute.xlu1 %4050 }
 0xedf   :  { %v4053_v15 = vadd.f32 %v4051_v54, %v4047_v61 }
 0xee1   :  { %4082 = vrot.lane.b32.xlu1 %v4076_v34, %s6709_s21 }
 0xee2   :  { %v2897_v62 = vpop.permute.xlu1 %2896 }
 0xee3   :  { %5092 = vmatpush3.msra.mxu1 %v2897_v62 }
 0xee4   :  { %5096 = vmatprep.subr.mxu1 %v5348_v3 }
 0xee5   :  { %4059 = vrot.lane.b32.xlu1 %v4053_v15, %s6711_s20  ;;  %v3409_v15 = vmul.f32 %v6158_v38, %v5548_v33 }
 0xf13   :  { %v3011_v0 = vpop.permute.xlu1 %3010 }
 0xf17   :  { %v3015_v48 = vpop.permute.xlu1 %3014 }
 0xf18   :  { %v6338_v43 = vsel %vm317_vm6, %v3011_v0, %v3015_v48 }
 0xf1b   :  { %v2988_v4 = vpop.permute.xlu1 %2987 }
 0xf1f   :  { %v2992_v19 = vpop.permute.xlu1 %2991 }
 0xf20   :  { %v6341_v29 = vsel %vm317_vm6, %v2988_v4, %v2992_v19 }
 0xf23   :  { %v3222_v35 = vpop.permute.xlu1 %3221 }
 0xf27   :  { %v3226_v22 = vpop.permute.xlu1 %3225 }
 0xf28   :  { %v3228_v17 = vsel %vm317_vm6, %v3222_v35, %v3226_v22 }
 0xf29   :  { %5107 = vmatpush3.xpose.msk.msra.mxu0 %vm354_vm5, %v3228_v17 }
 0xf2a   :  { %5116 = vmatprep.subr.mxu0 %v5348_v3 }
 0xf2b   :  { %v3199_v63 = vpop.permute.xlu1 %3198 }
 0xf2f   :  { %v3445_v12 = vpop.permute.xlu1 %3444 }
 0xf33   :  { %v3449_v51 = vpop.permute.xlu1 %3448 }
 0xf34   :  { %v3451_v0 = vsel %vm317_vm6, %v3445_v12, %v3449_v51 }
 0xf37   :  { %v3413_v49 = vpop.permute.xlu1 %3412 }
 0xf38   :  { %v3415_v4 = vadd.f32 %v3413_v49, %v3409_v15 }
 0xf3b   :  { %v3426_v5 = vpop.permute.xlu1 %3425 }
 0xf3c   :  { %v3428_v35 = vsel %vm317_vm6, %v3415_v4, %v3426_v5 }
 0xf3f   :  { %v3657_v54 = vpop.permute.xlu1 %3656 }
 0xf43   :  { %v3661_v34 = vpop.permute.xlu1 %3660 }
 0xf44   :  { %v3663_v33 = vsel %vm317_vm6, %v3657_v54, %v3661_v34 }
 0xf47   :  { %v3638_v1 = vpop.permute.xlu1 %3637 }
 0xf4b   :  { %v3872_v48 = vpop.permute.xlu1 %3871 }
 0xf4f   :  { %v3849_v22 = vpop.permute.xlu1 %3848 }
 0xf67   :  { %v6346_v56 = vpop.f32.mrf.mxu1 }
 0xf69   :  { %v5085_v59 = vpop.f32.mrf.mxu1 }
 0xf6b   :  { %v2879_v57 = vpop.f32.mrf.mxu1 }
 0xf6c   :  { %v2883_v58 = vmul.f32 0.35355338, %v2879_v57 }
 0xf6d   :  { %v5090_v60 = vpop.f32.mrf.mxu1 }
 0xf6e   :  { %v2884_v6 = vsel %vm5908_vm7, %v2883_v58, -inf }
 0xf6f   :  { %v2885_v11 = vsel %vm354_vm5, %v2884_v6, -inf }
 0xf70   :  { %2886 = vmax.xlane.f32.xlu0 %v2885_v11 }
 0xf86   :  { %3193 = vrot.lane.b32.xlu0 %v3191_v45, %s5364_s5  ;;  %v4083_v45 = vpop.permute.xlu1 %4082 }
 0xf8a   :  { %3621 = vrot.lane.b32.xlu0 %v3619_v14, %s5364_s5 }
 0xf8e   :  { %3855 = vrot.lane.b32.xlu0 %v3853_v24, %s5364_s5 }
 0xf92   :  { %3832 = vrot.lane.b32.xlu0 %v3830_v10, %s5364_s5 }
 0xf96   :  { %4066 = vrot.lane.b32.xlu0 %v4064_v37, %s5364_s5 }
 0xf9a   :  { %4043 = vrot.lane.b32.xlu0 %v4041_v2, %s5364_s5  ;;  %s6712_s5 = smov 40  }
 0xff9   :  { %v2887_v40 = vpop.xlane.xlu0 %2886 }
 0xffa   :  { %v2888_v44 = vsub.f32 %v2884_v6, %v2887_v40 }
 0xffc   :  { %v2889_v7 = vmul.f32 1.442695, %v2888_v44 }
 0xffd   :  { %v3194_v23 = vpop.permute.xlu0 %3193 }
 0xffe   :  { %5303 = vpow2.f32 %v2889_v7  ;;  %v3196_v27 = vadd.f32 %v3194_v23, %v3190_v30 }
0x1001   :  { %v3622_v50 = vpop.permute.xlu0 %3621 }
0x1002   :  { %v3624_v25 = vadd.f32 %v3622_v50, %v3618_v36 }
0x1005   :  { %v3856_v41 = vpop.permute.xlu0 %3855 }
0x1006   :  { %v3858_v32 = vadd.f32 %v3856_v41, %v3852_v47 }
0x1009   :  { %v3833_v16 = vpop.permute.xlu0 %3832 }
0x100a   :  { %v3835_v39 = vadd.f32 %v3833_v16, %v3829_v42 }
0x100b   :  { %v5304_v31 = vpop.eup %5303 }
0x100c   :  { %v2891_v13 = vsel %vm354_vm5, %v5304_v31, 0.0 }
0x100d   :  { %2892 = vadd.xlane.f32.xlu0 %v2891_v13  ;;  %v4067_v9 = vpop.permute.xlu0 %4066 }
0x100e   :  { %v4069_v46 = vadd.f32 %v4067_v9, %v4063_v53 }
0x1011   :  { %v4044_v52 = vpop.permute.xlu0 %4043 }
0x1012   :  { %v4046_v26 = vadd.f32 %v4044_v52, %v4040_v55 }
0x1023   :  { %3202 = vrot.lane.b32.xlu0 %v3196_v27, %s6711_s20 }
0x1027   :  { %3633 = vrot.lane.b32.xlu0 %v3624_v25, %s6703_s8 }
0x102b   :  { %3867 = vrot.lane.b32.xlu0 %v3858_v32, %s5372_s6 }
0x102f   :  { %3844 = vrot.lane.b32.xlu0 %v3835_v39, %s6706_s4 }
0x1033   :  { %4078 = vrot.lane.b32.xlu0 %v4069_v46, %s6708_s19 }
0x1037   :  { %4055 = vrot.lane.b32.xlu0 %v4046_v26, %s6710_s29 }
0x1096   :  { %v2893_v61 = vpop.xlane.xlu0 %2892 }
0x1097   :  { %5305 = vrcp.f32 %v2893_v61 }
0x109a   :  { %v3203_v62 = vpop.permute.xlu0 %3202 }
0x109b   :  { %v3205_v8 = vsel %vm317_vm6, %v3199_v63, %v3203_v62 }
0x109c   :  { %5109 = vmatmul.mubr.msk.f32.vlgmr.msra.gmra.mxu0 %vm354_vm5, %v3205_v8 }
0x109d   :  { %5117 = vmatpush3.xpose.msk.msra.mxu0 %vm354_vm5, %v3451_v0  ;;  %5118 = vmatprep.mubr.msk.f32.mxu0 %vm5370_vm4, %v5348_v3 }
0x109e   :  { %v3634_v19 = vpop.permute.xlu0 %3633  ;;  %5126 = vmatprep.subr.mxu0 %v5348_v3 }
0x109f   :  { %v3640_v59 = vsel %vm317_vm6, %v3634_v19, %v3638_v1 }
0x10a0   :  { %5119 = vmatmul.mubr.msk.f32.vlgmr.msra.gmra.mxu0 %vm354_vm5, %v3428_v35 }
0x10a1   :  { %5127 = vmatpush3.xpose.msk.msra.mxu0 %vm354_vm5, %v3663_v33  ;;  %5128 = vmatprep.mubr.msk.f32.mxu0 %vm5370_vm4, %v5348_v3 }
0x10a2   :  { %v3868_v17 = vpop.permute.xlu0 %3867  ;;  %5136 = vmatprep.subr.mxu0 %v5348_v3 }
0x10a3   :  { %v3874_v57 = vsel %vm317_vm6, %v3868_v17, %v3872_v48 }
0x10a4   :  { %v5306_v58 = vpop.eup %5305  ;;  %5129 = vmatmul.mubr.msk.f32.vlgmr.msra.gmra.mxu0 %vm354_vm5, %v3640_v59 }
0x10a5   :  { %5137 = vmatpush3.xpose.msk.msra.mxu0 %vm354_vm5, %v3874_v57  ;;  %v2895_v60 = vmul.f32 %v5306_v58, %v5304_v31  ;;  %5138 = vmatprep.mubr.msk.f32.mxu0 %vm5370_vm4, %v5348_v3 }
0x10a6   :  { %v3845_v6 = vpop.permute.xlu0 %3844  ;;  %5146 = vmatprep.subr.mxu0 %v5348_v3 }
0x10a7   :  { %v3851_v11 = vsel %vm317_vm6, %v3845_v6, %v3849_v22  ;;  %5094 = vmatmul.mubr.msk.f32.vlgmr.msra.gmra.mxu1 %vm354_vm5, %v2895_v60 }
0x10a8   :  { %5097 = vmatpush3.xpose.msk.msra.mxu1 %vm354_vm5, %v6338_v43  ;;  %5139 = vmatmul.mubr.msk.f32.vlgmr.msra.gmra.mxu0 %vm354_vm5, %v3851_v11  ;;  %v4060_v43 = vpop.permute.xlu1 %4059 }
0x10a9   :  { %5098 = vmatprep.mubr.msk.f32.mxu1 %vm5370_vm4, %v5348_v3  ;;  %5148 = vmatprep.mubr.msk.f32.mxu0 %vm5370_vm4, %v5348_v3 }
0x10aa   :  { %v4079_v14 = vpop.permute.xlu0 %4078  ;;  %5101 = vmatprep.subr.mxu1 %v5348_v3 }
0x10ab   :  { %v4085_v24 = vsel %vm317_vm6, %v4079_v14, %v4083_v45  ;;  %5099 = vmatmul.mubr.msk.f32.vlgmr.msra.gmra.mxu1 %vm354_vm5, %v6341_v29 }
0x10ac   :  { %5147 = vmatpush3.xpose.msk.msra.mxu0 %vm354_vm5, %v4085_v24  ;;  %5103 = vmatprep.mubr.msk.f32.mxu1 %vm5370_vm4, %v5348_v3 }
0x10ae   :  { %v4056_v10 = vpop.permute.xlu0 %4055 }
0x10af   :  { %v4062_v37 = vsel %vm317_vm6, %v4056_v10, %v4060_v43 }
0x10b0   :  { %5149 = vmatmul.mubr.msk.f32.vlgmr.msra.gmra.mxu0 %vm354_vm5, %v4062_v37 }
0x115c   :  { %v3301_v2 = vpop.f32.mrf.mxu0 }
0x115d   :  { %v3305_v40 = vmul.f32 0.35355338, %v3301_v2 }
0x115e   :  { %v5110_v44 = vpop.f32.mrf.mxu0 }
0x115f   :  { %v3306_v7 = vsel %vm5908_vm7, %v3305_v40, -inf }
0x1160   :  { %v3524_v31 = vpop.f32.mrf.mxu0  ;;  %v3307_v29 = vsel %vm354_vm5, %v3306_v7, -inf }
0x1161   :  { %3308 = vmax.xlane.f32.xlu1 %v3307_v29  ;;  %v3528_v16 = vmul.f32 0.35355338, %v3524_v31 }
0x1162   :  { %v5120_v13 = vpop.f32.mrf.mxu0 }
0x1163   :  { %v3529_v39 = vsel %vm5908_vm7, %v3528_v16, -inf }
0x1164   :  { %v3736_v23 = vpop.f32.mrf.mxu0  ;;  %v3530_v63 = vsel %vm354_vm5, %v3529_v39, -inf }
0x1165   :  { %v3740_v53 = vmul.f32 0.35355338, %v3736_v23 }
0x1166   :  { %v5130_v50 = vpop.f32.mrf.mxu0 }
0x1167   :  { %v6432_v30 = vpop.f32.mrf.mxu1  ;;  %v3741_v12 = vsel %vm5908_vm7, %v3740_v53, -inf }
0x1168   :  { %v3947_v41 = vpop.f32.mrf.mxu0  ;;  %v3742_v5 = vsel %vm354_vm5, %v3741_v12, -inf }
0x1169   :  { %v5095_v27 = vpop.f32.mrf.mxu1  ;;  %v3951_v51 = vmul.f32 0.35355338, %v3947_v41 }
0x116a   :  { %v5140_v36 = vpop.f32.mrf.mxu0 }
0x116b   :  { %v3090_v25 = vpop.f32.mrf.mxu1  ;;  %v3952_v54 = vsel %vm5908_vm7, %v3951_v51, -inf  ;;  %v4269_v51 = vld [vmem:[%s6658_s13 + $0x18] sm:$0xff] }
0x116c   :  { %v3094_v47 = vmul.f32 0.35355338, %v3090_v25  ;;  %v3953_v34 = vsel %vm354_vm5, %v3952_v54, -inf  ;;  %5156 = vmatprep.subr.mxu0 %v4269_v51 }
0x116d   :  { %v5100_v32 = vpop.f32.mrf.mxu1  ;;  %5157 = vmatpush3.msra.mxu0 %v4269_v51  ;;  %v4492_v51 = vld [vmem:[%s6661_s16 + $0x38] sm:$0xff] }
0x116e   :  { %v3095_v42 = vsel %vm5908_vm7, %v3094_v47, -inf }
0x116f   :  { %v3096_v9 = vsel %vm354_vm5, %v3095_v42, -inf }
0x1170   :  { %v4158_v46 = vpop.f32.mrf.mxu0  ;;  %3097 = vmax.xlane.f32.xlu0 %v3096_v9 }
0x1171   :  { %v4162_v52 = vmul.f32 0.35355338, %v4158_v46 }
0x1172   :  { %v5150_v55 = vpop.f32.mrf.mxu0 }
0x1173   :  { %v4163_v26 = vsel %vm5908_vm7, %v4162_v52, -inf }
0x1174   :  { %3531 = vmax.xlane.f32.xlu0 %v3530_v63  ;;  %v4164_v49 = vsel %vm354_vm5, %v4163_v26, -inf }
0x1175   :  { %4165 = vmax.xlane.f32.xlu1 %v4164_v49  ;;  %v4268_v49 = vld [vmem:[%s6658_s13 + $0x10] sm:$0xff] }
0x1176   :  { %5158 = vmatprep.subr.mxu0 %v4268_v49 }
0x1177   :  { %5159 = vmatpush3.msra.mxu0 %v4268_v49  ;;  %v4491_v49 = vld [vmem:[%s6661_s16 + $0x30] sm:$0xff] }
0x1178   :  { %3743 = vmax.xlane.f32.xlu0 %v3742_v5 }
0x117c   :  { %3954 = vmax.xlane.f32.xlu0 %v3953_v34  ;;  %v4267_v34 = vld [vmem:[%s6658_s13 + $0x8] sm:$0xff] }
0x117d   :  { %5160 = vmatprep.subr.mxu0 %v4267_v34 }
0x117e   :  { %5161 = vmatpush3.msra.mxu0 %v4267_v34  ;;  %v4488_v34 = vld [vmem:[%s6661_s16 + $0x18] sm:$0xff] }
0x11ea   :  { %v3309_v1 = vpop.xlane.xlu1 %3308 }
0x11eb   :  { %v3310_v61 = vsub.f32 %v3306_v7, %v3309_v1  ;;  %v4266_v1 = vld [vmem:[%s6658_s13] sm:$0xff] }
0x11ec   :  { %5162 = vmatprep.subr.mxu0 %v4266_v1 }
0x11ed   :  { %v3311_v62 = vmul.f32 1.442695, %v3310_v61  ;;  %5163 = vmatpush3.msra.mxu0 %v4266_v1  ;;  %v4487_v1 = vld [vmem:[%s6661_s16 + $0x10] sm:$0xff] }
0x11ef   :  { %5307 = vpow2.f32 %v3311_v62 }
0x11f9   :  { %v3098_v15 = vpop.xlane.xlu0 %3097 }
0x11fa   :  { %v3099_v17 = vsub.f32 %v3095_v42, %v3098_v15 }
0x11fc   :  { %v6449_v8 = vpop.eup %5307  ;;  %v3100_v6 = vmul.f32 1.442695, %v3099_v17 }
0x11fd   :  { %v3532_v0 = vpop.xlane.xlu0 %3531  ;;  %v3313_v48 = vsel %vm354_vm5, %v6449_v8, 0.0 }
0x11fe   :  { %v3533_v4 = vsub.f32 %v3529_v39, %v3532_v0  ;;  %3314 = vadd.xlane.f32.xlu1 %v3313_v48  ;;  %v4166_v19 = vpop.xlane.xlu1 %4165 }
0x11ff   :  { %v4167_v35 = vsub.f32 %v4163_v26, %v4166_v19 }
0x1200   :  { %v3534_v28 = vmul.f32 1.442695, %v3533_v4 }
0x1201   :  { %v3744_v33 = vpop.xlane.xlu0 %3743  ;;  %v4168_v59 = vmul.f32 1.442695, %v4167_v35 }
0x1202   :  { %5309 = vpow2.f32 %v3534_v28  ;;  %v3745_v22 = vsub.f32 %v3741_v12, %v3744_v33 }
0x1204   :  { %v3746_v57 = vmul.f32 1.442695, %v3745_v22 }
0x1205   :  { %v3955_v58 = vpop.xlane.xlu0 %3954 }
0x1206   :  { %5311 = vpow2.f32 %v3746_v57  ;;  %v3956_v60 = vsub.f32 %v3952_v54, %v3955_v58 }
0x1207   :  { %5313 = vpow2.f32 %v4168_v59 }
0x1208   :  { %v3957_v11 = vmul.f32 1.442695, %v3956_v60 }
0x120a   :  { %5315 = vpow2.f32 %v3957_v11 }
0x120b   :  { %5317 = vpow2.f32 %v3100_v6 }
0x120f   :  { %v5310_v45 = vpop.eup %5309 }
0x1210   :  { %v3536_v14 = vsel %vm354_vm5, %v5310_v45, 0.0 }
0x1211   :  { %3537 = vadd.xlane.f32.xlu0 %v3536_v14 }
0x1213   :  { %v5312_v24 = vpop.eup %5311 }
0x1214   :  { %v3748_v43 = vsel %vm354_vm5, %v5312_v24, 0.0  ;;  %v6455_v10 = vpop.eup %5313 }
0x1215   :  { %3749 = vadd.xlane.f32.xlu1 %v3748_v43  ;;  %v4170_v2 = vsel %vm354_vm5, %v6455_v10, 0.0 }
0x1217   :  { %v5316_v37 = vpop.eup %5315 }
0x1218   :  { %v3959_v40 = vsel %vm354_vm5, %v5316_v37, 0.0  ;;  %v5318_v44 = vpop.eup %5317 }
0x1219   :  { %4171 = vadd.xlane.f32.xlu1 %v4170_v2  ;;  %3960 = vadd.xlane.f32.xlu0 %v3959_v40  ;;  %v3102_v7 = vsel %vm354_vm5, %v5318_v44, 0.0 }
0x121d   :  { %3103 = vadd.xlane.f32.xlu0 %v3102_v7  ;;  %v4383_v7 = vld [vmem:[%s6659_s15 + $0x28] sm:$0xff] }
0x122a   :  { %3318 = vrot.lane.b32.xlu1 %v6160_v20, %s6712_s5 }
0x122e   :  { %3542 = vrot.lane.b32.xlu1 %v6158_v38, %s5379_s23 }
0x1232   :  { %3753 = vrot.lane.b32.xlu1 %v6158_v38, %s5362_s28 }
0x1233   :  { %3107 = vrot.lane.b32.xlu0 %v6160_v20, %s6713_s1 }
0x1236   :  { %4175 = vrot.lane.b32.xlu1 %v6158_v38, %s6712_s5 }
0x1237   :  { %3964 = vrot.lane.b32.xlu0 %v6158_v38, %s6713_s1 }
0x123b   :  { %3395 = vrot.lane.b32.xlu0 %v6432_v30, %s5359_s25 }
0x1287   :  { %v3315_v13 = vpop.xlane.xlu1 %3314 }
0x129a   :  { %v3538_v31 = vpop.xlane.xlu0 %3537 }
0x129e   :  { %v3750_v50 = vpop.xlane.xlu1 %3749 }
0x12a2   :  { %v3961_v29 = vpop.xlane.xlu0 %3960  ;;  %v4172_v20 = vpop.xlane.xlu1 %4171 }
0x12a6   :  { %v3104_v23 = vpop.xlane.xlu0 %3103  ;;  %v3319_v27 = vpop.permute.xlu1 %3318 }
0x12a7   :  { %5319 = vrcp.f32 %v3104_v23  ;;  %v4379_v23 = vld [vmem:[%s6659_s15 + $0x8] sm:$0xff] }
0x12a8   :  { %5321 = vrcp.f32 %v3315_v13  ;;  %v4380_v13 = vld [vmem:[%s6659_s15 + $0x10] sm:$0xff] }
0x12a9   :  { %5323 = vrcp.f32 %v3538_v31  ;;  %v4382_v31 = vld [vmem:[%s6659_s15 + $0x20] sm:$0xff] }
0x12aa   :  { %v3108_v41 = vpop.permute.xlu0 %3107  ;;  %5325 = vrcp.f32 %v3750_v50  ;;  %v3543_v30 = vpop.permute.xlu1 %3542  ;;  %v4378_v50 = vld [vmem:[%s6659_s15] sm:$0xff] }
0x12ab   :  { %5102 = vmatpush3.msra.mxu1 %v3108_v41  ;;  %5327 = vrcp.f32 %v3961_v29  ;;  %v4381_v29 = vld [vmem:[%s6659_s15 + $0x18] sm:$0xff] }
0x12ac   :  { %5111 = vmatprep.subr.mxu1 %v5348_v3  ;;  %5329 = vrcp.f32 %v4172_v20 }
0x12ae   :  { %v3754_v9 = vpop.permute.xlu1 %3753  ;;  %v3965_v46 = vpop.permute.xlu0 %3964 }
0x12b2   :  { %v4176_v26 = vpop.permute.xlu1 %4175  ;;  %v3396_v35 = vpop.permute.xlu0 %3395 }
0x12b3   :  { %v3406_v22 = vsel %vm354_vm5, %v6346_v56, %v3396_v35 }
0x12b4   :  { %v5320_v36 = vpop.eup %5319 }
0x12b5   :  { %v3106_v38 = vmul.f32 %v5320_v36, %v5318_v44  ;;  %v5322_v25 = vpop.eup %5321 }
0x12b6   :  { %v3317_v16 = vmul.f32 %v5322_v25, %v6449_v8  ;;  %v5324_v47 = vpop.eup %5323 }
0x12b7   :  { %5104 = vmatmul.mubr.msk.f32.vlgmr.msra.gmra.mxu1 %vm354_vm5, %v3106_v38  ;;  %v3540_v32 = vmul.f32 %v5324_v47, %v5310_v45  ;;  %v5326_v42 = vpop.eup %5325 }
0x12b8   :  { %5112 = vmatpush3.msra.mxu1 %v3319_v27  ;;  %5113 = vmatprep.mubr.msk.f32.mxu1 %vm5370_vm4, %v5348_v3  ;;  %v3752_v39 = vmul.f32 %v5326_v42, %v5312_v24  ;;  %v5328_v53 = vpop.eup %5327 }
0x12b9   :  { %5121 = vmatprep.subr.mxu1 %v5348_v3  ;;  %v3963_v52 = vmul.f32 %v5328_v53, %v5316_v37  ;;  %v5330_v55 = vpop.eup %5329  ;;  %v4500_v53 = vld [vmem:[%s6661_s16 + $0x78] sm:$0xff] }
0x12ba   :  { %v4174_v63 = vmul.f32 %v5330_v55, %v6455_v10  ;;  %5167 = vmatprep.subr.mxu0 %v4500_v53  ;;  %v4496_v55 = vld [vmem:[%s6661_s16 + $0x58] sm:$0xff] }
0x12bb   :  { %5114 = vmatmul.mubr.msk.f32.vlgmr.msra.gmra.mxu1 %vm354_vm5, %v3317_v16 }
0x12bc   :  { %5122 = vmatpush3.msra.mxu1 %v3543_v30  ;;  %5123 = vmatprep.mubr.msk.f32.mxu1 %vm5370_vm4, %v5348_v3 }
0x12bd   :  { %5131 = vmatprep.subr.mxu1 %v5348_v3 }
0x12bf   :  { %5124 = vmatmul.mubr.msk.f32.vlgmr.msra.gmra.mxu1 %vm354_vm5, %v3540_v32  ;;  %v4761_v32 = vld [vmem:[%s6660_s14] ss:$0 sm:$0xff] }
0x12c0   :  { %5132 = vmatpush3.msra.mxu1 %v3754_v9  ;;  %5133 = vmatprep.mubr.msk.f32.mxu1 %vm5370_vm4, %v5348_v3 }
0x12c1   :  { %5141 = vmatprep.subr.mxu1 %v5348_v3 }
0x12c3   :  { %5134 = vmatmul.mubr.msk.f32.vlgmr.msra.gmra.mxu1 %vm354_vm5, %v3752_v39 }
0x12c4   :  { %5142 = vmatpush3.msra.mxu1 %v3965_v46  ;;  %5143 = vmatprep.mubr.msk.f32.mxu1 %vm5370_vm4, %v5348_v3  ;;  %v4499_v46 = vld [vmem:[%s6661_s16 + $0x70] sm:$0xff] }
0x12c5   :  { %5151 = vmatprep.subr.mxu1 %v5348_v3 }
0x12c7   :  { %5144 = vmatmul.mubr.msk.f32.vlgmr.msra.gmra.mxu1 %vm354_vm5, %v3963_v52  ;;  %v4498_v52 = vld [vmem:[%s6661_s16 + $0x68] sm:$0xff] }
0x12c8   :  { %5152 = vmatpush3.msra.mxu1 %v4176_v26  ;;  %5153 = vmatprep.mubr.msk.f32.mxu1 %vm5370_vm4, %v5348_v3  ;;  %v4495_v26 = vld [vmem:[%s6661_s16 + $0x50] sm:$0xff] }
0x12cb   :  { %5154 = vmatmul.mubr.msk.f32.vlgmr.msra.gmra.mxu1 %vm354_vm5, %v4174_v63  ;;  %v4494_v63 = vld [vmem:[%s6661_s16 + $0x48] sm:$0xff] }
0x12cc   :  { %4456 = vmatprep.mubr.f32.mxu1 %v5348_v3 }
0x1377   :  { %v3179_v12 = vpop.f32.mrf.mxu1 }
0x1378   :  { %3399 = vrot.lane.b32.xlu1 %v3179_v12, %s5361_s27  ;;  %v4493_v12 = vld [vmem:[%s6661_s16 + $0x40] sm:$0xff] }
0x1379   :  { %v5105_v5 = vpop.f32.mrf.mxu1 }
0x137a   :  { %v4490_v5 = vld [vmem:[%s6661_s16 + $0x28] sm:$0xff] }
0x137b   :  { %v3390_v54 = vpop.f32.mrf.mxu1 }
0x137c   :  { %3403 = vrot.lane.b32.xlu1 %v3390_v54, %s6714_s30  ;;  %v4489_v54 = vld [vmem:[%s6661_s16 + $0x20] sm:$0xff] }
0x137d   :  { %v5115_v61 = vpop.f32.mrf.mxu1 }
0x137e   :  { %v4486_v61 = vld [vmem:[%s6661_s16 + $0x8] sm:$0xff] }
0x137f   :  { %v3614_v62 = vpop.f32.mrf.mxu1 }
0x1381   :  { %v5125_v15 = vpop.f32.mrf.mxu1 }
0x1383   :  { %v3825_v8 = vpop.f32.mrf.mxu1 }
0x1384   :  { %4252 = vrot.lane.b32.xlu0 %v3825_v8, %s5359_s25 }
0x1385   :  { %v5135_v0 = vpop.f32.mrf.mxu1 }
0x1387   :  { %v4036_v48 = vpop.f32.mrf.mxu1 }
0x1388   :  { %4256 = vrot.lane.b32.xlu0 %v4036_v48, %s5361_s27 }
0x1389   :  { %v5145_v4 = vpop.f32.mrf.mxu1 }
0x138b   :  { %v4247_v19 = vpop.f32.mrf.mxu1 }
0x138c   :  { %4260 = vrot.lane.b32.xlu1 %v4247_v19, %s6714_s30 }
0x138d   :  { %v5155_v28 = vpop.f32.mrf.mxu1 }
0x13ea   :  { %v3400_v33 = vpop.permute.xlu1 %3399 }
0x13eb   :  { %v3407_v17 = vsel %vm1269_vm8, %v3406_v22, %v3400_v33 }
0x13ee   :  { %v3404_v59 = vpop.permute.xlu1 %3403 }
0x13ef   :  { %v3408_v57 = vsel %vm1271_vm9, %v3407_v17, %v3404_v59 }
0x13f0   :  { %5164 = vmatprep.mubr.msk.f32.mxu0 %vm173_vm3, %v3408_v57 }
0x13f6   :  { %v4253_v58 = vpop.permute.xlu0 %4252 }
0x13f7   :  { %v4263_v6 = vsel %vm354_vm5, %v3614_v62, %v4253_v58  ;;  %v4485_v62 = vld [vmem:[%s6661_s16] sm:$0xff] }
0x13fa   :  { %v4257_v60 = vpop.permute.xlu0 %4256 }
0x13fb   :  { %v4264_v11 = vsel %vm1269_vm8, %v4263_v6, %v4257_v60 }
0x13fe   :  { %v4261_v45 = vpop.permute.xlu1 %4260 }
0x13ff   :  { %v4265_v14 = vsel %vm1271_vm9, %v4264_v11, %v4261_v45 }
0x1400   :  { %5165 = vmatmul.mubr.msk.f32.vlgmr.msra.gmra.mxu0 %vm173_vm3, %v4265_v14 }
0x1401   :  { %5168 = vmatpush3.msra.mxu0 %v4500_v53 }
0x1402   :  { %5169 = vmatprep.subr.mxu0 %v4499_v46 }
0x1403   :  { %5170 = vmatpush3.msra.mxu0 %v4499_v46 }
0x1404   :  { %5171 = vmatprep.subr.mxu0 %v4498_v52 }
0x1405   :  { %5172 = vmatpush3.msra.mxu0 %v4498_v52 }
0x14c0   :  { %v5166_v24 = vpop.f32.mrf.mxu0 }
0x14c1   :  { %v6526_v56 = vadd.f32 %v5166_v24, %v6125_v21  ;;  %v4385_v21 = vld [vmem:[%s6659_s15 + $0x38] sm:$0xff] }
0x14c2   :  { %v4342_v43 = vpop.f32.mrf.mxu0  ;;  %4416 = vmatprep.subr.mxu1 %v4385_v21  ;;  %v4605_v21 = vld [vmem:[%s6662_s2 + $0x10] sm:$0xff] }
0x14c3   :  { %v6529_v10 = vadd.f32 %v4342_v43, %v6128_v18  ;;  %v4355_v37 = vmul.f32 %v6526_v56, %v6526_v56  ;;  %v4384_v18 = vld [vmem:[%s6659_s15 + $0x30] sm:$0xff] }
0x14c4   :  { %4417 = vmatpush1.msra.mxu1 %v4384_v18 }
0x14c5   :  { %v4359_v2 = vsel %vm173_vm3, %v4355_v37, 0.0  ;;  %v4354_v40 = vmul.f32 %v6529_v10, %v6529_v10  ;;  %4418 = vmatprep.subr.mxu1 %v4383_v7 }
0x14c6   :  { %4360 = vadd.xlane.f32.xlu1 %v4359_v2  ;;  %4419 = vmatpush1.msra.mxu1 %v4382_v31 }
0x14c7   :  { %v4356_v44 = vsel %vm173_vm3, %v4354_v40, 0.0  ;;  %4420 = vmatprep.subr.mxu1 %v4381_v29 }
0x14c8   :  { %4357 = vadd.xlane.f32.xlu0 %v4356_v44  ;;  %4421 = vmatpush1.msra.mxu1 %v4380_v13  ;;  %v4606_v44 = vld [vmem:[%s6662_s2 + $0x18] sm:$0xff] }
0x14c9   :  { %4422 = vmatprep.subr.mxu1 %v4379_v23 }
0x14ca   :  { %4423 = vmatpush1.msra.mxu1 %v4378_v50 }
0x14cb   :  { %5202 = vmatprep.subr.mxu1 %v4606_v44 }
0x154f   :  { %v4361_v41 = vpop.xlane.xlu1 %4360 }
0x1550   :  { %v4363_v20 = vmul.f32 0.03125, %v4361_v41  ;;  %v4766_v41 = vld [vmem:[%s6663_s17] ss:$0 sm:$0xff] }
0x1551   :  { %v4358_v27 = vpop.xlane.xlu0 %4357 }
0x1552   :  { %v4365_v36 = vadd.f32 1.1920929e-07, %v4363_v20  ;;  %v4362_v38 = vmul.f32 0.03125, %v4358_v27 }
0x1554   :  { %v4364_v25 = vadd.f32 1.1920929e-07, %v4362_v38  ;;  %5331 = vrsqrt.f32 %v4365_v36 }
0x1556   :  { %5333 = vrsqrt.f32 %v4364_v25 }
0x1561   :  { %v5332_v30 = vpop.eup %5331 }
0x1562   :  { %v4369_v9 = vmul.f32 %v5332_v30, %v6526_v56 }
0x1563   :  { %v5334_v16 = vpop.eup %5333 }
0x1564   :  { %v4368_v47 = vmul.f32 %v5334_v16, %v6529_v10  ;;  %v4377_v39 = vmul.f32 %v4761_v32, %v4369_v9 }
0x1566   :  { %v4376_v42 = vmul.f32 %v4761_v32, %v4368_v47 }
0x1568   :  { %4762 = vmatmul.mubr.msk.f32.vlgmr.msra.gmra.mxu1 %vm173_vm3, %v4376_v42 }
0x1569   :  { %4462 = vmatprep.mubr.f32.mxu1 %v5348_v3  ;;  %v4497_v3 = vld [vmem:[%s6661_s16 + $0x60] sm:$0xff]  ;;  %5203 = vmatpush3.msra.mxu1 %v4606_v44 }
0x156a   :  { %5173 = vmatprep.subr.mxu0 %v4497_v3  ;;  %5204 = vmatprep.subr.mxu1 %v4605_v21 }
0x156b   :  { %5174 = vmatpush3.msra.mxu0 %v4497_v3  ;;  %5205 = vmatpush3.msra.mxu1 %v4605_v21 }
0x156c   :  { %4763 = vmatmul.mubr.msk.f32.gmra.mxu1 %vm173_vm3, %v4377_v39  ;;  %5175 = vmatprep.subr.mxu0 %v4496_v55 }
0x156d   :  { %5176 = vmatpush3.msra.mxu0 %v4496_v55 }
0x156e   :  { %5177 = vmatprep.subr.mxu0 %v4495_v26 }
0x156f   :  { %5178 = vmatpush3.msra.mxu0 %v4495_v26 }
0x1570   :  { %5179 = vmatprep.subr.mxu0 %v4494_v63 }
0x1571   :  { %5180 = vmatpush3.msra.mxu0 %v4494_v63 }
0x1572   :  { %5181 = vmatprep.subr.mxu0 %v4493_v12 }
0x1573   :  { %5182 = vmatpush3.msra.mxu0 %v4493_v12 }
0x1574   :  { %5183 = vmatprep.subr.mxu0 %v4492_v51 }
0x1575   :  { %5184 = vmatpush3.msra.mxu0 %v4492_v51 }
0x1576   :  { %5185 = vmatprep.subr.mxu0 %v4491_v49 }
0x1577   :  { %5186 = vmatpush3.msra.mxu0 %v4491_v49 }
0x1578   :  { %5187 = vmatprep.subr.mxu0 %v4490_v5 }
0x1579   :  { %5188 = vmatpush3.msra.mxu0 %v4490_v5 }
0x157a   :  { %5189 = vmatprep.subr.mxu0 %v4489_v54 }
0x157b   :  { %5190 = vmatpush3.msra.mxu0 %v4489_v54 }
0x157c   :  { %5191 = vmatprep.subr.mxu0 %v4488_v34 }
0x157d   :  { %5192 = vmatpush3.msra.mxu0 %v4488_v34 }
0x157e   :  { %5193 = vmatprep.subr.mxu0 %v4487_v1 }
0x157f   :  { %5194 = vmatpush3.msra.mxu0 %v4487_v1 }
0x1580   :  { %5195 = vmatprep.subr.mxu0 %v4486_v61 }
0x1581   :  { %5196 = vmatpush3.msra.mxu0 %v4486_v61 }
0x1582   :  { %5197 = vmatprep.subr.mxu0 %v4485_v62 }
0x1583   :  { %5198 = vmatpush3.msra.mxu0 %v4485_v62 }
0x1628   :  { %v4458_v15 = vpop.f32.mrf.mxu1 }
0x1629   :  { %v4764_v8 = vmul.f32 -1.442695, %v4458_v15 }
0x162a   :  { %v4460_v0 = vpop.f32.mrf.mxu1 }
0x162b   :  { %5335 = vpow2.f32 %v4764_v8 }
0x162c   :  { %v4464_v48 = vpop.f32.mrf.mxu1 }
0x162d   :  { %v4765_v4 = vmul.f32 -1.442695, %v4464_v48 }
0x162e   :  { %v4466_v60 = vpop.f32.mrf.mxu1 }
0x162f   :  { %5337 = vpow2.f32 %v4765_v4 }
0x1638   :  { %v5336_v19 = vpop.eup %5335 }
0x1639   :  { %v4475_v28 = vadd.f32 1.0, %v5336_v19 }
0x163b   :  { %5339 = vrcp.f32 %v4475_v28 }
0x163c   :  { %v5338_v35 = vpop.eup %5337 }
0x163d   :  { %v4476_v33 = vadd.f32 1.0, %v5338_v35 }
0x163f   :  { %5341 = vrcp.f32 %v4476_v33 }
0x1648   :  { %v5340_v22 = vpop.eup %5339 }
0x1649   :  { %v4481_v17 = vmul.f32 %v5340_v22, %v4458_v15 }
0x164b   :  { %v4483_v59 = vmul.f32 %v4481_v17, %v4460_v0 }
0x164c   :  { %v5342_v57 = vpop.eup %5341 }
0x164d   :  { %v4482_v58 = vmul.f32 %v5342_v57, %v4464_v48  ;;  %5199 = vmatprep.mubr.f32.mxu0 %v4483_v59 }
0x164f   :  { %v4484_v6 = vmul.f32 %v4482_v58, %v4466_v60 }
0x1651   :  { %5200 = vmatmul.mubr.f32.vlgmr.msra.gmra.mxu0 %v4484_v6 }
0x1711   :  { %v5201_v11 = vpop.f32.mrf.mxu0 }
0x1712   :  { %v4577_v14 = vadd.f32 %v5201_v11, %v6526_v56  ;;  %v4604_v56 = vld [vmem:[%s6662_s2 + $0x8] sm:$0xff] }
0x1713   :  { %v4567_v45 = vpop.f32.mrf.mxu0  ;;  %5206 = vmatprep.subr.mxu1 %v4604_v56 }
0x1714   :  { %v4576_v24 = vadd.f32 %v4567_v45, %v6529_v10  ;;  %v4580_v37 = vmul.f32 %v4577_v14, %v4577_v14  ;;  %5207 = vmatpush3.msra.mxu1 %v4604_v56  ;;  %v4603_v10 = vld [vmem:[%s6662_s2] sm:$0xff] }
0x1715   :  { %5208 = vmatprep.subr.mxu1 %v4603_v10 }
0x1716   :  { %v4579_v43 = vmul.f32 %v4576_v24, %v4576_v24  ;;  %v4584_v40 = vsel %vm173_vm3, %v4580_v37, 0.0  ;;  %5209 = vmatpush3.msra.mxu1 %v4603_v10 }
0x1718   :  { %v4581_v2 = vsel %vm173_vm3, %v4579_v43, 0.0 }
0x1719   :  { %4582 = vadd.xlane.f32.xlu0 %v4581_v2 }
0x171d   :  { %4585 = vadd.xlane.f32.xlu0 %v4584_v40 }
0x17a2   :  { %v4583_v18 = vpop.xlane.xlu0 %4582 }
0x17a3   :  { %v4587_v7 = vmul.f32 0.03125, %v4583_v18 }
0x17a5   :  { %v4589_v31 = vadd.f32 1.1920929e-07, %v4587_v7 }
0x17a6   :  { %v4586_v29 = vpop.xlane.xlu0 %4585 }
0x17a7   :  { %5343 = vrsqrt.f32 %v4589_v31  ;;  %v4588_v13 = vmul.f32 0.03125, %v4586_v29 }
0x17a9   :  { %v4590_v23 = vadd.f32 1.1920929e-07, %v4588_v13 }
0x17ab   :  { %5345 = vrsqrt.f32 %v4590_v23 }
0x17b4   :  { %v5344_v50 = vpop.eup %5343 }
0x17b5   :  { %v4593_v20 = vmul.f32 %v5344_v50, %v4576_v24 }
0x17b7   :  { %v4601_v27 = vmul.f32 %v4766_v41, %v4593_v20 }
0x17b8   :  { %v5346_v36 = vpop.eup %5345 }
0x17b9   :  { %v4594_v38 = vmul.f32 %v5346_v36, %v4577_v14  ;;  %5210 = vmatprep.mubr.msk.f32.mxu1 %vm173_vm3, %v4601_v27 }
0x17bb   :  { %v4602_v25 = vmul.f32 %v4766_v41, %v4594_v38 }
0x17bd   :  { %5211 = vmatmul.mubr.msk.f32.vlgmr.msra.gmra.mxu1 %vm173_vm3, %v4602_v25 }
0x187d   :  { %v5212_v30 = vpop.f32.mrf.mxu1 }
0x187e   :  { %4689 = vst.msk [vmem:[%s6664_s18 + $0x8] sm:$0xff] %vm83_vm0, %v5212_v30 }
0x187f   :  { %v4679_v16 = vpop.f32.mrf.mxu1 }
0x1880   :  { %4688 = vst.msk [vmem:[%s6664_s18] sm:$0xff] %vm83_vm0, %v4679_v16 }

</bundles_post_ra>
